<compile_context>
chip_gen: v7x
topology: tpu7x:2x2x1
jax: 0.10.0
libtpu: 0.0.40
codegen_flags: <defaults>
</compile_context>

<pallas_src>
import jax
import jax.numpy as jnp
from jax.experimental import pallas as pl
from jax.experimental.pallas import tpu as pltpu

# --- config (MDNRNNConfig, sized down for the demo; hidden=128 keeps lanes dense) ---
LATENT = 32
ACTION = 4
HIDDEN = 128
K = 5                       # num_mixtures
RNN_LAYERS = 1              # single-layer LSTM
TEMPERATURE = 1.0
LN_EPS = 1e-5
D_IN = LATENT + ACTION

B = 2
T = 8
B_PAD = 8                   # pad the recurrence batch to a full sublane tile
TBP = T * B_PAD

# fused MDN head layout (lane-aligned segments): [pi|pad -> 128 | mu 160 | sigma 160 | pad -> 512]
PI_SEG = 128
MU_SEG = K * LATENT         # 160
SIG_SEG = K * LATENT        # 160
HEAD_USED = PI_SEG + MU_SEG + SIG_SEG   # 448
HEAD_PAD = 512              # two 256-wide MXU passes on v6e/v7x


def _softplus(x):
    # numerically-stable softplus from ops that lower cleanly in Mosaic (exp/log/abs/max)
    return jnp.maximum(x, 0.0) + jnp.log(1.0 + jnp.exp(-jnp.abs(x)))


def mdn_rnn_kernel(x_ref,                       # (TBP, D_IN) f32, time-major padded rows
                   w_in_ref, b_in_ref,          # (D_IN, H) bf16, (1, H) f32
                   w_ih_ref, w_hh_ref,          # (H, 4H) bf16 each
                   b_lstm_ref,                  # (1, 4H) f32 (b_ih + b_hh)
                   gamma_ref, beta_ref,         # (1, H) f32
                   w_head_ref, b_head_ref,      # (H, HEAD_PAD) bf16, (1, HEAD_PAD) f32
                   heads_ref,                   # out: (TBP, HEAD_PAD) f32 packed
                   h_out_ref, c_out_ref,        # out: (B_PAD, H) f32 final LSTM state
                   gx_scr):                     # scratch: (T, B_PAD, 4H) f32
    # ---- hoisted, batched input path (off the serial chain) ----
    x = x_ref[...].astype(jnp.bfloat16)                                          # (TBP, D_IN)
    xp = jnp.dot(x, w_in_ref[...], preferred_element_type=jnp.float32) + b_in_ref[...]
    xp = jnp.maximum(xp, 0.0)                                                    # ReLU, (TBP, H)
    gates_x = (jnp.dot(xp.astype(jnp.bfloat16), w_ih_ref[...],
                       preferred_element_type=jnp.float32) + b_lstm_ref[...])    # (TBP, 4H)
    # park batched gate pre-activations in VMEM; each per-step slab is a full (8, 4H) tile
    gx_scr[...] = gates_x.reshape(T, B_PAD, 4 * HIDDEN)

    # ---- serial recurrence: only h @ W_hh + gate nonlinearities remain ----
    w_hh = w_hh_ref[...]                          # hoisted: single read of the 128 KB bf16 weight
    h = jnp.zeros((B_PAD, HIDDEN), jnp.float32)
    c = jnp.zeros((B_PAD, HIDDEN), jnp.float32)
    hs = []
    for t in range(T):                            # fully unrolled; all accesses tile-aligned
        g = gx_scr[t] + jnp.dot(h.astype(jnp.bfloat16), w_hh,
                                preferred_element_type=jnp.float32)              # (B_PAD, 4H)
        i_g = jax.nn.sigmoid(g[:, 0 * HIDDEN:1 * HIDDEN])    # PyTorch gate order i,f,g,o
        f_g = jax.nn.sigmoid(g[:, 1 * HIDDEN:2 * HIDDEN])
        g_g = jnp.tanh(g[:, 2 * HIDDEN:3 * HIDDEN])
        o_g = jax.nn.sigmoid(g[:, 3 * HIDDEN:4 * HIDDEN])
        c = f_g * c + i_g * g_g
        h = o_g * jnp.tanh(c)
        hs.append(h)

    h_out_ref[...] = h
    c_out_ref[...] = c

    # ---- epilogue on the full (TBP, H) slab (held as values, no scratch round-trip) ----
    rnn_out = jnp.concatenate(hs, axis=0)                                        # (TBP, H), tile-aligned
    mean = jnp.mean(rnn_out, axis=-1, keepdims=True)
    var = jnp.mean((rnn_out - mean) ** 2, axis=-1, keepdims=True)
    y = (rnn_out - mean) * jax.lax.rsqrt(var + LN_EPS) * gamma_ref[...] + beta_ref[...]

    # fused MDN heads: one (TBP,H)@(H,512) matmul -> lane-dense result tile
    heads = (jnp.dot(y.astype(jnp.bfloat16), w_head_ref[...],
                     preferred_element_type=jnp.float32) + b_head_ref[...])      # (TBP, HEAD_PAD)

    # pi softmax only over its own 128-lane segment (exact normalization -> sums to 1)
    pi_seg = heads[:, :PI_SEG]
    lane_pi = jax.lax.broadcasted_iota(jnp.int32, pi_seg.shape, 1)
    pi_logits = jnp.where(lane_pi < K, pi_seg * (1.0 / TEMPERATURE), -1e30)
    m = jnp.max(pi_logits, axis=-1, keepdims=True)
    e = jnp.exp(pi_logits - m)
    pi = e / jnp.sum(e, axis=-1, keepdims=True)

    rest = heads[:, PI_SEG:]                                                     # [mu | sigma | pad]
    lane_r = jax.lax.broadcasted_iota(jnp.int32, rest.shape, 1)
    rest_packed = jnp.where(lane_r < MU_SEG, rest,
                  jnp.where(lane_r < MU_SEG + SIG_SEG, _softplus(rest), 0.0))

    heads_ref[...] = jnp.concatenate([pi, rest_packed], axis=-1)                 # single lane-dense store


def mdn_rnn_forward(z, a, params):
    """z: (B, T, LATENT), a: (B, T, ACTION) -> (pi, mu, sigma, (h, c)) like PyTorch MDN_RNN."""
    x = jnp.concatenate([z, a], axis=-1).astype(jnp.float32)         # (B, T, D_IN)
    x_tm = jnp.transpose(x, (1, 0, 2))                               # (T, B, D_IN) time-major
    x_pad = jnp.zeros((T, B_PAD, D_IN), jnp.float32).at[:, :B].set(x_tm)
    x_rows = x_pad.reshape(TBP, D_IN)                                # padded rows are dead weight

    bf16 = lambda w: w.astype(jnp.bfloat16)

    # fused + lane-aligned padded head weight/bias: [w_pi|0 -> 128 | w_mu | w_sig | 0 -> 512]
    w_head = jnp.concatenate([
        jnp.pad(params["w_pi"], ((0, 0), (0, PI_SEG - K))),
        params["w_mu"], params["w_sig"],
    ], axis=1)
    w_head = jnp.pad(w_head, ((0, 0), (0, HEAD_PAD - HEAD_USED)))
    b_head = jnp.concatenate([
        jnp.pad(params["b_pi"], ((0, 0), (0, PI_SEG - K))),
        params["b_mu"], params["b_sig"],
    ], axis=1)
    b_head = jnp.pad(b_head, ((0, 0), (0, HEAD_PAD - HEAD_USED)))

    weight_args = (
        bf16(params["w_in"]), params["b_in"],
        bf16(params["w_ih"]), bf16(params["w_hh"]), params["b_lstm"],
        params["gamma"], params["beta"],
        bf16(w_head), b_head,
    )

    in_specs = [pl.BlockSpec((TBP, D_IN), lambda i: (0, 0))]
    in_specs += [pl.BlockSpec(w.shape, lambda i: (0, 0)) for w in weight_args]

    out_shapes = (
        jax.ShapeDtypeStruct((TBP, HEAD_PAD), jnp.float32),
        jax.ShapeDtypeStruct((B_PAD, HIDDEN), jnp.float32),
        jax.ShapeDtypeStruct((B_PAD, HIDDEN), jnp.float32),
    )
    out_specs = (
        pl.BlockSpec((TBP, HEAD_PAD), lambda i: (0, 0)),
        pl.BlockSpec((B_PAD, HIDDEN), lambda i: (0, 0)),
        pl.BlockSpec((B_PAD, HIDDEN), lambda i: (0, 0)),
    )

    heads, h_last, c_last = pl.pallas_call(
        mdn_rnn_kernel,
        out_shape=out_shapes,
        grid_spec=pltpu.PrefetchScalarGridSpec(
            num_scalar_prefetch=0,
            grid=(1,),                            # single grid step: recurrence runs in-kernel
            in_specs=in_specs,
            out_specs=out_specs,
            scratch_shapes=[pltpu.VMEM((T, B_PAD, 4 * HIDDEN), jnp.float32)],
        ),
        compiler_params=pltpu.CompilerParams(
            dimension_semantics=("arbitrary",)),
    )(x_rows, *weight_args)

    heads = heads.reshape(T, B_PAD, HEAD_PAD)[:, :B]                 # drop padded rows -> (T, B, 512)
    pi = jnp.transpose(heads[:, :, :K], (1, 0, 2))                   # (B, T, K)
    mu = jnp.transpose(heads[:, :, PI_SEG:PI_SEG + MU_SEG], (1, 0, 2)).reshape(B, T, K, LATENT)
    sigma = jnp.transpose(heads[:, :, PI_SEG + MU_SEG:PI_SEG + MU_SEG + SIG_SEG],
                          (1, 0, 2)).reshape(B, T, K, LATENT)
    hidden = (h_last[:B][None], c_last[:B][None])                    # (layers, B, H)
    return pi, mu, sigma, hidden


# ------------------------- deterministic parameter init -------------------------
def init_params(key):
    ks = jax.random.split(key, 16)

    def uni(k, shape, fan_in):
        bound = 1.0 / jnp.sqrt(jnp.float32(fan_in))
        return jax.random.uniform(k, shape, jnp.float32, -bound, bound)

    return {
        "w_in":  uni(ks[0], (D_IN, HIDDEN), D_IN),
        "b_in":  uni(ks[1], (1, HIDDEN), D_IN),
        # LSTM weights stored transposed (in_features, 4H); PyTorch gate order i,f,g,o
        "w_ih":  uni(ks[2], (HIDDEN, 4 * HIDDEN), HIDDEN),
        "w_hh":  uni(ks[3], (HIDDEN, 4 * HIDDEN), HIDDEN),
        "b_lstm": uni(ks[4], (1, 4 * HIDDEN), HIDDEN) + uni(ks[5], (1, 4 * HIDDEN), HIDDEN),
        "gamma": jnp.ones((1, HIDDEN), jnp.float32),
        "beta":  jnp.zeros((1, HIDDEN), jnp.float32),
        "w_pi":  uni(ks[6], (HIDDEN, K), HIDDEN),
        "b_pi":  uni(ks[7], (1, K), HIDDEN),
        "w_mu":  uni(ks[8], (HIDDEN, K * LATENT), HIDDEN),
        "b_mu":  uni(ks[9], (1, K * LATENT), HIDDEN),
        "w_sig": uni(ks[10], (HIDDEN, K * LATENT), HIDDEN),
        "b_sig": uni(ks[11], (1, K * LATENT), HIDDEN),
    }


# ------------------------- pure-JAX reference for checking -------------------------
def reference_forward(z, a, p):
    # same mixed-precision policy as the kernel: bf16 matmul operands, f32 accumulation
    def mm(x, w):
        return jnp.dot(x.astype(jnp.bfloat16), w.astype(jnp.bfloat16),
                       preferred_element_type=jnp.float32)

    x = jnp.concatenate([z, a], axis=-1)
    xp = jax.nn.relu(mm(x, p["w_in"]) + p["b_in"])            # (B, T, H)
    gx = mm(xp, p["w_ih"]) + p["b_lstm"]                      # (B, T, 4H)

    def step(carry, gx_t):
        h, c = carry
        gates = gx_t + mm(h, p["w_hh"])
        i = jax.nn.sigmoid(gates[:, :HIDDEN])
        f = jax.nn.sigmoid(gates[:, HIDDEN:2 * HIDDEN])
        g = jnp.tanh(gates[:, 2 * HIDDEN:3 * HIDDEN])
        o = jax.nn.sigmoid(gates[:, 3 * HIDDEN:])
        c = f * c + i * g
        h = o * jnp.tanh(c)
        return (h, c), h

    h0 = jnp.zeros((B, HIDDEN), jnp.float32)
    (h_l, c_l), hs = jax.lax.scan(step, (h0, h0), jnp.transpose(gx, (1, 0, 2)))
    rnn_out = jnp.transpose(hs, (1, 0, 2))                    # (B, T, H)
    mean = rnn_out.mean(-1, keepdims=True)
    var = ((rnn_out - mean) ** 2).mean(-1, keepdims=True)
    y = (rnn_out - mean) / jnp.sqrt(var + LN_EPS) * p["gamma"][0] + p["beta"][0]
    pi = jax.nn.softmax((mm(y, p["w_pi"]) + p["b_pi"]) / TEMPERATURE, axis=-1)
    mu = (mm(y, p["w_mu"]) + p["b_mu"]).reshape(B, T, K, LATENT)
    sigma = _softplus(mm(y, p["w_sig"]) + p["b_sig"]).reshape(B, T, K, LATENT)
    return pi, mu, sigma, (h_l[None], c_l[None])


if __name__ == "__main__":
    key = jax.random.PRNGKey(0)
    kp, kz, ka = jax.random.split(key, 3)
    params = init_params(kp)
    z = jax.random.normal(kz, (B, T, LATENT), jnp.float32)
    a = jax.random.normal(ka, (B, T, ACTION), jnp.float32)

    pi, mu, sigma, (h, c) = jax.block_until_ready(mdn_rnn_forward(z, a, params))

    pi_r, mu_r, sig_r, (h_r, c_r) = reference_forward(z, a, params)
    assert jnp.allclose(pi, pi_r, atol=2e-3, rtol=2e-3)
    assert jnp.allclose(mu, mu_r, atol=2e-3, rtol=2e-3)
    assert jnp.allclose(sigma, sig_r, atol=2e-3, rtol=2e-3)
    assert jnp.allclose(h, h_r, atol=2e-3, rtol=2e-3)
    assert jnp.allclose(c, c_r, atol=2e-3, rtol=2e-3)
    assert pi.shape == (B, T, K) and mu.shape == (B, T, K, LATENT) and sigma.shape == (B, T, K, LATENT)
    assert h.shape == (RNN_LAYERS, B, HIDDEN) and c.shape == (RNN_LAYERS, B, HIDDEN)
    # pi must be a proper mixture distribution (exact softmax normalization in-kernel)
    assert jnp.allclose(pi.sum(-1), jnp.ones((B, T)), atol=1e-5)

    print("KERNEL_OK")
</pallas_src>

<mosaic_0001>
module attributes {stable_mosaic.version = 11 : i64} {
  func.func @mdn_rnn_kernel(%arg0: i32, %arg1: memref<64x36xf32, #tpu.memory_space<vmem>>, %arg2: memref<36x128xbf16, #tpu.memory_space<vmem>>, %arg3: memref<1x128xf32, #tpu.memory_space<vmem>>, %arg4: memref<128x512xbf16, #tpu.memory_space<vmem>>, %arg5: memref<128x512xbf16, #tpu.memory_space<vmem>>, %arg6: memref<1x512xf32, #tpu.memory_space<vmem>>, %arg7: memref<1x128xf32, #tpu.memory_space<vmem>>, %arg8: memref<1x128xf32, #tpu.memory_space<vmem>>, %arg9: memref<128x512xbf16, #tpu.memory_space<vmem>>, %arg10: memref<1x512xf32, #tpu.memory_space<vmem>>, %arg11: memref<64x512xf32, #tpu.memory_space<vmem>>, %arg12: memref<8x128xf32, #tpu.memory_space<vmem>>, %arg13: memref<8x128xf32, #tpu.memory_space<vmem>>, %arg14: memref<8x8x512xf32, #tpu.memory_space<vmem>>) attributes {dimension_semantics = [#tpu.dimension_semantics<arbitrary>], iteration_bounds = array<i64: 1>, scalar_prefetch = 0 : i64, scratch_operands = 1 : i64, tpu.core_type = #tpu.core_type<tc>, window_params = [{pipeline_mode = #tpu.pipeline_mode<synchronous>, transform_indices = @transform_0, window_bounds = array<i64: 64, 36>}, {pipeline_mode = #tpu.pipeline_mode<synchronous>, transform_indices = @transform_1, window_bounds = array<i64: 36, 128>}, {pipeline_mode = #tpu.pipeline_mode<synchronous>, transform_indices = @transform_2, window_bounds = array<i64: 1, 128>}, {pipeline_mode = #tpu.pipeline_mode<synchronous>, transform_indices = @transform_3, window_bounds = array<i64: 128, 512>}, {pipeline_mode = #tpu.pipeline_mode<synchronous>, transform_indices = @transform_4, window_bounds = array<i64: 128, 512>}, {pipeline_mode = #tpu.pipeline_mode<synchronous>, transform_indices = @transform_5, window_bounds = array<i64: 1, 512>}, {pipeline_mode = #tpu.pipeline_mode<synchronous>, transform_indices = @transform_6, window_bounds = array<i64: 1, 128>}, {pipeline_mode = #tpu.pipeline_mode<synchronous>, transform_indices = @transform_7, window_bounds = array<i64: 1, 128>}, {pipeline_mode = #tpu.pipeline_mode<synchronous>, transform_indices = @transform_8, window_bounds = array<i64: 128, 512>}, {pipeline_mode = #tpu.pipeline_mode<synchronous>, transform_indices = @transform_9, window_bounds = array<i64: 1, 512>}, {pipeline_mode = #tpu.pipeline_mode<synchronous>, transform_indices = @transform_10, window_bounds = array<i64: 64, 512>}, {pipeline_mode = #tpu.pipeline_mode<synchronous>, transform_indices = @transform_11, window_bounds = array<i64: 8, 128>}, {pipeline_mode = #tpu.pipeline_mode<synchronous>, transform_indices = @transform_12, window_bounds = array<i64: 8, 128>}]} {
    %c0 = arith.constant 0 : index
    %c0_0 = arith.constant 0 : index
    %0 = vector.load %arg1[%c0, %c0_0] : memref<64x36xf32, #tpu.memory_space<vmem>>, vector<64x36xf32>
    %1 = arith.truncf %0 : vector<64x36xf32> to vector<64x36xbf16>
    %c0_1 = arith.constant 0 : index
    %c0_2 = arith.constant 0 : index
    %2 = vector.load %arg2[%c0_1, %c0_2] : memref<36x128xbf16, #tpu.memory_space<vmem>>, vector<36x128xbf16>
    %cst = arith.constant dense<0.000000e+00> : vector<64x128xf32>
    %3 = tpu.matmul %1, %2, %cst {dimension_numbers = #tpu.dot_dimension_numbers<[1], [0], [0], [1], [0, 0, 1, 1], [], []>} : vector<64x36xbf16>, vector<36x128xbf16>, vector<64x128xf32> -> vector<64x128xf32>
    %c0_3 = arith.constant 0 : index
    %c0_4 = arith.constant 0 : index
    %4 = vector.load %arg3[%c0_3, %c0_4] : memref<1x128xf32, #tpu.memory_space<vmem>>, vector<1x128xf32>
    %5 = vector.broadcast %4 : vector<1x128xf32> to vector<64x128xf32>
    %6 = arith.addf %3, %5 : vector<64x128xf32>
    %cst_5 = arith.constant 0.000000e+00 : f32
    %7 = vector.broadcast %cst_5 : f32 to vector<64x128xf32>
    %8 = arith.maximumf %6, %7 : vector<64x128xf32>
    %9 = arith.truncf %8 : vector<64x128xf32> to vector<64x128xbf16>
    %c0_6 = arith.constant 0 : index
    %c0_7 = arith.constant 0 : index
    %10 = vector.load %arg4[%c0_6, %c0_7] : memref<128x512xbf16, #tpu.memory_space<vmem>>, vector<128x512xbf16>
    %cst_8 = arith.constant dense<0.000000e+00> : vector<64x512xf32>
    %11 = tpu.matmul %9, %10, %cst_8 {dimension_numbers = #tpu.dot_dimension_numbers<[1], [0], [0], [1], [0, 0, 1, 1], [], []>} : vector<64x128xbf16>, vector<128x512xbf16>, vector<64x512xf32> -> vector<64x512xf32>
    %c0_9 = arith.constant 0 : index
    %c0_10 = arith.constant 0 : index
    %12 = vector.load %arg6[%c0_9, %c0_10] : memref<1x512xf32, #tpu.memory_space<vmem>>, vector<1x512xf32>
    %13 = vector.broadcast %12 : vector<1x512xf32> to vector<64x512xf32>
    %14 = arith.addf %11, %13 : vector<64x512xf32>
    %15 = vector.shape_cast %14 : vector<64x512xf32> to vector<8x8x512xf32>
    %c0_11 = arith.constant 0 : index
    %c0_12 = arith.constant 0 : index
    %c0_13 = arith.constant 0 : index
    %16 = vector.load %arg14[%c0_11, %c0_12, %c0_13] : memref<8x8x512xf32, #tpu.memory_space<vmem>>, vector<8x8x512xf32>
    tpu.vector_store %arg14[%c0_11, %c0_12, %c0_13], %15 {strides = array<i32>} : memref<8x8x512xf32, #tpu.memory_space<vmem>>, vector<8x8x512xf32>,
    %c0_14 = arith.constant 0 : index
    %c0_15 = arith.constant 0 : index
    %17 = vector.load %arg5[%c0_14, %c0_15] : memref<128x512xbf16, #tpu.memory_space<vmem>>, vector<128x512xbf16>
    %cst_16 = arith.constant 0.000000e+00 : f32
    %18 = vector.broadcast %cst_16 : f32 to vector<8x128xf32>
    %cst_17 = arith.constant 0.000000e+00 : f32
    %19 = vector.broadcast %cst_17 : f32 to vector<8x128xf32>
    %c0_18 = arith.constant 0 : index
    %c0_19 = arith.constant 0 : index
    %c0_20 = arith.constant 0 : index
    %20 = vector.load %arg14[%c0_18, %c0_19, %c0_20] : memref<8x8x512xf32, #tpu.memory_space<vmem>>, vector<1x8x512xf32>
    %21 = vector.shape_cast %20 : vector<1x8x512xf32> to vector<8x512xf32>
    %22 = arith.truncf %18 : vector<8x128xf32> to vector<8x128xbf16>
    %cst_21 = arith.constant dense<0.000000e+00> : vector<8x512xf32>
    %23 = tpu.matmul %22, %17, %cst_21 {dimension_numbers = #tpu.dot_dimension_numbers<[1], [0], [0], [1], [0, 0, 1, 1], [], []>} : vector<8x128xbf16>, vector<128x512xbf16>, vector<8x512xf32> -> vector<8x512xf32>
    %24 = arith.addf %21, %23 : vector<8x512xf32>
    %25 = vector.extract_strided_slice %24 {offsets = [0, 0], sizes = [8, 128], strides = [1, 1]} : vector<8x512xf32> to vector<8x128xf32>
    %26 = arith.negf %25 : vector<8x128xf32>
    %27 = math.exp %26 : vector<8x128xf32>
    %cst_22 = arith.constant 1.000000e+00 : f32
    %28 = vector.broadcast %cst_22 : f32 to vector<8x128xf32>
    %29 = arith.addf %28, %27 : vector<8x128xf32>
    %30 = arith.divf %28, %29 : vector<8x128xf32>
    %31 = vector.extract_strided_slice %24 {offsets = [0, 128], sizes = [8, 128], strides = [1, 1]} : vector<8x512xf32> to vector<8x128xf32>
    %32 = arith.negf %31 : vector<8x128xf32>
    %33 = math.exp %32 : vector<8x128xf32>
    %cst_23 = arith.constant 1.000000e+00 : f32
    %34 = vector.broadcast %cst_23 : f32 to vector<8x128xf32>
    %35 = arith.addf %34, %33 : vector<8x128xf32>
    %36 = arith.divf %34, %35 : vector<8x128xf32>
    %37 = vector.extract_strided_slice %24 {offsets = [0, 256], sizes = [8, 128], strides = [1, 1]} : vector<8x512xf32> to vector<8x128xf32>
    %38 = math.tanh %37 : vector<8x128xf32>
    %39 = vector.extract_strided_slice %24 {offsets = [0, 384], sizes = [8, 128], strides = [1, 1]} : vector<8x512xf32> to vector<8x128xf32>
    %40 = arith.negf %39 : vector<8x128xf32>
    %41 = math.exp %40 : vector<8x128xf32>
    %cst_24 = arith.constant 1.000000e+00 : f32
    %42 = vector.broadcast %cst_24 : f32 to vector<8x128xf32>
    %43 = arith.addf %42, %41 : vector<8x128xf32>
    %44 = arith.divf %42, %43 : vector<8x128xf32>
    %45 = arith.mulf %36, %19 : vector<8x128xf32>
    %46 = arith.mulf %30, %38 : vector<8x128xf32>
    %47 = arith.addf %45, %46 : vector<8x128xf32>
    %48 = math.tanh %47 : vector<8x128xf32>
    %49 = arith.mulf %44, %48 : vector<8x128xf32>
    %c1 = arith.constant 1 : index
    %c0_25 = arith.constant 0 : index
    %c0_26 = arith.constant 0 : index
    %50 = vector.load %arg14[%c1, %c0_25, %c0_26] : memref<8x8x512xf32, #tpu.memory_space<vmem>>, vector<1x8x512xf32>
    %51 = vector.shape_cast %50 : vector<1x8x512xf32> to vector<8x512xf32>
    %52 = arith.truncf %49 : vector<8x128xf32> to vector<8x128xbf16>
    %cst_27 = arith.constant dense<0.000000e+00> : vector<8x512xf32>
    %53 = tpu.matmul %52, %17, %cst_27 {dimension_numbers = #tpu.dot_dimension_numbers<[1], [0], [0], [1], [0, 0, 1, 1], [], []>} : vector<8x128xbf16>, vector<128x512xbf16>, vector<8x512xf32> -> vector<8x512xf32>
    %54 = arith.addf %51, %53 : vector<8x512xf32>
    %55 = vector.extract_strided_slice %54 {offsets = [0, 0], sizes = [8, 128], strides = [1, 1]} : vector<8x512xf32> to vector<8x128xf32>
    %56 = arith.negf %55 : vector<8x128xf32>
    %57 = math.exp %56 : vector<8x128xf32>
    %cst_28 = arith.constant 1.000000e+00 : f32
    %58 = vector.broadcast %cst_28 : f32 to vector<8x128xf32>
    %59 = arith.addf %58, %57 : vector<8x128xf32>
    %60 = arith.divf %58, %59 : vector<8x128xf32>
    %61 = vector.extract_strided_slice %54 {offsets = [0, 128], sizes = [8, 128], strides = [1, 1]} : vector<8x512xf32> to vector<8x128xf32>
    %62 = arith.negf %61 : vector<8x128xf32>
    %63 = math.exp %62 : vector<8x128xf32>
    %cst_29 = arith.constant 1.000000e+00 : f32
    %64 = vector.broadcast %cst_29 : f32 to vector<8x128xf32>
    %65 = arith.addf %64, %63 : vector<8x128xf32>
    %66 = arith.divf %64, %65 : vector<8x128xf32>
    %67 = vector.extract_strided_slice %54 {offsets = [0, 256], sizes = [8, 128], strides = [1, 1]} : vector<8x512xf32> to vector<8x128xf32>
    %68 = math.tanh %67 : vector<8x128xf32>
    %69 = vector.extract_strided_slice %54 {offsets = [0, 384], sizes = [8, 128], strides = [1, 1]} : vector<8x512xf32> to vector<8x128xf32>
    %70 = arith.negf %69 : vector<8x128xf32>
    %71 = math.exp %70 : vector<8x128xf32>
    %cst_30 = arith.constant 1.000000e+00 : f32
    %72 = vector.broadcast %cst_30 : f32 to vector<8x128xf32>
    %73 = arith.addf %72, %71 : vector<8x128xf32>
    %74 = arith.divf %72, %73 : vector<8x128xf32>
    %75 = arith.mulf %66, %47 : vector<8x128xf32>
    %76 = arith.mulf %60, %68 : vector<8x128xf32>
    %77 = arith.addf %75, %76 : vector<8x128xf32>
    %78 = math.tanh %77 : vector<8x128xf32>
    %79 = arith.mulf %74, %78 : vector<8x128xf32>
    %c2 = arith.constant 2 : index
    %c0_31 = arith.constant 0 : index
    %c0_32 = arith.constant 0 : index
    %80 = vector.load %arg14[%c2, %c0_31, %c0_32] : memref<8x8x512xf32, #tpu.memory_space<vmem>>, vector<1x8x512xf32>
    %81 = vector.shape_cast %80 : vector<1x8x512xf32> to vector<8x512xf32>
    %82 = arith.truncf %79 : vector<8x128xf32> to vector<8x128xbf16>
    %cst_33 = arith.constant dense<0.000000e+00> : vector<8x512xf32>
    %83 = tpu.matmul %82, %17, %cst_33 {dimension_numbers = #tpu.dot_dimension_numbers<[1], [0], [0], [1], [0, 0, 1, 1], [], []>} : vector<8x128xbf16>, vector<128x512xbf16>, vector<8x512xf32> -> vector<8x512xf32>
    %84 = arith.addf %81, %83 : vector<8x512xf32>
    %85 = vector.extract_strided_slice %84 {offsets = [0, 0], sizes = [8, 128], strides = [1, 1]} : vector<8x512xf32> to vector<8x128xf32>
    %86 = arith.negf %85 : vector<8x128xf32>
    %87 = math.exp %86 : vector<8x128xf32>
    %cst_34 = arith.constant 1.000000e+00 : f32
    %88 = vector.broadcast %cst_34 : f32 to vector<8x128xf32>
    %89 = arith.addf %88, %87 : vector<8x128xf32>
    %90 = arith.divf %88, %89 : vector<8x128xf32>
    %91 = vector.extract_strided_slice %84 {offsets = [0, 128], sizes = [8, 128], strides = [1, 1]} : vector<8x512xf32> to vector<8x128xf32>
    %92 = arith.negf %91 : vector<8x128xf32>
    %93 = math.exp %92 : vector<8x128xf32>
    %cst_35 = arith.constant 1.000000e+00 : f32
    %94 = vector.broadcast %cst_35 : f32 to vector<8x128xf32>
    %95 = arith.addf %94, %93 : vector<8x128xf32>
    %96 = arith.divf %94, %95 : vector<8x128xf32>
    %97 = vector.extract_strided_slice %84 {offsets = [0, 256], sizes = [8, 128], strides = [1, 1]} : vector<8x512xf32> to vector<8x128xf32>
    %98 = math.tanh %97 : vector<8x128xf32>
    %99 = vector.extract_strided_slice %84 {offsets = [0, 384], sizes = [8, 128], strides = [1, 1]} : vector<8x512xf32> to vector<8x128xf32>
    %100 = arith.negf %99 : vector<8x128xf32>
    %101 = math.exp %100 : vector<8x128xf32>
    %cst_36 = arith.constant 1.000000e+00 : f32
    %102 = vector.broadcast %cst_36 : f32 to vector<8x128xf32>
    %103 = arith.addf %102, %101 : vector<8x128xf32>
    %104 = arith.divf %102, %103 : vector<8x128xf32>
    %105 = arith.mulf %96, %77 : vector<8x128xf32>
    %106 = arith.mulf %90, %98 : vector<8x128xf32>
    %107 = arith.addf %105, %106 : vector<8x128xf32>
    %108 = math.tanh %107 : vector<8x128xf32>
    %109 = arith.mulf %104, %108 : vector<8x128xf32>
    %c3 = arith.constant 3 : index
    %c0_37 = arith.constant 0 : index
    %c0_38 = arith.constant 0 : index
    %110 = vector.load %arg14[%c3, %c0_37, %c0_38] : memref<8x8x512xf32, #tpu.memory_space<vmem>>, vector<1x8x512xf32>
    %111 = vector.shape_cast %110 : vector<1x8x512xf32> to vector<8x512xf32>
    %112 = arith.truncf %109 : vector<8x128xf32> to vector<8x128xbf16>
    %cst_39 = arith.constant dense<0.000000e+00> : vector<8x512xf32>
    %113 = tpu.matmul %112, %17, %cst_39 {dimension_numbers = #tpu.dot_dimension_numbers<[1], [0], [0], [1], [0, 0, 1, 1], [], []>} : vector<8x128xbf16>, vector<128x512xbf16>, vector<8x512xf32> -> vector<8x512xf32>
    %114 = arith.addf %111, %113 : vector<8x512xf32>
    %115 = vector.extract_strided_slice %114 {offsets = [0, 0], sizes = [8, 128], strides = [1, 1]} : vector<8x512xf32> to vector<8x128xf32>
    %116 = arith.negf %115 : vector<8x128xf32>
    %117 = math.exp %116 : vector<8x128xf32>
    %cst_40 = arith.constant 1.000000e+00 : f32
    %118 = vector.broadcast %cst_40 : f32 to vector<8x128xf32>
    %119 = arith.addf %118, %117 : vector<8x128xf32>
    %120 = arith.divf %118, %119 : vector<8x128xf32>
    %121 = vector.extract_strided_slice %114 {offsets = [0, 128], sizes = [8, 128], strides = [1, 1]} : vector<8x512xf32> to vector<8x128xf32>
    %122 = arith.negf %121 : vector<8x128xf32>
    %123 = math.exp %122 : vector<8x128xf32>
    %cst_41 = arith.constant 1.000000e+00 : f32
    %124 = vector.broadcast %cst_41 : f32 to vector<8x128xf32>
    %125 = arith.addf %124, %123 : vector<8x128xf32>
    %126 = arith.divf %124, %125 : vector<8x128xf32>
    %127 = vector.extract_strided_slice %114 {offsets = [0, 256], sizes = [8, 128], strides = [1, 1]} : vector<8x512xf32> to vector<8x128xf32>
    %128 = math.tanh %127 : vector<8x128xf32>
    %129 = vector.extract_strided_slice %114 {offsets = [0, 384], sizes = [8, 128], strides = [1, 1]} : vector<8x512xf32> to vector<8x128xf32>
    %130 = arith.negf %129 : vector<8x128xf32>
    %131 = math.exp %130 : vector<8x128xf32>
    %cst_42 = arith.constant 1.000000e+00 : f32
    %132 = vector.broadcast %cst_42 : f32 to vector<8x128xf32>
    %133 = arith.addf %132, %131 : vector<8x128xf32>
    %134 = arith.divf %132, %133 : vector<8x128xf32>
    %135 = arith.mulf %126, %107 : vector<8x128xf32>
    %136 = arith.mulf %120, %128 : vector<8x128xf32>
    %137 = arith.addf %135, %136 : vector<8x128xf32>
    %138 = math.tanh %137 : vector<8x128xf32>
    %139 = arith.mulf %134, %138 : vector<8x128xf32>
    %c4 = arith.constant 4 : index
    %c0_43 = arith.constant 0 : index
    %c0_44 = arith.constant 0 : index
    %140 = vector.load %arg14[%c4, %c0_43, %c0_44] : memref<8x8x512xf32, #tpu.memory_space<vmem>>, vector<1x8x512xf32>
    %141 = vector.shape_cast %140 : vector<1x8x512xf32> to vector<8x512xf32>
    %142 = arith.truncf %139 : vector<8x128xf32> to vector<8x128xbf16>
    %cst_45 = arith.constant dense<0.000000e+00> : vector<8x512xf32>
    %143 = tpu.matmul %142, %17, %cst_45 {dimension_numbers = #tpu.dot_dimension_numbers<[1], [0], [0], [1], [0, 0, 1, 1], [], []>} : vector<8x128xbf16>, vector<128x512xbf16>, vector<8x512xf32> -> vector<8x512xf32>
    %144 = arith.addf %141, %143 : vector<8x512xf32>
    %145 = vector.extract_strided_slice %144 {offsets = [0, 0], sizes = [8, 128], strides = [1, 1]} : vector<8x512xf32> to vector<8x128xf32>
    %146 = arith.negf %145 : vector<8x128xf32>
    %147 = math.exp %146 : vector<8x128xf32>
    %cst_46 = arith.constant 1.000000e+00 : f32
    %148 = vector.broadcast %cst_46 : f32 to vector<8x128xf32>
    %149 = arith.addf %148, %147 : vector<8x128xf32>
    %150 = arith.divf %148, %149 : vector<8x128xf32>
    %151 = vector.extract_strided_slice %144 {offsets = [0, 128], sizes = [8, 128], strides = [1, 1]} : vector<8x512xf32> to vector<8x128xf32>
    %152 = arith.negf %151 : vector<8x128xf32>
    %153 = math.exp %152 : vector<8x128xf32>
    %cst_47 = arith.constant 1.000000e+00 : f32
    %154 = vector.broadcast %cst_47 : f32 to vector<8x128xf32>
    %155 = arith.addf %154, %153 : vector<8x128xf32>
    %156 = arith.divf %154, %155 : vector<8x128xf32>
    %157 = vector.extract_strided_slice %144 {offsets = [0, 256], sizes = [8, 128], strides = [1, 1]} : vector<8x512xf32> to vector<8x128xf32>
    %158 = math.tanh %157 : vector<8x128xf32>
    %159 = vector.extract_strided_slice %144 {offsets = [0, 384], sizes = [8, 128], strides = [1, 1]} : vector<8x512xf32> to vector<8x128xf32>
    %160 = arith.negf %159 : vector<8x128xf32>
    %161 = math.exp %160 : vector<8x128xf32>
    %cst_48 = arith.constant 1.000000e+00 : f32
    %162 = vector.broadcast %cst_48 : f32 to vector<8x128xf32>
    %163 = arith.addf %162, %161 : vector<8x128xf32>
    %164 = arith.divf %162, %163 : vector<8x128xf32>
    %165 = arith.mulf %156, %137 : vector<8x128xf32>
    %166 = arith.mulf %150, %158 : vector<8x128xf32>
    %167 = arith.addf %165, %166 : vector<8x128xf32>
    %168 = math.tanh %167 : vector<8x128xf32>
    %169 = arith.mulf %164, %168 : vector<8x128xf32>
    %c5 = arith.constant 5 : index
    %c0_49 = arith.constant 0 : index
    %c0_50 = arith.constant 0 : index
    %170 = vector.load %arg14[%c5, %c0_49, %c0_50] : memref<8x8x512xf32, #tpu.memory_space<vmem>>, vector<1x8x512xf32>
    %171 = vector.shape_cast %170 : vector<1x8x512xf32> to vector<8x512xf32>
    %172 = arith.truncf %169 : vector<8x128xf32> to vector<8x128xbf16>
    %cst_51 = arith.constant dense<0.000000e+00> : vector<8x512xf32>
    %173 = tpu.matmul %172, %17, %cst_51 {dimension_numbers = #tpu.dot_dimension_numbers<[1], [0], [0], [1], [0, 0, 1, 1], [], []>} : vector<8x128xbf16>, vector<128x512xbf16>, vector<8x512xf32> -> vector<8x512xf32>
    %174 = arith.addf %171, %173 : vector<8x512xf32>
    %175 = vector.extract_strided_slice %174 {offsets = [0, 0], sizes = [8, 128], strides = [1, 1]} : vector<8x512xf32> to vector<8x128xf32>
    %176 = arith.negf %175 : vector<8x128xf32>
    %177 = math.exp %176 : vector<8x128xf32>
    %cst_52 = arith.constant 1.000000e+00 : f32
    %178 = vector.broadcast %cst_52 : f32 to vector<8x128xf32>
    %179 = arith.addf %178, %177 : vector<8x128xf32>
    %180 = arith.divf %178, %179 : vector<8x128xf32>
    %181 = vector.extract_strided_slice %174 {offsets = [0, 128], sizes = [8, 128], strides = [1, 1]} : vector<8x512xf32> to vector<8x128xf32>
    %182 = arith.negf %181 : vector<8x128xf32>
    %183 = math.exp %182 : vector<8x128xf32>
    %cst_53 = arith.constant 1.000000e+00 : f32
    %184 = vector.broadcast %cst_53 : f32 to vector<8x128xf32>
    %185 = arith.addf %184, %183 : vector<8x128xf32>
    %186 = arith.divf %184, %185 : vector<8x128xf32>
    %187 = vector.extract_strided_slice %174 {offsets = [0, 256], sizes = [8, 128], strides = [1, 1]} : vector<8x512xf32> to vector<8x128xf32>
    %188 = math.tanh %187 : vector<8x128xf32>
    %189 = vector.extract_strided_slice %174 {offsets = [0, 384], sizes = [8, 128], strides = [1, 1]} : vector<8x512xf32> to vector<8x128xf32>
    %190 = arith.negf %189 : vector<8x128xf32>
    %191 = math.exp %190 : vector<8x128xf32>
    %cst_54 = arith.constant 1.000000e+00 : f32
    %192 = vector.broadcast %cst_54 : f32 to vector<8x128xf32>
    %193 = arith.addf %192, %191 : vector<8x128xf32>
    %194 = arith.divf %192, %193 : vector<8x128xf32>
    %195 = arith.mulf %186, %167 : vector<8x128xf32>
    %196 = arith.mulf %180, %188 : vector<8x128xf32>
    %197 = arith.addf %195, %196 : vector<8x128xf32>
    %198 = math.tanh %197 : vector<8x128xf32>
    %199 = arith.mulf %194, %198 : vector<8x128xf32>
    %c6 = arith.constant 6 : index
    %c0_55 = arith.constant 0 : index
    %c0_56 = arith.constant 0 : index
    %200 = vector.load %arg14[%c6, %c0_55, %c0_56] : memref<8x8x512xf32, #tpu.memory_space<vmem>>, vector<1x8x512xf32>
    %201 = vector.shape_cast %200 : vector<1x8x512xf32> to vector<8x512xf32>
    %202 = arith.truncf %199 : vector<8x128xf32> to vector<8x128xbf16>
    %cst_57 = arith.constant dense<0.000000e+00> : vector<8x512xf32>
    %203 = tpu.matmul %202, %17, %cst_57 {dimension_numbers = #tpu.dot_dimension_numbers<[1], [0], [0], [1], [0, 0, 1, 1], [], []>} : vector<8x128xbf16>, vector<128x512xbf16>, vector<8x512xf32> -> vector<8x512xf32>
    %204 = arith.addf %201, %203 : vector<8x512xf32>
    %205 = vector.extract_strided_slice %204 {offsets = [0, 0], sizes = [8, 128], strides = [1, 1]} : vector<8x512xf32> to vector<8x128xf32>
    %206 = arith.negf %205 : vector<8x128xf32>
    %207 = math.exp %206 : vector<8x128xf32>
    %cst_58 = arith.constant 1.000000e+00 : f32
    %208 = vector.broadcast %cst_58 : f32 to vector<8x128xf32>
    %209 = arith.addf %208, %207 : vector<8x128xf32>
    %210 = arith.divf %208, %209 : vector<8x128xf32>
    %211 = vector.extract_strided_slice %204 {offsets = [0, 128], sizes = [8, 128], strides = [1, 1]} : vector<8x512xf32> to vector<8x128xf32>
    %212 = arith.negf %211 : vector<8x128xf32>
    %213 = math.exp %212 : vector<8x128xf32>
    %cst_59 = arith.constant 1.000000e+00 : f32
    %214 = vector.broadcast %cst_59 : f32 to vector<8x128xf32>
    %215 = arith.addf %214, %213 : vector<8x128xf32>
    %216 = arith.divf %214, %215 : vector<8x128xf32>
    %217 = vector.extract_strided_slice %204 {offsets = [0, 256], sizes = [8, 128], strides = [1, 1]} : vector<8x512xf32> to vector<8x128xf32>
    %218 = math.tanh %217 : vector<8x128xf32>
    %219 = vector.extract_strided_slice %204 {offsets = [0, 384], sizes = [8, 128], strides = [1, 1]} : vector<8x512xf32> to vector<8x128xf32>
    %220 = arith.negf %219 : vector<8x128xf32>
    %221 = math.exp %220 : vector<8x128xf32>
    %cst_60 = arith.constant 1.000000e+00 : f32
    %222 = vector.broadcast %cst_60 : f32 to vector<8x128xf32>
    %223 = arith.addf %222, %221 : vector<8x128xf32>
    %224 = arith.divf %222, %223 : vector<8x128xf32>
    %225 = arith.mulf %216, %197 : vector<8x128xf32>
    %226 = arith.mulf %210, %218 : vector<8x128xf32>
    %227 = arith.addf %225, %226 : vector<8x128xf32>
    %228 = math.tanh %227 : vector<8x128xf32>
    %229 = arith.mulf %224, %228 : vector<8x128xf32>
    %c7 = arith.constant 7 : index
    %c0_61 = arith.constant 0 : index
    %c0_62 = arith.constant 0 : index
    %230 = vector.load %arg14[%c7, %c0_61, %c0_62] : memref<8x8x512xf32, #tpu.memory_space<vmem>>, vector<1x8x512xf32>
    %231 = vector.shape_cast %230 : vector<1x8x512xf32> to vector<8x512xf32>
    %232 = arith.truncf %229 : vector<8x128xf32> to vector<8x128xbf16>
    %cst_63 = arith.constant dense<0.000000e+00> : vector<8x512xf32>
    %233 = tpu.matmul %232, %17, %cst_63 {dimension_numbers = #tpu.dot_dimension_numbers<[1], [0], [0], [1], [0, 0, 1, 1], [], []>} : vector<8x128xbf16>, vector<128x512xbf16>, vector<8x512xf32> -> vector<8x512xf32>
    %234 = arith.addf %231, %233 : vector<8x512xf32>
    %235 = vector.extract_strided_slice %234 {offsets = [0, 0], sizes = [8, 128], strides = [1, 1]} : vector<8x512xf32> to vector<8x128xf32>
    %236 = arith.negf %235 : vector<8x128xf32>
    %237 = math.exp %236 : vector<8x128xf32>
    %cst_64 = arith.constant 1.000000e+00 : f32
    %238 = vector.broadcast %cst_64 : f32 to vector<8x128xf32>
    %239 = arith.addf %238, %237 : vector<8x128xf32>
    %240 = arith.divf %238, %239 : vector<8x128xf32>
    %241 = vector.extract_strided_slice %234 {offsets = [0, 128], sizes = [8, 128], strides = [1, 1]} : vector<8x512xf32> to vector<8x128xf32>
    %242 = arith.negf %241 : vector<8x128xf32>
    %243 = math.exp %242 : vector<8x128xf32>
    %cst_65 = arith.constant 1.000000e+00 : f32
    %244 = vector.broadcast %cst_65 : f32 to vector<8x128xf32>
    %245 = arith.addf %244, %243 : vector<8x128xf32>
    %246 = arith.divf %244, %245 : vector<8x128xf32>
    %247 = vector.extract_strided_slice %234 {offsets = [0, 256], sizes = [8, 128], strides = [1, 1]} : vector<8x512xf32> to vector<8x128xf32>
    %248 = math.tanh %247 : vector<8x128xf32>
    %249 = vector.extract_strided_slice %234 {offsets = [0, 384], sizes = [8, 128], strides = [1, 1]} : vector<8x512xf32> to vector<8x128xf32>
    %250 = arith.negf %249 : vector<8x128xf32>
    %251 = math.exp %250 : vector<8x128xf32>
    %cst_66 = arith.constant 1.000000e+00 : f32
    %252 = vector.broadcast %cst_66 : f32 to vector<8x128xf32>
    %253 = arith.addf %252, %251 : vector<8x128xf32>
    %254 = arith.divf %252, %253 : vector<8x128xf32>
    %255 = arith.mulf %246, %227 : vector<8x128xf32>
    %256 = arith.mulf %240, %248 : vector<8x128xf32>
    %257 = arith.addf %255, %256 : vector<8x128xf32>
    %258 = math.tanh %257 : vector<8x128xf32>
    %259 = arith.mulf %254, %258 : vector<8x128xf32>
    %c0_67 = arith.constant 0 : index
    %c0_68 = arith.constant 0 : index
    %260 = vector.load %arg12[%c0_67, %c0_68] : memref<8x128xf32, #tpu.memory_space<vmem>>, vector<8x128xf32>
    tpu.vector_store %arg12[%c0_67, %c0_68], %259 {strides = array<i32>} : memref<8x128xf32, #tpu.memory_space<vmem>>, vector<8x128xf32>,
    %c0_69 = arith.constant 0 : index
    %c0_70 = arith.constant 0 : index
    %261 = vector.load %arg13[%c0_69, %c0_70] : memref<8x128xf32, #tpu.memory_space<vmem>>, vector<8x128xf32>
    tpu.vector_store %arg13[%c0_69, %c0_70], %257 {strides = array<i32>} : memref<8x128xf32, #tpu.memory_space<vmem>>, vector<8x128xf32>,
    %262 = tpu.concatenate %49, %79, %109, %139, %169, %199, %229, %259 in 0 : vector<8x128xf32>, vector<8x128xf32>, vector<8x128xf32>, vector<8x128xf32>, vector<8x128xf32>, vector<8x128xf32>, vector<8x128xf32>, vector<8x128xf32> -> vector<64x128xf32>
    %cst_71 = arith.constant dense<0.000000e+00> : vector<64xf32>
    %263 = vector.multi_reduction <add>, %262, %cst_71 [1] : vector<64x128xf32> to vector<64xf32>
    %264 = vector.shape_cast %263 : vector<64xf32> to vector<64x1xf32>
    %cst_72 = arith.constant 1.280000e+02 : f32
    %265 = vector.broadcast %cst_72 : f32 to vector<64x1xf32>
    %266 = arith.divf %264, %265 : vector<64x1xf32>
    %267 = vector.broadcast %266 : vector<64x1xf32> to vector<64x128xf32>
    %268 = arith.subf %262, %267 : vector<64x128xf32>
    %269 = arith.mulf %268, %268 : vector<64x128xf32>
    %cst_73 = arith.constant dense<0.000000e+00> : vector<64xf32>
    %270 = vector.multi_reduction <add>, %269, %cst_73 [1] : vector<64x128xf32> to vector<64xf32>
    %271 = vector.shape_cast %270 : vector<64xf32> to vector<64x1xf32>
    %cst_74 = arith.constant 1.280000e+02 : f32
    %272 = vector.broadcast %cst_74 : f32 to vector<64x1xf32>
    %273 = arith.divf %271, %272 : vector<64x1xf32>
    %274 = vector.broadcast %266 : vector<64x1xf32> to vector<64x128xf32>
    %275 = arith.subf %262, %274 : vector<64x128xf32>
    %cst_75 = arith.constant 9.99999974E-6 : f32
    %276 = vector.broadcast %cst_75 : f32 to vector<64x1xf32>
    %277 = arith.addf %273, %276 : vector<64x1xf32>
    %278 = math.rsqrt %277 : vector<64x1xf32>
    %279 = vector.broadcast %278 : vector<64x1xf32> to vector<64x128xf32>
    %280 = arith.mulf %275, %279 : vector<64x128xf32>
    %c0_76 = arith.constant 0 : index
    %c0_77 = arith.constant 0 : index
    %281 = vector.load %arg7[%c0_76, %c0_77] : memref<1x128xf32, #tpu.memory_space<vmem>>, vector<1x128xf32>
    %282 = vector.broadcast %281 : vector<1x128xf32> to vector<64x128xf32>
    %283 = arith.mulf %280, %282 : vector<64x128xf32>
    %c0_78 = arith.constant 0 : index
    %c0_79 = arith.constant 0 : index
    %284 = vector.load %arg8[%c0_78, %c0_79] : memref<1x128xf32, #tpu.memory_space<vmem>>, vector<1x128xf32>
    %285 = vector.broadcast %284 : vector<1x128xf32> to vector<64x128xf32>
    %286 = arith.addf %283, %285 : vector<64x128xf32>
    %287 = arith.truncf %286 : vector<64x128xf32> to vector<64x128xbf16>
    %c0_80 = arith.constant 0 : index
    %c0_81 = arith.constant 0 : index
    %288 = vector.load %arg9[%c0_80, %c0_81] : memref<128x512xbf16, #tpu.memory_space<vmem>>, vector<128x512xbf16>
    %cst_82 = arith.constant dense<0.000000e+00> : vector<64x512xf32>
    %289 = tpu.matmul %287, %288, %cst_82 {dimension_numbers = #tpu.dot_dimension_numbers<[1], [0], [0], [1], [0, 0, 1, 1], [], []>} : vector<64x128xbf16>, vector<128x512xbf16>, vector<64x512xf32> -> vector<64x512xf32>
    %c0_83 = arith.constant 0 : index
    %c0_84 = arith.constant 0 : index
    %290 = vector.load %arg10[%c0_83, %c0_84] : memref<1x512xf32, #tpu.memory_space<vmem>>, vector<1x512xf32>
    %291 = vector.broadcast %290 : vector<1x512xf32> to vector<64x512xf32>
    %292 = arith.addf %289, %291 : vector<64x512xf32>
    %293 = vector.extract_strided_slice %292 {offsets = [0, 0], sizes = [64, 128], strides = [1, 1]} : vector<64x512xf32> to vector<64x128xf32>
    %294 = tpu.iota {dimensions = array<i32: 1>} : vector<64x128xi32>
    %c5_i32 = arith.constant 5 : i32
    %295 = vector.broadcast %c5_i32 : i32 to vector<64x128xi32>
    %296 = arith.cmpi slt, %294, %295 : vector<64x128xi32>
    %cst_85 = arith.constant 1.000000e+00 : f32
    %297 = vector.broadcast %cst_85 : f32 to vector<64x128xf32>
    %298 = arith.mulf %293, %297 : vector<64x128xf32>
    %cst_86 = arith.constant -1.000000e+30 : f32
    %299 = vector.broadcast %cst_86 : f32 to vector<64x128xf32>
    %300 = arith.select %296, %298, %299 : vector<64x128xi1>, vector<64x128xf32>
    %cst_87 = arith.constant dense<0xFF800000> : vector<64xf32>
    %301 = vector.multi_reduction <maximumf>, %300, %cst_87 [1] : vector<64x128xf32> to vector<64xf32>
    %302 = vector.shape_cast %301 : vector<64xf32> to vector<64x1xf32>
    %303 = vector.broadcast %302 : vector<64x1xf32> to vector<64x128xf32>
    %304 = arith.subf %300, %303 : vector<64x128xf32>
    %305 = math.exp %304 : vector<64x128xf32>
    %cst_88 = arith.constant dense<0.000000e+00> : vector<64xf32>
    %306 = vector.multi_reduction <add>, %305, %cst_88 [1] : vector<64x128xf32> to vector<64xf32>
    %307 = vector.shape_cast %306 : vector<64xf32> to vector<64x1xf32>
    %308 = vector.broadcast %307 : vector<64x1xf32> to vector<64x128xf32>
    %309 = arith.divf %305, %308 : vector<64x128xf32>
    %310 = vector.extract_strided_slice %292 {offsets = [0, 128], sizes = [64, 384], strides = [1, 1]} : vector<64x512xf32> to vector<64x384xf32>
    %311 = tpu.iota {dimensions = array<i32: 1>} : vector<64x384xi32>
    %c160_i32 = arith.constant 160 : i32
    %312 = vector.broadcast %c160_i32 : i32 to vector<64x384xi32>
    %313 = arith.cmpi slt, %311, %312 : vector<64x384xi32>
    %c320_i32 = arith.constant 320 : i32
    %314 = vector.broadcast %c320_i32 : i32 to vector<64x384xi32>
    %315 = arith.cmpi slt, %311, %314 : vector<64x384xi32>
    %cst_89 = arith.constant 0.000000e+00 : f32
    %316 = vector.broadcast %cst_89 : f32 to vector<64x384xf32>
    %317 = arith.maximumf %310, %316 : vector<64x384xf32>
    %318 = math.absf %310 : vector<64x384xf32>
    %cst_90 = arith.constant 0.000000e+00 : f32
    %319 = vector.broadcast %cst_90 : f32 to vector<64x384xf32>
    %320 = arith.subf %319, %318 : vector<64x384xf32>
    %321 = math.exp %320 : vector<64x384xf32>
    %cst_91 = arith.constant 1.000000e+00 : f32
    %322 = vector.broadcast %cst_91 : f32 to vector<64x384xf32>
    %323 = arith.addf %322, %321 : vector<64x384xf32>
    %324 = math.log %323 : vector<64x384xf32>
    %325 = arith.addf %317, %324 : vector<64x384xf32>
    %cst_92 = arith.constant 0.000000e+00 : f32
    %326 = vector.broadcast %cst_92 : f32 to vector<64x384xf32>
    %327 = arith.select %315, %325, %326 : vector<64x384xi1>, vector<64x384xf32>
    %328 = arith.select %313, %310, %327 : vector<64x384xi1>, vector<64x384xf32>
    %329 = tpu.concatenate %309, %328 in 1 : vector<64x128xf32>, vector<64x384xf32> -> vector<64x512xf32>
    %c0_93 = arith.constant 0 : index
    %c0_94 = arith.constant 0 : index
    %330 = vector.load %arg11[%c0_93, %c0_94] : memref<64x512xf32, #tpu.memory_space<vmem>>, vector<64x512xf32>
    tpu.vector_store %arg11[%c0_93, %c0_94], %329 {strides = array<i32>} : memref<64x512xf32, #tpu.memory_space<vmem>>, vector<64x512xf32>,
    return
  }
  func.func @transform_0(%arg0: i32) -> (i32, i32) {
    %c0_i32 = arith.constant 0 : i32
    %c0_i32_0 = arith.constant 0 : i32
    %c0_i32_1 = arith.constant 0 : i32
    return %c0_i32, %c0_i32_0 : i32, i32
  }
  func.func @transform_1(%arg0: i32) -> (i32, i32) {
    %c0_i32 = arith.constant 0 : i32
    %c0_i32_0 = arith.constant 0 : i32
    %c0_i32_1 = arith.constant 0 : i32
    return %c0_i32, %c0_i32_0 : i32, i32
  }
  func.func @transform_2(%arg0: i32) -> (i32, i32) {
    %c0_i32 = arith.constant 0 : i32
    %c0_i32_0 = arith.constant 0 : i32
    %c0_i32_1 = arith.constant 0 : i32
    return %c0_i32, %c0_i32_0 : i32, i32
  }
  func.func @transform_3(%arg0: i32) -> (i32, i32) {
    %c0_i32 = arith.constant 0 : i32
    %c0_i32_0 = arith.constant 0 : i32
    %c0_i32_1 = arith.constant 0 : i32
    return %c0_i32, %c0_i32_0 : i32, i32
  }
  func.func @transform_4(%arg0: i32) -> (i32, i32) {
    %c0_i32 = arith.constant 0 : i32
    %c0_i32_0 = arith.constant 0 : i32
    %c0_i32_1 = arith.constant 0 : i32
    return %c0_i32, %c0_i32_0 : i32, i32
  }
  func.func @transform_5(%arg0: i32) -> (i32, i32) {
    %c0_i32 = arith.constant 0 : i32
    %c0_i32_0 = arith.constant 0 : i32
    %c0_i32_1 = arith.constant 0 : i32
    return %c0_i32, %c0_i32_0 : i32, i32
  }
  func.func @transform_6(%arg0: i32) -> (i32, i32) {
    %c0_i32 = arith.constant 0 : i32
    %c0_i32_0 = arith.constant 0 : i32
    %c0_i32_1 = arith.constant 0 : i32
    return %c0_i32, %c0_i32_0 : i32, i32
  }
  func.func @transform_7(%arg0: i32) -> (i32, i32) {
    %c0_i32 = arith.constant 0 : i32
    %c0_i32_0 = arith.constant 0 : i32
    %c0_i32_1 = arith.constant 0 : i32
    return %c0_i32, %c0_i32_0 : i32, i32
  }
  func.func @transform_8(%arg0: i32) -> (i32, i32) {
    %c0_i32 = arith.constant 0 : i32
    %c0_i32_0 = arith.constant 0 : i32
    %c0_i32_1 = arith.constant 0 : i32
    return %c0_i32, %c0_i32_0 : i32, i32
  }
  func.func @transform_9(%arg0: i32) -> (i32, i32) {
    %c0_i32 = arith.constant 0 : i32
    %c0_i32_0 = arith.constant 0 : i32
    %c0_i32_1 = arith.constant 0 : i32
    return %c0_i32, %c0_i32_0 : i32, i32
  }
  func.func @transform_10(%arg0: i32) -> (i32, i32) {
    %c0_i32 = arith.constant 0 : i32
    %c0_i32_0 = arith.constant 0 : i32
    %c0_i32_1 = arith.constant 0 : i32
    return %c0_i32, %c0_i32_0 : i32, i32
  }
  func.func @transform_11(%arg0: i32) -> (i32, i32) {
    %c0_i32 = arith.constant 0 : i32
    %c0_i32_0 = arith.constant 0 : i32
    %c0_i32_1 = arith.constant 0 : i32
    return %c0_i32, %c0_i32_0 : i32, i32
  }
  func.func @transform_12(%arg0: i32) -> (i32, i32) {
    %c0_i32 = arith.constant 0 : i32
    %c0_i32_0 = arith.constant 0 : i32
    %c0_i32_1 = arith.constant 0 : i32
    return %c0_i32, %c0_i32_0 : i32, i32
  }
}

</mosaic_0001>

<bundles_post_ra>
// kernel: tpu_custom_call.1
= control target key start
LH: loop header
LB: loop body
LE: loop exit
PB: predicated region body
PF: predicated region fallthrough
CT: control target
= control target key end

     0   :  { %18 = vsyncpa [#allocation4], 0  ;;  %s4421_s0 = inlined_call_operand.vmem [shape: f32[64,36], index: 0, kind: input, shape index: {}]   ;;  %s4422_s1 = inlined_call_operand.vmem [shape: bf16[36,128], index: 1, kind: input, shape index: {}]   ;;  %s4423_s2 = inlined_call_operand.vmem [shape: f32[1,128], index: 2, kind: input, shape index: {}]   ;;  %s4424_s3 = inlined_call_operand.hbm [shape: bf16[128,512], index: 3, kind: input, shape index: {}]   ;;  %s4425_s4 = inlined_call_operand.hbm [shape: bf16[128,512], index: 4, kind: input, shape index: {}]   ;;  %s4426_s5 = inlined_call_operand.vmem [shape: f32[1,512], index: 5, kind: input, shape index: {}]   ;;  %s4427_s6 = inlined_call_operand.vmem [shape: f32[1,128], index: 6, kind: input, shape index: {}]   ;;  %s4428_s7 = inlined_call_operand.vmem [shape: f32[1,128], index: 7, kind: input, shape index: {}]   ;;  %s4429_s8 = inlined_call_operand.hbm [shape: bf16[128,512], index: 8, kind: input, shape index: {}]   ;;  %s4430_s9 = inlined_call_operand.vmem [shape: f32[1,512], index: 9, kind: input, shape index: {}]   ;;  %s4431_s10 = inlined_call_operand.hbm [shape: f32[64,512], index: 10, kind: output, shape index: {0}]   ;;  %s4432_s11 = inlined_call_operand.hbm [shape: f32[8,128], index: 11, kind: output, shape index: {1}]   ;;  %s4433_s12 = inlined_call_operand.hbm [shape: f32[8,128], index: 12, kind: output, shape index: {2}]  }
   0x1   :  { %19 = vsyncpa [#allocation7], 0 }
   0x2   :  { %20 = vsyncpa [#allocation5], 0 }
   0x3   :  { %21 = vsyncpa [#allocation11], 0  ;;  %s3364_s21 = smov [#allocation6]   ;;  %s3365_s23 = smov [#allocation3]  }
   0x4   :  { %s45_s22 = sshll.u32 %s3364_s21, 4  ;;  %s33_s24 = sshll.u32 %s3365_s23, 4  ;;  %s46_s22 = int_to_ptr.vmem [resolvable:$true] %s45_s22  ;;  %s3440_s24 = int_to_ptr.vmem [resolvable:$true] %s33_s24 }
   0x5   :  { %s3224_s27 = scalar_lea.hbm %s4425_s4, 4096 }
   0x6   :  { %p3225_p0 = scmp.ne.s32.totalorder %s4425_s4, %s3224_s27  ;;  %p3228_p1 = scmp.lt.u32.totalorder %s3224_s27, %s4425_s4 }
   0x8   :  { %p3230_p2 = pnand %p3228_p1, %p3225_p0 }
   0xa   :  { %3233 = shalt.err (!%p3230_p2)
}
   0xb   :  { %s3234_s14 = scalar_lea.vmem %s46_s22, 4096  ;;  %p3239_p4 = scmp.lt.s32.totalorder %s46_s22, %s46_s22 }
   0xc   :  { %p3235_p3 = scmp.ne.s32.totalorder %s46_s22, %s3234_s14  ;;  %p3240_p5 = scmp.lt.s32.totalorder %s3234_s14, %s3234_s14 }
   0xe   :  { %p3241_p6 = por %p3240_p5, %p3239_p4 }
  0x10   :  { %p3242_p7 = pnand %p3241_p6, %p3235_p3 }
  0x12   :  { %3245 = shalt.err (!%p3242_p7)
}
  0x13   :  { %s3366_s15 = smov 256   ;;  %s3367_s16 = smov 16  }
  0x14   :  { %51 = dma.hbm_to_vmem [thread:$0]  %s4425_s4, 4096, %s46_s22, [#allocation7], %s3366_s15, %s3366_s15, %s3367_s16  }
  0x15   :  { %s3246_s21 = scalar_lea.hbm %s4424_s3, 4096 }
  0x16   :  { %p3247_p8 = scmp.ne.s32.totalorder %s4424_s3, %s3246_s21  ;;  %p3250_p9 = scmp.lt.u32.totalorder %s3246_s21, %s4424_s3 }
  0x18   :  { %p3252_p10 = pnand %p3250_p9, %p3247_p8 }
  0x1a   :  { %3255 = shalt.err (!%p3252_p10)
}
  0x1b   :  { %s3256_s28 = scalar_lea.vmem %s3440_s24, 4096  ;;  %p3261_p12 = scmp.lt.s32.totalorder %s3440_s24, %s3440_s24 }
  0x1c   :  { %p3257_p11 = scmp.ne.s32.totalorder %s3440_s24, %s3256_s28  ;;  %p3262_p13 = scmp.lt.s32.totalorder %s3256_s28, %s3256_s28 }
  0x1e   :  { %p3263_p0 = por %p3262_p13, %p3261_p12 }
  0x20   :  { %p3264_p1 = pnand %p3263_p0, %p3257_p11 }
  0x22   :  { %3267 = shalt.err (!%p3264_p1)
}
  0x23   :  { %39 = dma.hbm_to_vmem [thread:$0]  %s4424_s3, 4096, %s3440_s24, [#allocation4], %s3366_s15, %s3366_s15, %s3367_s16  }
  0x24   :  { %s3368_s29 = smov [#allocation8]   ;;  %s3268_s17 = scalar_lea.hbm %s4429_s8, 4096 }
  0x25   :  { %s63_s30 = sshll.u32 %s3368_s29, 4  ;;  %p3269_p2 = scmp.ne.s32.totalorder %s4429_s8, %s3268_s17  ;;  %s64_s30 = int_to_ptr.vmem [resolvable:$true] %s63_s30 }
  0x26   :  { %p3272_p3 = scmp.lt.u32.totalorder %s3268_s17, %s4429_s8 }
  0x28   :  { %p3274_p4 = pnand %p3272_p3, %p3269_p2 }
  0x2a   :  { %3277 = shalt.err (!%p3274_p4)
}
  0x2b   :  { %s3278_s23 = scalar_lea.vmem %s64_s30, 4096  ;;  %p3283_p6 = scmp.lt.s32.totalorder %s64_s30, %s64_s30 }
  0x2c   :  { %p3279_p5 = scmp.ne.s32.totalorder %s64_s30, %s3278_s23  ;;  %p3284_p7 = scmp.lt.s32.totalorder %s3278_s23, %s3278_s23 }
  0x2e   :  { %p3285_p8 = por %p3284_p7, %p3283_p6 }
  0x30   :  { %p3286_p9 = pnand %p3285_p8, %p3279_p5 }
  0x32   :  { %3289 = shalt.err (!%p3286_p9)
}
  0x33   :  { %69 = dma.hbm_to_vmem [thread:$0]  %s4429_s8, 4096, %s64_s30, [#allocation7], %s3366_s15, %s3366_s15, %s3367_s16  }
  0x34   :  { %3356 = dma.done.wait [#allocation4], 4096  }
  0x35   :  { %3357 = vsyncadd [#allocation4], 4294963200 }
  0x36   :  { %3358 = dma.done.wait [#allocation7], 8192  }
  0x37   :  { %3359 = vsyncadd [#allocation7], 4294959104  ;;  %v2805_v0 = vld [vmem:[%s4422_s1] sm:$0xff]   ;;  %v2806_v1 = vld [vmem:[%s4422_s1 + $0x8] sm:$0xff]   ;;  %vm121_vm0 = vcmask 293888   ;;  %vm134_vm1 = vcmask 1041408  }
  0x38   :  { %2779 = vmatprep.subr.bf16.mxu0 %v2805_v0  ;;  %v82_v2 = vld [vmem:[%s4421_s0] sm:$0xff]  ;;  %v83_v3 = vld [vmem:[%s4421_s0 + $0x8] sm:$0xff]  ;;  %v2807_v4 = vld [vmem:[%s4422_s1 + $0x10] ss:$0 sps:$4 sm:$0x33]   ;;  %v4439_v50 = vmov 0  }
  0x39   :  { %2780 = vmatpush3.bf16.msra.mxu0 %v2805_v0  ;;  %v90_v5 = vpack.c.bf16 %v83_v3, %v82_v2  ;;  %v84_v6 = vld [vmem:[%s4421_s0 + $0x10] sm:$0xff]  ;;  %v85_v7 = vld [vmem:[%s4421_s0 + $0x18] sm:$0xff]  ;;  %v86_v8 = vld [vmem:[%s4421_s0 + $0x20] sm:$0xff]  ;;  %v136_v13 = vsel %vm134_vm1, %v2807_v4, 0  ;;  %461 = vmatprep.mubr.bf16.mxu1 %v4439_v50 }
  0x3a   :  { %2781 = vmatprep.subr.bf16.mxu0 %v2806_v1  ;;  %v2808_v9 = vld [vmem:[#allocation3 + $0x4] ss:$16 sps:$4 sm:$0xff]   ;;  %v2810_v10 = vld [vmem:[#allocation3] ss:$16 sps:$4 sm:$0xff]   ;;  %v87_v11 = vld [vmem:[%s4421_s0 + $0x28] sm:$0xff]  ;;  %v91_v16 = vpack.c.bf16 %v85_v7, %v84_v6 }
  0x3b   :  { %2785 = vmatprep.mubr.msk.bf16.mxu0 %vm121_vm0, %v90_v5  ;;  %v2813_v12 = vld [vmem:[#allocation3 + $0xc] ss:$16 sps:$4 sm:$0xff]   ;;  %429 = vmatprep.subr.bf16.mxu1 %v2808_v9  ;;  %v2814_v14 = vld [vmem:[#allocation3 + $0x24] ss:$16 sps:$4 sm:$0xff]   ;;  %v2816_v15 = vld [vmem:[#allocation3 + $0x20] ss:$16 sps:$4 sm:$0xff]   ;;  %v92_v17 = vpack.c.bf16 %v87_v11, %v86_v8 }
  0x3c   :  { %430 = vmatpush1.bf16.msra.mxu1 %v2810_v10  ;;  %v2811_v18 = vld [vmem:[#allocation3 + $0x8] ss:$16 sps:$4 sm:$0xff]   ;;  %v2820_v19 = vld [vmem:[#allocation3 + $0x44] ss:$16 sps:$4 sm:$0xff]   ;;  %v2819_v20 = vld [vmem:[#allocation3 + $0x2c] ss:$16 sps:$4 sm:$0xff]  }
  0x3d   :  { %2782 = vmatpush3.bf16.msra.mxu0 %v2806_v1  ;;  %431 = vmatprep.subr.bf16.mxu1 %v2814_v14  ;;  %v2822_v21 = vld [vmem:[#allocation3 + $0x40] ss:$16 sps:$4 sm:$0xff]   ;;  %v2826_v23 = vld [vmem:[#allocation3 + $0x64] ss:$16 sps:$4 sm:$0xff]   ;;  %v89_v24 = vld [vmem:[%s4421_s0 + $0x38] sm:$0xff] }
  0x3e   :  { %2793 = vmatprep.subr.msk.bf16.mxu0 %vm134_vm1, %v2807_v4  ;;  %v88_v22 = vld [vmem:[%s4421_s0 + $0x30] sm:$0xff]  ;;  %v2817_v25 = vld [vmem:[#allocation3 + $0x28] ss:$16 sps:$4 sm:$0xff]   ;;  %v2825_v26 = vld [vmem:[#allocation3 + $0x4c] ss:$16 sps:$4 sm:$0xff]  }
  0x3f   :  { %v2828_v27 = vld [vmem:[#allocation3 + $0x60] ss:$16 sps:$4 sm:$0xff]   ;;  %v93_v28 = vpack.c.bf16 %v89_v24, %v88_v22  ;;  %v2832_v29 = vld [vmem:[#allocation3 + $0x84] ss:$16 sps:$4 sm:$0xff]   ;;  %v2823_v30 = vld [vmem:[#allocation3 + $0x48] ss:$16 sps:$4 sm:$0xff]  }
  0x40   :  { %432 = vmatpush1.bf16.msra.mxu1 %v2816_v15  ;;  %v2831_v31 = vld [vmem:[#allocation3 + $0x6c] ss:$16 sps:$4 sm:$0xff]   ;;  %v2834_v32 = vld [vmem:[#allocation3 + $0x80] ss:$16 sps:$4 sm:$0xff]   ;;  %v2829_v33 = vld [vmem:[#allocation3 + $0x68] ss:$16 sps:$4 sm:$0xff]  }
  0x41   :  { %2784 = vmatpush3.bf16.msra.mxu0 %v136_v13  ;;  %433 = vmatprep.subr.bf16.mxu1 %v2820_v19  ;;  %v2838_v34 = vld [vmem:[#allocation3 + $0xa4] ss:$16 sps:$4 sm:$0xff]   ;;  %v2837_v35 = vld [vmem:[#allocation3 + $0x8c] ss:$16 sps:$4 sm:$0xff]   ;;  %v2840_v36 = vld [vmem:[#allocation3 + $0xa0] ss:$16 sps:$4 sm:$0xff]  }
  0x42   :  { %502 = vmatprep.subr.bf16.mxu0 %v2813_v12  ;;  %v2835_v37 = vld [vmem:[#allocation3 + $0x88] ss:$16 sps:$4 sm:$0xff]   ;;  %v2843_v38 = vld [vmem:[#allocation3 + $0xac] ss:$16 sps:$4 sm:$0xff]   ;;  %v2844_v40 = vld [vmem:[#allocation3 + $0xc4] ss:$16 sps:$4 sm:$0xff]  }
  0x43   :  { %v2841_v39 = vld [vmem:[#allocation3 + $0xa8] ss:$16 sps:$4 sm:$0xff]   ;;  %v2849_v41 = vld [vmem:[#allocation3 + $0xcc] ss:$16 sps:$4 sm:$0xff]   ;;  %v2846_v42 = vld [vmem:[#allocation3 + $0xc0] ss:$16 sps:$4 sm:$0xff]  }
  0x44   :  { %2786 = vmatmul.mubr.msk.bf16.vlgmr.msra.gmra.mrb[0].mxu0 %vm121_vm0, %v91_v16  ;;  %434 = vmatpush1.bf16.msra.mxu1 %v2822_v21  ;;  %v2847_v43 = vld [vmem:[#allocation3 + $0xc8] ss:$16 sps:$4 sm:$0xff]   ;;  %v2850_v44 = vld [vmem:[#allocation3 + $0xe4] ss:$16 sps:$4 sm:$0xff]   ;;  %v2855_v45 = vld [vmem:[#allocation3 + $0xec] ss:$16 sps:$4 sm:$0xff]  }
  0x45   :  { %2789 = vmatprep.mubr.msk.bf16.mxu0 %vm121_vm0, %v92_v17  ;;  %503 = vmatpush1.bf16.msra.mxu0 %v2811_v18  ;;  %v2852_v46 = vld [vmem:[#allocation3 + $0xe0] ss:$16 sps:$4 sm:$0xff]   ;;  %v2853_v47 = vld [vmem:[#allocation3 + $0xe8] ss:$16 sps:$4 sm:$0xff]   ;;  %v3529_v48 = vld [vmem:[#allocation6 + $0x4] ss:$16 sps:$4 sm:$0xff]  }
  0x46   :  { %504 = vmatprep.subr.bf16.mxu0 %v2819_v20  ;;  %435 = vmatprep.subr.bf16.mxu1 %v2826_v23  ;;  %v3531_v49 = vld [vmem:[#allocation6 + $0xc] ss:$16 sps:$4 sm:$0xff]   ;;  %v2642_v51 = vld [vmem:[%s4423_s2] ss:$0 sm:$0xff]  ;;  %v3542_v2 = vld [vmem:[#allocation6 + $0x8] ss:$16 sps:$4 sm:$0xff]  }
  0x47   :  { %v3540_v1 = vld [vmem:[#allocation6] ss:$16 sps:$4 sm:$0xff]   ;;  %v3544_v5 = vld [vmem:[#allocation6 + $0x24] ss:$16 sps:$4 sm:$0xff]   ;;  %v3546_v6 = vld [vmem:[#allocation6 + $0x2c] ss:$16 sps:$4 sm:$0xff]  }
  0x48   :  { %436 = vmatpush1.bf16.msra.mxu1 %v2828_v27  ;;  %v3550_v12 = vld [vmem:[#allocation6 + $0x20] ss:$16 sps:$4 sm:$0xff]   ;;  %v3552_v14 = vld [vmem:[#allocation6 + $0x28] ss:$16 sps:$4 sm:$0xff]   ;;  %v3556_v18 = vld [vmem:[#allocation6 + $0x44] ss:$16 sps:$4 sm:$0xff]  }
  0x49   :  { %505 = vmatpush1.bf16.msra.mxu0 %v2817_v25  ;;  %437 = vmatprep.subr.bf16.mxu1 %v2832_v29  ;;  %v3558_v19 = vld [vmem:[#allocation6 + $0x4c] ss:$16 sps:$4 sm:$0xff]   ;;  %v3564_v23 = vld [vmem:[#allocation6 + $0x40] ss:$16 sps:$4 sm:$0xff]   ;;  %v3566_v24 = vld [vmem:[#allocation6 + $0x48] ss:$16 sps:$4 sm:$0xff]  }
  0x4a   :  { %506 = vmatprep.subr.bf16.mxu0 %v2825_v26  ;;  %v3570_v26 = vld [vmem:[#allocation6 + $0x64] ss:$16 sps:$4 sm:$0xff]   ;;  %v3572_v27 = vld [vmem:[#allocation6 + $0x6c] ss:$16 sps:$4 sm:$0xff]   ;;  %v3578_v29 = vld [vmem:[#allocation6 + $0x68] ss:$16 sps:$4 sm:$0xff]  }
  0x4c   :  { %2790 = vmatmul.mubr.msk.bf16.gmra.mrb[4].mxu0 %vm121_vm0, %v93_v28  ;;  %438 = vmatpush1.bf16.msra.mxu1 %v2834_v32  ;;  %v3576_v28 = vld [vmem:[#allocation6 + $0x60] ss:$16 sps:$4 sm:$0xff]  }
  0x4d   :  { %507 = vmatpush1.bf16.msra.mxu0 %v2823_v30  ;;  %439 = vmatprep.subr.bf16.mxu1 %v2838_v34  ;;  %v3582_v30 = vld [vmem:[#allocation6 + $0x84] ss:$16 sps:$4 sm:$0xff]   ;;  %v3590_v32 = vld [vmem:[#allocation6 + $0x80] ss:$16 sps:$4 sm:$0xff]  }
  0x4e   :  { %508 = vmatprep.subr.bf16.mxu0 %v2831_v31  ;;  %534 = vmatprep.mubr.bf16.mxu0 %v4439_v50  ;;  %v3584_v31 = vld [vmem:[#allocation6 + $0x8c] ss:$16 sps:$4 sm:$0xff]   ;;  %v3596_v34 = vld [vmem:[#allocation6 + $0xa4] ss:$16 sps:$4 sm:$0xff]  }
  0x50   :  { %440 = vmatpush1.bf16.msra.mxu1 %v2840_v36  ;;  %v3602_v36 = vld [vmem:[#allocation6 + $0xa0] ss:$16 sps:$4 sm:$0xff]  }
  0x51   :  { %509 = vmatpush1.bf16.msra.mxu0 %v2829_v33  ;;  %441 = vmatprep.subr.bf16.mxu1 %v2844_v40  ;;  %v3592_v33 = vld [vmem:[#allocation6 + $0x88] ss:$16 sps:$4 sm:$0xff]   ;;  %v3616_v40 = vld [vmem:[#allocation6 + $0xc0] ss:$16 sps:$4 sm:$0xff]  }
  0x52   :  { %510 = vmatprep.subr.bf16.mxu0 %v2837_v35  ;;  %v3598_v35 = vld [vmem:[#allocation6 + $0xac] ss:$16 sps:$4 sm:$0xff]  }
  0x54   :  { %442 = vmatpush1.bf16.msra.mxu1 %v2846_v42  ;;  %v3622_v42 = vld [vmem:[#allocation6 + $0xe4] ss:$16 sps:$4 sm:$0xff]  }
  0x55   :  { %511 = vmatpush1.bf16.msra.mxu0 %v2835_v37  ;;  %443 = vmatprep.subr.bf16.mxu1 %v2850_v44  ;;  %v3604_v37 = vld [vmem:[#allocation6 + $0xa8] ss:$16 sps:$4 sm:$0xff]   ;;  %v3628_v44 = vld [vmem:[#allocation6 + $0xe0] ss:$16 sps:$4 sm:$0xff]  }
  0x56   :  { %512 = vmatprep.subr.bf16.mxu0 %v2843_v38  ;;  %v3608_v38 = vld [vmem:[#allocation6 + $0xc4] ss:$16 sps:$4 sm:$0xff]  }
  0x58   :  { %444 = vmatpush1.bf16.msra.mxu1 %v2852_v46  ;;  %v4436_v46 = vlaneseq }
  0x59   :  { %513 = vmatpush1.bf16.msra.mxu0 %v2841_v39  ;;  %803 = vmatprep.subr.bf16.mxu1 %v3529_v48  ;;  %v3610_v39 = vld [vmem:[#allocation6 + $0xcc] ss:$16 sps:$4 sm:$0xff]  }
  0x5a   :  { %514 = vmatprep.subr.bf16.mxu0 %v2849_v41  ;;  %v3618_v41 = vld [vmem:[#allocation6 + $0xc8] ss:$16 sps:$4 sm:$0xff]  }
  0x5d   :  { %515 = vmatpush1.bf16.msra.mxu0 %v2847_v43  ;;  %v3624_v43 = vld [vmem:[#allocation6 + $0xec] ss:$16 sps:$4 sm:$0xff]  }
  0x5e   :  { %516 = vmatprep.subr.bf16.mxu0 %v2855_v45  ;;  %v3630_v45 = vld [vmem:[#allocation6 + $0xe8] ss:$16 sps:$4 sm:$0xff]  }
  0x61   :  { %517 = vmatpush1.bf16.msra.mxu0 %v2853_v47  ;;  %v3677_v47 = vshrl.u32 %v4436_v46, 7 }
  0x62   :  { %844 = vmatprep.subr.bf16.mxu0 %v3531_v49 }
  0x63   :  { %4443 = vst [vmem:[#allocation17_spill] sm:$0xff] %v3677_v47 }
 0x117   :  { %v2787_v52 = vpop.f32.mrb[0].mxu0 }
 0x118   :  { %v181_v53 = vadd.f32 %v2787_v52, %v2642_v51  ;;  %v172_v54 = vpop.f32.mrb[1].mxu0  ;;  %v4437_v52 = vsub.s32 2, %v3677_v47 }
 0x119   :  { %v173_v55 = vadd.f32 %v2642_v51, %v172_v54  ;;  %v2788_v56 = vpop.f32.mrb[2].mxu0  ;;  %v4435_v54 = vsub.s32 1, %v3677_v47 }
 0x11a   :  { %v184_v57 = vadd.f32 %v2788_v56, %v2642_v51  ;;  %v175_v58 = vpop.f32.mrb[3].mxu0  ;;  %v205_v60 = vmax.f32 %v181_v53, 0.0  ;;  %v247_v53 = vld [vmem:[%s4426_s5] sm:$0xf] }
 0x11b   :  { %v176_v59 = vadd.f32 %v2642_v51, %v175_v58  ;;  %v203_v62 = vmax.f32 %v173_v55, 0.0  ;;  %v4434_v55 = vsub.s32 3, %v3677_v47 }
 0x11c   :  { %v206_v61 = vmax.f32 %v184_v57, 0.0 }
 0x11d   :  { %v204_v63 = vmax.f32 %v176_v59, 0.0  ;;  %v260_v59 = vrot.slane %v247_v53, %v4437_v52 }
 0x11e   :  { %v212_v0 = vpack.c.bf16 %v206_v61, %v205_v60 }
 0x11f   :  { %v211_v3 = vpack.c.bf16 %v204_v63, %v203_v62  ;;  %v2791_v4 = vpop.f32.mrb[4].mxu0  ;;  %v256_v62 = vrot.slane %v247_v53, %v4435_v54  ;;  %v264_v63 = vrot.slane %v247_v53, %v4434_v55 }
 0x120   :  { %v197_v7 = vadd.f32 %v2791_v4, %v2642_v51  ;;  %v188_v8 = vpop.f32.mrb[5].mxu0 }
 0x121   :  { %462 = vmatmul.mubr.bf16.vlgmr.msra.gmra.mrb[0].mxu1 %v211_v3  ;;  %535 = vmatmul.mubr.bf16.vlgmr.msra.gmra.mrb[8].mxu0 %v211_v3  ;;  %v189_v9 = vadd.f32 %v2642_v51, %v188_v8  ;;  %v2792_v10 = vpop.f32.mrb[6].mxu0 }
 0x122   :  { %804 = vmatpush1.bf16.msra.mxu1 %v3540_v1  ;;  %845 = vmatpush1.bf16.msra.mxu0 %v3542_v2  ;;  %v209_v11 = vmax.f32 %v197_v7, 0.0  ;;  %v200_v13 = vadd.f32 %v2792_v10, %v2642_v51  ;;  %v191_v15 = vpop.f32.mrb[7].mxu0 }
 0x123   :  { %805 = vmatprep.subr.bf16.mxu1 %v3544_v5  ;;  %v207_v16 = vmax.f32 %v189_v9, 0.0  ;;  %846 = vmatprep.subr.bf16.mxu0 %v3546_v6  ;;  %v192_v17 = vadd.f32 %v2642_v51, %v191_v15  ;;  %v4438_v51 = vsub.s32 0, %v3677_v47 }
 0x124   :  { %v210_v20 = vmax.f32 %v200_v13, 0.0  ;;  %471 = vmatprep.mubr.bf16.mxu1 %v4439_v50  ;;  %544 = vmatprep.mubr.bf16.mxu0 %v4439_v50 }
 0x125   :  { %v208_v21 = vmax.f32 %v192_v17, 0.0  ;;  %v252_v58 = vrot.slane %v247_v53, %v4438_v51 }
 0x126   :  { %806 = vmatpush1.bf16.msra.mxu1 %v3550_v12  ;;  %v214_v22 = vpack.c.bf16 %v210_v20, %v209_v11  ;;  %847 = vmatpush1.bf16.msra.mxu0 %v3552_v14 }
 0x127   :  { %v213_v25 = vpack.c.bf16 %v208_v21, %v207_v16  ;;  %807 = vmatprep.subr.bf16.mxu1 %v3556_v18  ;;  %848 = vmatprep.subr.bf16.mxu0 %v3558_v19 }
 0x129   :  { %472 = vmatmul.mubr.bf16.gmra.mrb[4].mxu1 %v212_v0  ;;  %545 = vmatmul.mubr.bf16.gmra.mrb[12].mxu0 %v212_v0 }
 0x12a   :  { %808 = vmatpush1.bf16.msra.mxu1 %v3564_v23  ;;  %849 = vmatpush1.bf16.msra.mxu0 %v3566_v24 }
 0x12b   :  { %809 = vmatprep.subr.bf16.mxu1 %v3570_v26  ;;  %850 = vmatprep.subr.bf16.mxu0 %v3572_v27 }
 0x12c   :  { %481 = vmatprep.mubr.bf16.mxu1 %v4439_v50  ;;  %554 = vmatprep.mubr.bf16.mxu0 %v4439_v50 }
 0x12e   :  { %810 = vmatpush1.bf16.msra.mxu1 %v3576_v28  ;;  %851 = vmatpush1.bf16.msra.mxu0 %v3578_v29 }
 0x12f   :  { %811 = vmatprep.subr.bf16.mxu1 %v3582_v30  ;;  %852 = vmatprep.subr.bf16.mxu0 %v3584_v31 }
 0x131   :  { %482 = vmatmul.mubr.bf16.gmra.mrb[8].mxu1 %v213_v25  ;;  %555 = vmatmul.mubr.bf16.gmra.mrb[16].mxu0 %v213_v25 }
 0x132   :  { %812 = vmatpush1.bf16.msra.mxu1 %v3590_v32  ;;  %853 = vmatpush1.bf16.msra.mxu0 %v3592_v33 }
 0x133   :  { %813 = vmatprep.subr.bf16.mxu1 %v3596_v34  ;;  %854 = vmatprep.subr.bf16.mxu0 %v3598_v35 }
 0x134   :  { %491 = vmatprep.mubr.bf16.mxu1 %v4439_v50  ;;  %564 = vmatprep.mubr.bf16.mxu0 %v4439_v50 }
 0x136   :  { %814 = vmatpush1.bf16.msra.mxu1 %v3602_v36  ;;  %855 = vmatpush1.bf16.msra.mxu0 %v3604_v37 }
 0x137   :  { %815 = vmatprep.subr.bf16.mxu1 %v3608_v38  ;;  %856 = vmatprep.subr.bf16.mxu0 %v3610_v39 }
 0x139   :  { %492 = vmatmul.mubr.bf16.gmra.mrb[12].mxu1 %v214_v22  ;;  %565 = vmatmul.mubr.bf16.gmra.mrb[20].mxu0 %v214_v22 }
 0x13a   :  { %816 = vmatpush1.bf16.msra.mxu1 %v3616_v40  ;;  %857 = vmatpush1.bf16.msra.mxu0 %v3618_v41 }
 0x13b   :  { %817 = vmatprep.subr.bf16.mxu1 %v3622_v42  ;;  %858 = vmatprep.subr.bf16.mxu0 %v3624_v43 }
 0x13c   :  { %835 = vmatprep.mubr.bf16.mxu1 %v4439_v50  ;;  %876 = vmatprep.mubr.bf16.mxu0 %v4439_v50 }
 0x13e   :  { %818 = vmatpush1.bf16.msra.mxu1 %v3628_v44  ;;  %859 = vmatpush1.bf16.msra.mxu0 %v3630_v45 }
 0x13f   :  { %919 = vmatprep.subr.bf16.mxu1 %v3529_v48  ;;  %960 = vmatprep.subr.bf16.mxu0 %v3531_v49 }
 0x141   :  { %836 = vmatmul.mubr.bf16.vlgmr.msra.gmra.mrb[16].mxu1 %v4439_v50  ;;  %877 = vmatmul.mubr.bf16.vlgmr.msra.gmra.mrb[24].mxu0 %v4439_v50 }
 0x142   :  { %920 = vmatpush1.bf16.msra.mxu1 %v3540_v1  ;;  %961 = vmatpush1.bf16.msra.mxu0 %v3542_v2 }
 0x143   :  { %921 = vmatprep.subr.bf16.mxu1 %v3544_v5  ;;  %962 = vmatprep.subr.bf16.mxu0 %v3546_v6 }
 0x144   :  { %951 = vmatprep.mubr.bf16.mxu1 %v4439_v50  ;;  %992 = vmatprep.mubr.bf16.mxu0 %v4439_v50 }
 0x146   :  { %922 = vmatpush1.bf16.msra.mxu1 %v3550_v12  ;;  %963 = vmatpush1.bf16.msra.mxu0 %v3552_v14 }
 0x147   :  { %923 = vmatprep.subr.bf16.mxu1 %v3556_v18  ;;  %964 = vmatprep.subr.bf16.mxu0 %v3558_v19 }
 0x14a   :  { %924 = vmatpush1.bf16.msra.mxu1 %v3564_v23  ;;  %965 = vmatpush1.bf16.msra.mxu0 %v3566_v24 }
 0x14b   :  { %925 = vmatprep.subr.bf16.mxu1 %v3570_v26  ;;  %966 = vmatprep.subr.bf16.mxu0 %v3572_v27 }
 0x14e   :  { %926 = vmatpush1.bf16.msra.mxu1 %v3576_v28  ;;  %967 = vmatpush1.bf16.msra.mxu0 %v3578_v29 }
 0x14f   :  { %927 = vmatprep.subr.bf16.mxu1 %v3582_v30  ;;  %968 = vmatprep.subr.bf16.mxu0 %v3584_v31 }
 0x152   :  { %928 = vmatpush1.bf16.msra.mxu1 %v3590_v32  ;;  %969 = vmatpush1.bf16.msra.mxu0 %v3592_v33 }
 0x153   :  { %929 = vmatprep.subr.bf16.mxu1 %v3596_v34  ;;  %970 = vmatprep.subr.bf16.mxu0 %v3598_v35 }
 0x156   :  { %930 = vmatpush1.bf16.msra.mxu1 %v3602_v36  ;;  %971 = vmatpush1.bf16.msra.mxu0 %v3604_v37 }
 0x157   :  { %931 = vmatprep.subr.bf16.mxu1 %v3608_v38  ;;  %972 = vmatprep.subr.bf16.mxu0 %v3610_v39 }
 0x15a   :  { %932 = vmatpush1.bf16.msra.mxu1 %v3616_v40  ;;  %973 = vmatpush1.bf16.msra.mxu0 %v3618_v41 }
 0x15b   :  { %933 = vmatprep.subr.bf16.mxu1 %v3622_v42  ;;  %974 = vmatprep.subr.bf16.mxu0 %v3624_v43 }
 0x15e   :  { %934 = vmatpush1.bf16.msra.mxu1 %v3628_v44  ;;  %975 = vmatpush1.bf16.msra.mxu0 %v3630_v45 }
 0x15f   :  { %1035 = vmatprep.subr.bf16.mxu1 %v3529_v48  ;;  %1076 = vmatprep.subr.bf16.mxu0 %v3531_v49 }
 0x1f4   :  { %v3686_v56 = vpop.f32.mrb[0].mxu1  ;;  %v3688_v57 = vpop.f32.mrb[8].mxu0 }
 0x1f5   :  { %v465_v60 = vpop.f32.mrb[1].mxu1  ;;  %v538_v61 = vpop.f32.mrb[9].mxu0 }
 0x1f6   :  { %v467_v0 = vpop.f32.mrb[2].mxu1  ;;  %v540_v3 = vpop.f32.mrb[10].mxu0 }
 0x1f7   :  { %v3698_v4 = vadd.f32 %v467_v0, %v252_v58  ;;  %v3700_v7 = vadd.f32 %v540_v3, %v260_v59  ;;  %v469_v8 = vpop.f32.mrb[3].mxu1  ;;  %v542_v9 = vpop.f32.mrb[11].mxu0 }
 0x1f8   :  { %v3702_v10 = vadd.f32 %v469_v8, %v256_v62  ;;  %v3704_v11 = vadd.f32 %v542_v9, %v264_v63 }
 0x1fc   :  { %v473_v13 = vpop.f32.mrb[4].mxu1  ;;  %v546_v15 = vpop.f32.mrb[12].mxu0 }
 0x1fd   :  { %v3706_v16 = vadd.f32 %v473_v13, %v252_v58  ;;  %v3708_v17 = vadd.f32 %v546_v15, %v260_v59  ;;  %v475_v20 = vpop.f32.mrb[5].mxu1  ;;  %v548_v21 = vpop.f32.mrb[13].mxu0 }
 0x1fe   :  { %v3710_v22 = vadd.f32 %v475_v20, %v256_v62  ;;  %v3712_v25 = vadd.f32 %v548_v21, %v264_v63  ;;  %v477_v53 = vpop.f32.mrb[6].mxu1  ;;  %v550_v0 = vpop.f32.mrb[14].mxu0 }
 0x1ff   :  { %v3714_v3 = vadd.f32 %v477_v53, %v252_v58  ;;  %v3716_v8 = vadd.f32 %v550_v0, %v260_v59  ;;  %v479_v9 = vpop.f32.mrb[7].mxu1  ;;  %v552_v55 = vpop.f32.mrb[15].mxu0 }
 0x200   :  { %4444 = vst [vmem:[#allocation18_spill] sm:$0xff] %v3710_v22  ;;  %4445 = vst [vmem:[#allocation19_spill] sm:$0xff] %v3712_v25  ;;  %v3718_v54 = vadd.f32 %v479_v9, %v256_v62  ;;  %v3720_v13 = vadd.f32 %v552_v55, %v264_v63 }
 0x201   :  { %4446 = vst [vmem:[#allocation20_spill] sm:$0xff] %v3714_v3  ;;  %4447 = vst [vmem:[#allocation21_spill] sm:$0xff] %v3716_v8 }
 0x202   :  { %4448 = vst [vmem:[#allocation22_spill] sm:$0xff] %v3718_v54  ;;  %4449 = vst [vmem:[#allocation23_spill] sm:$0xff] %v3720_v13 }
 0x204   :  { %v483_v15 = vpop.f32.mrb[8].mxu1  ;;  %v556_v46 = vpop.f32.mrb[16].mxu0 }
 0x205   :  { %v3722_v52 = vadd.f32 %v483_v15, %v252_v58  ;;  %v3724_v20 = vadd.f32 %v556_v46, %v260_v59  ;;  %v485_v21 = vpop.f32.mrb[9].mxu1  ;;  %v558_v51 = vpop.f32.mrb[17].mxu0 }
 0x206   :  { %v3726_v50 = vadd.f32 %v485_v21, %v256_v62  ;;  %v3728_v53 = vadd.f32 %v558_v51, %v264_v63  ;;  %v487_v0 = vpop.f32.mrb[10].mxu1  ;;  %v560_v47 = vpop.f32.mrb[18].mxu0 }
 0x207   :  { %4450 = vst [vmem:[#allocation24_spill] sm:$0xff] %v3722_v52  ;;  %4451 = vst [vmem:[#allocation25_spill] sm:$0xff] %v3724_v20  ;;  %v3730_v8 = vadd.f32 %v487_v0, %v252_v58  ;;  %v3732_v9 = vadd.f32 %v560_v47, %v260_v59  ;;  %v489_v55 = vpop.f32.mrb[11].mxu1  ;;  %v562_v13 = vpop.f32.mrb[19].mxu0 }
 0x208   :  { %4452 = vst [vmem:[#allocation26_spill] sm:$0xff] %v3726_v50  ;;  %4453 = vst [vmem:[#allocation27_spill] sm:$0xff] %v3728_v53  ;;  %v3734_v54 = vadd.f32 %v489_v55, %v256_v62  ;;  %v3736_v15 = vadd.f32 %v562_v13, %v264_v63 }
 0x209   :  { %4454 = vst [vmem:[#allocation28_spill] sm:$0xff] %v3730_v8  ;;  %4455 = vst [vmem:[#allocation29_spill] sm:$0xff] %v3732_v9 }
 0x20a   :  { %4456 = vst [vmem:[#allocation30_spill] sm:$0xff] %v3734_v54  ;;  %4457 = vst [vmem:[#allocation31_spill] sm:$0xff] %v3736_v15 }
 0x20c   :  { %v493_v46 = vpop.f32.mrb[12].mxu1  ;;  %v566_v20 = vpop.f32.mrb[20].mxu0 }
 0x20d   :  { %v3738_v52 = vadd.f32 %v493_v46, %v252_v58  ;;  %v3740_v21 = vadd.f32 %v566_v20, %v260_v59  ;;  %v495_v51 = vpop.f32.mrb[13].mxu1  ;;  %v568_v53 = vpop.f32.mrb[21].mxu0  ;;  %v464_v20 = vadd.f32 %v3686_v56, %v252_v58 }
 0x20e   :  { %v3742_v50 = vadd.f32 %v495_v51, %v256_v62  ;;  %v3744_v0 = vadd.f32 %v568_v53, %v264_v63  ;;  %v497_v47 = vpop.f32.mrb[14].mxu1  ;;  %v570_v9 = vpop.f32.mrb[22].mxu0  ;;  %v466_v51 = vadd.f32 %v465_v60, %v256_v62 }
 0x20f   :  { %4458 = vst [vmem:[#allocation32_spill] sm:$0xff] %v3738_v52  ;;  %4459 = vst [vmem:[#allocation33_spill] sm:$0xff] %v3740_v21  ;;  %v3746_v8 = vadd.f32 %v497_v47, %v252_v58  ;;  %v3748_v55 = vadd.f32 %v570_v9, %v260_v59  ;;  %v499_v13 = vpop.f32.mrb[15].mxu1  ;;  %v572_v15 = vpop.f32.mrb[23].mxu0  ;;  %v537_v21 = vadd.f32 %v3688_v57, %v260_v59 }
 0x210   :  { %4460 = vst [vmem:[#allocation34_spill] sm:$0xff] %v3742_v50  ;;  %4461 = vst [vmem:[#allocation35_spill] sm:$0xff] %v3744_v0  ;;  %v3750_v54 = vadd.f32 %v499_v13, %v256_v62  ;;  %v3752_v46 = vadd.f32 %v572_v15, %v264_v63  ;;  %v539_v50 = vadd.f32 %v538_v61, %v264_v63 }
 0x211   :  { %4462 = vst [vmem:[#allocation36_spill] sm:$0xff] %v3746_v8  ;;  %4463 = vst [vmem:[#allocation37_spill] sm:$0xff] %v3748_v55 }
 0x212   :  { %4464 = vst [vmem:[#allocation38_spill] sm:$0xff] %v3750_v54  ;;  %4465 = vst [vmem:[#allocation39_spill] sm:$0xff] %v3752_v46 }
 0x214   :  { %v837_v53 = vpop.f32.mrb[16].mxu1  ;;  %v878_v0 = vpop.f32.mrb[24].mxu0 }
 0x215   :  { %v885_v52 = vadd.f32 %v837_v53, %v464_v20  ;;  %v887_v3 = vadd.f32 %v878_v0, %v537_v21  ;;  %v839_v47 = vpop.f32.mrb[17].mxu1  ;;  %v880_v8 = vpop.f32.mrb[25].mxu0 }
 0x216   :  { %v886_v9 = vadd.f32 %v839_v47, %v466_v51  ;;  %v888_v55 = vadd.f32 %v880_v8, %v539_v50  ;;  %v841_v25 = vpop.f32.mrb[18].mxu1  ;;  %v882_v22 = vpop.f32.mrb[26].mxu0 }
 0x217   :  { %v2714_v13 = vmul.f32 -1.442695, %v885_v52  ;;  %v842_v54 = vpop.f32.mrb[19].mxu1  ;;  %v883_v15 = vpop.f32.mrb[27].mxu0 }
 0x218   :  { %v2715_v46 = vmul.f32 -1.442695, %v886_v9  ;;  %v2716_v56 = vmul.f32 -1.442695, %v888_v55  ;;  %v4466_v55 = vmov 0  }
 0x219   :  { %2952 = vpow2.f32 %v2714_v13 }
 0x21a   :  { %2954 = vpow2.f32 %v2715_v46 }
 0x21b   :  { %2956 = vpow2.f32 %v2716_v56 }
 0x21c   :  { %2958 = vtanh.f32 %v887_v3 }
 0x223   :  { %v2953_v57 = vpop.eup %2952 }
 0x224   :  { %v2955_v58 = vpop.eup %2954  ;;  %v892_v59 = vadd.f32 1.0, %v2953_v57 }
 0x225   :  { %v898_v60 = vadd.f32 1.0, %v2955_v58  ;;  %v2957_v61 = vpop.eup %2956 }
 0x226   :  { %2960 = vrcp.f32 %v892_v59  ;;  %v2959_v62 = vpop.eup %2958  ;;  %v905_v52 = vadd.f32 1.0, %v2957_v61 }
 0x227   :  { %2962 = vrcp.f32 %v898_v60 }
 0x228   :  { %2964 = vrcp.f32 %v905_v52 }
 0x230   :  { %v2961_v50 = vpop.eup %2960 }
 0x231   :  { %v2963_v63 = vpop.eup %2962  ;;  %v909_v22 = vmul.f32 %v2961_v50, %v2959_v62 }
 0x232   :  { %v908_v54 = vmul.f32 0.0, %v2963_v63  ;;  %v2965_v8 = vpop.eup %2964 }
 0x234   :  { %v3756_v25 = vadd.f32 %v909_v22, %v908_v54 }
 0x236   :  { %2966 = vtanh.f32 %v3756_v25 }
 0x240   :  { %v2967_v21 = vpop.eup %2966 }
 0x241   :  { %v3759_v0 = vmul.f32 %v2967_v21, %v2965_v8 }
 0x243   :  { %1727 = vadd.xlane.f32.xlu0 %v3759_v0  ;;  %v918_v3 = vpack.c.bf16 %v3759_v0, %v3759_v0 }
 0x245   :  { %952 = vmatmul.mubr.bf16.vlgmr.msra.gmra.mrb[20].mxu1 %v918_v3  ;;  %993 = vmatmul.mubr.bf16.vlgmr.msra.gmra.mrb[28].mxu0 %v918_v3 }
 0x246   :  { %1036 = vmatpush1.bf16.msra.mxu1 %v3540_v1  ;;  %1077 = vmatpush1.bf16.msra.mxu0 %v3542_v2 }
 0x247   :  { %1037 = vmatprep.subr.bf16.mxu1 %v3544_v5  ;;  %1078 = vmatprep.subr.bf16.mxu0 %v3546_v6 }
 0x248   :  { %1067 = vmatprep.mubr.bf16.mxu1 %v4466_v55  ;;  %1108 = vmatprep.mubr.bf16.mxu0 %v4466_v55 }
 0x24a   :  { %1038 = vmatpush1.bf16.msra.mxu1 %v3550_v12  ;;  %1079 = vmatpush1.bf16.msra.mxu0 %v3552_v14 }
 0x24b   :  { %1039 = vmatprep.subr.bf16.mxu1 %v3556_v18  ;;  %1080 = vmatprep.subr.bf16.mxu0 %v3558_v19 }
 0x24e   :  { %1040 = vmatpush1.bf16.msra.mxu1 %v3564_v23  ;;  %1081 = vmatpush1.bf16.msra.mxu0 %v3566_v24 }
 0x24f   :  { %1041 = vmatprep.subr.bf16.mxu1 %v3570_v26  ;;  %1082 = vmatprep.subr.bf16.mxu0 %v3572_v27 }
 0x252   :  { %1042 = vmatpush1.bf16.msra.mxu1 %v3576_v28  ;;  %1083 = vmatpush1.bf16.msra.mxu0 %v3578_v29 }
 0x253   :  { %1043 = vmatprep.subr.bf16.mxu1 %v3582_v30  ;;  %1084 = vmatprep.subr.bf16.mxu0 %v3584_v31 }
 0x256   :  { %1044 = vmatpush1.bf16.msra.mxu1 %v3590_v32  ;;  %1085 = vmatpush1.bf16.msra.mxu0 %v3592_v33 }
 0x257   :  { %1045 = vmatprep.subr.bf16.mxu1 %v3596_v34  ;;  %1086 = vmatprep.subr.bf16.mxu0 %v3598_v35 }
 0x25a   :  { %1046 = vmatpush1.bf16.msra.mxu1 %v3602_v36  ;;  %1087 = vmatpush1.bf16.msra.mxu0 %v3604_v37 }
 0x25b   :  { %1047 = vmatprep.subr.bf16.mxu1 %v3608_v38  ;;  %1088 = vmatprep.subr.bf16.mxu0 %v3610_v39 }
 0x25e   :  { %1048 = vmatpush1.bf16.msra.mxu1 %v3616_v40  ;;  %1089 = vmatpush1.bf16.msra.mxu0 %v3618_v41 }
 0x25f   :  { %1049 = vmatprep.subr.bf16.mxu1 %v3622_v42  ;;  %1090 = vmatprep.subr.bf16.mxu0 %v3624_v43 }
 0x262   :  { %1050 = vmatpush1.bf16.msra.mxu1 %v3628_v44  ;;  %1091 = vmatpush1.bf16.msra.mxu0 %v3630_v45 }
 0x263   :  { %1151 = vmatprep.subr.bf16.mxu1 %v3529_v48  ;;  %1192 = vmatprep.subr.bf16.mxu0 %v3531_v49 }
 0x318   :  { %v953_v46 = vpop.f32.mrb[20].mxu1  ;;  %v994_v20 = vpop.f32.mrb[28].mxu0 }
 0x319   :  { %v1001_v51 = vadd.f32 %v953_v46, %v3698_v4  ;;  %v1003_v53 = vadd.f32 %v994_v20, %v3700_v7  ;;  %v955_v47 = vpop.f32.mrb[21].mxu1  ;;  %v996_v9 = vpop.f32.mrb[29].mxu0 }
 0x31a   :  { %v1002_v13 = vadd.f32 %v955_v47, %v3702_v10  ;;  %v1004_v15 = vadd.f32 %v996_v9, %v3704_v11  ;;  %v957_v56 = vpop.f32.mrb[22].mxu1  ;;  %v998_v57 = vpop.f32.mrb[30].mxu0 }
 0x31b   :  { %v2717_v58 = vmul.f32 -1.442695, %v1001_v51  ;;  %v958_v59 = vpop.f32.mrb[23].mxu1  ;;  %v999_v60 = vpop.f32.mrb[31].mxu0  ;;  %v4467_v57 = vld [vmem:[#allocation18_spill] sm:$0xff] }
 0x31c   :  { %v2718_v61 = vmul.f32 -1.442695, %v1002_v13  ;;  %v2719_v62 = vmul.f32 -1.442695, %v1004_v15  ;;  %v4468_v59 = vld [vmem:[#allocation19_spill] sm:$0xff] }
 0x31d   :  { %2968 = vpow2.f32 %v2717_v58 }
 0x31e   :  { %2970 = vpow2.f32 %v2718_v61 }
 0x31f   :  { %2972 = vpow2.f32 %v2719_v62 }
 0x320   :  { %2974 = vtanh.f32 %v1003_v53 }
 0x327   :  { %v2969_v50 = vpop.eup %2968 }
 0x328   :  { %v2971_v63 = vpop.eup %2970  ;;  %v1008_v4 = vadd.f32 1.0, %v2969_v50 }
 0x329   :  { %v1014_v7 = vadd.f32 1.0, %v2971_v63  ;;  %v2973_v10 = vpop.eup %2972 }
 0x32a   :  { %2976 = vrcp.f32 %v1008_v4  ;;  %v2975_v22 = vpop.eup %2974  ;;  %v1021_v8 = vadd.f32 1.0, %v2973_v10 }
 0x32b   :  { %2978 = vrcp.f32 %v1014_v7 }
 0x32c   :  { %2980 = vrcp.f32 %v1021_v8 }
 0x334   :  { %v2977_v11 = vpop.eup %2976 }
 0x335   :  { %v2979_v52 = vpop.eup %2978  ;;  %v1025_v54 = vmul.f32 %v2977_v11, %v2975_v22 }
 0x336   :  { %v1024_v21 = vmul.f32 %v2979_v52, %v3756_v25  ;;  %v2981_v46 = vpop.eup %2980 }
 0x338   :  { %v3803_v3 = vadd.f32 %v1025_v54, %v1024_v21 }
 0x33a   :  { %2982 = vtanh.f32 %v3803_v3 }
 0x344   :  { %v2983_v20 = vpop.eup %2982 }
 0x345   :  { %v3806_v51 = vmul.f32 %v2983_v20, %v2981_v46 }
 0x347   :  { %1729 = vadd.xlane.f32.xlu0 %v3806_v51  ;;  %v1034_v53 = vpack.c.bf16 %v3806_v51, %v3806_v51 }
 0x349   :  { %1068 = vmatmul.mubr.bf16.vlgmr.msra.gmra.mrb[24].mxu1 %v1034_v53  ;;  %1109 = vmatmul.mubr.bf16.vlgmr.msra.gmra.mrb[32].mxu0 %v1034_v53 }
 0x34a   :  { %1152 = vmatpush1.bf16.msra.mxu1 %v3540_v1  ;;  %1193 = vmatpush1.bf16.msra.mxu0 %v3542_v2 }
 0x34b   :  { %1153 = vmatprep.subr.bf16.mxu1 %v3544_v5  ;;  %1194 = vmatprep.subr.bf16.mxu0 %v3546_v6 }
 0x34c   :  { %1183 = vmatprep.mubr.bf16.mxu1 %v4466_v55  ;;  %1224 = vmatprep.mubr.bf16.mxu0 %v4466_v55 }
 0x34e   :  { %1154 = vmatpush1.bf16.msra.mxu1 %v3550_v12  ;;  %1195 = vmatpush1.bf16.msra.mxu0 %v3552_v14 }
 0x34f   :  { %1155 = vmatprep.subr.bf16.mxu1 %v3556_v18  ;;  %1196 = vmatprep.subr.bf16.mxu0 %v3558_v19 }
 0x352   :  { %1156 = vmatpush1.bf16.msra.mxu1 %v3564_v23  ;;  %1197 = vmatpush1.bf16.msra.mxu0 %v3566_v24 }
 0x353   :  { %1157 = vmatprep.subr.bf16.mxu1 %v3570_v26  ;;  %1198 = vmatprep.subr.bf16.mxu0 %v3572_v27 }
 0x356   :  { %1158 = vmatpush1.bf16.msra.mxu1 %v3576_v28  ;;  %1199 = vmatpush1.bf16.msra.mxu0 %v3578_v29 }
 0x357   :  { %1159 = vmatprep.subr.bf16.mxu1 %v3582_v30  ;;  %1200 = vmatprep.subr.bf16.mxu0 %v3584_v31 }
 0x35a   :  { %1160 = vmatpush1.bf16.msra.mxu1 %v3590_v32  ;;  %1201 = vmatpush1.bf16.msra.mxu0 %v3592_v33 }
 0x35b   :  { %1161 = vmatprep.subr.bf16.mxu1 %v3596_v34  ;;  %1202 = vmatprep.subr.bf16.mxu0 %v3598_v35 }
 0x35e   :  { %1162 = vmatpush1.bf16.msra.mxu1 %v3602_v36  ;;  %1203 = vmatpush1.bf16.msra.mxu0 %v3604_v37 }
 0x35f   :  { %1163 = vmatprep.subr.bf16.mxu1 %v3608_v38  ;;  %1204 = vmatprep.subr.bf16.mxu0 %v3610_v39 }
 0x362   :  { %1164 = vmatpush1.bf16.msra.mxu1 %v3616_v40  ;;  %1205 = vmatpush1.bf16.msra.mxu0 %v3618_v41 }
 0x363   :  { %1165 = vmatprep.subr.bf16.mxu1 %v3622_v42  ;;  %1206 = vmatprep.subr.bf16.mxu0 %v3624_v43 }
 0x366   :  { %1166 = vmatpush1.bf16.msra.mxu1 %v3628_v44  ;;  %1207 = vmatpush1.bf16.msra.mxu0 %v3630_v45 }
 0x367   :  { %1267 = vmatprep.subr.bf16.mxu1 %v3529_v48  ;;  %1308 = vmatprep.subr.bf16.mxu0 %v3531_v49 }
 0x41c   :  { %v1069_v25 = vpop.f32.mrb[24].mxu1  ;;  %v1110_v47 = vpop.f32.mrb[32].mxu0 }
 0x41d   :  { %v1117_v9 = vadd.f32 %v1069_v25, %v3706_v16  ;;  %v1119_v13 = vadd.f32 %v1110_v47, %v3708_v17  ;;  %v1071_v15 = vpop.f32.mrb[25].mxu1  ;;  %v1112_v56 = vpop.f32.mrb[33].mxu0 }
 0x41e   :  { %v1118_v58 = vadd.f32 %v1071_v15, %v4467_v57  ;;  %v1120_v60 = vadd.f32 %v1112_v56, %v4468_v59  ;;  %v1073_v61 = vpop.f32.mrb[26].mxu1  ;;  %v1114_v62 = vpop.f32.mrb[34].mxu0  ;;  %v4469_v57 = vld [vmem:[#allocation20_spill] sm:$0xff]  ;;  %v4470_v59 = vld [vmem:[#allocation21_spill] sm:$0xff] }
 0x41f   :  { %v2720_v50 = vmul.f32 -1.442695, %v1117_v9  ;;  %v1074_v63 = vpop.f32.mrb[27].mxu1  ;;  %v1115_v4 = vpop.f32.mrb[35].mxu0 }
 0x420   :  { %v2721_v7 = vmul.f32 -1.442695, %v1118_v58  ;;  %v2722_v10 = vmul.f32 -1.442695, %v1120_v60  ;;  %v4472_v4 = vld [vmem:[#allocation23_spill] sm:$0xff] }
 0x421   :  { %2984 = vpow2.f32 %v2720_v50  ;;  %v4471_v50 = vld [vmem:[#allocation22_spill] sm:$0xff] }
 0x422   :  { %2986 = vpow2.f32 %v2721_v7 }
 0x423   :  { %2988 = vpow2.f32 %v2722_v10 }
 0x424   :  { %2990 = vtanh.f32 %v1119_v13 }
 0x42b   :  { %v2985_v22 = vpop.eup %2984 }
 0x42c   :  { %v2987_v11 = vpop.eup %2986  ;;  %v1124_v16 = vadd.f32 1.0, %v2985_v22 }
 0x42d   :  { %v1130_v17 = vadd.f32 1.0, %v2987_v11  ;;  %v2989_v52 = vpop.eup %2988 }
 0x42e   :  { %2992 = vrcp.f32 %v1124_v16  ;;  %v2991_v54 = vpop.eup %2990  ;;  %v1137_v20 = vadd.f32 1.0, %v2989_v52 }
 0x42f   :  { %2994 = vrcp.f32 %v1130_v17 }
 0x430   :  { %2996 = vrcp.f32 %v1137_v20 }
 0x438   :  { %v2993_v8 = vpop.eup %2992 }
 0x439   :  { %v2995_v21 = vpop.eup %2994  ;;  %v1141_v46 = vmul.f32 %v2993_v8, %v2991_v54 }
 0x43a   :  { %v1140_v53 = vmul.f32 %v2995_v21, %v3803_v3  ;;  %v2997_v47 = vpop.eup %2996 }
 0x43c   :  { %v3850_v25 = vadd.f32 %v1141_v46, %v1140_v53 }
 0x43e   :  { %2998 = vtanh.f32 %v3850_v25 }
 0x448   :  { %v2999_v9 = vpop.eup %2998 }
 0x449   :  { %v3853_v15 = vmul.f32 %v2999_v9, %v2997_v47 }
 0x44b   :  { %1731 = vadd.xlane.f32.xlu1 %v3853_v15  ;;  %v1150_v13 = vpack.c.bf16 %v3853_v15, %v3853_v15 }
 0x44d   :  { %1184 = vmatmul.mubr.bf16.vlgmr.msra.gmra.mrb[28].mxu1 %v1150_v13  ;;  %1225 = vmatmul.mubr.bf16.vlgmr.msra.gmra.mrb[36].mxu0 %v1150_v13 }
 0x44e   :  { %1268 = vmatpush1.bf16.msra.mxu1 %v3540_v1  ;;  %1309 = vmatpush1.bf16.msra.mxu0 %v3542_v2 }
 0x44f   :  { %1269 = vmatprep.subr.bf16.mxu1 %v3544_v5  ;;  %1310 = vmatprep.subr.bf16.mxu0 %v3546_v6 }
 0x450   :  { %1299 = vmatprep.mubr.bf16.mxu1 %v4466_v55  ;;  %1340 = vmatprep.mubr.bf16.mxu0 %v4466_v55 }
 0x452   :  { %1270 = vmatpush1.bf16.msra.mxu1 %v3550_v12  ;;  %1311 = vmatpush1.bf16.msra.mxu0 %v3552_v14 }
 0x453   :  { %1271 = vmatprep.subr.bf16.mxu1 %v3556_v18  ;;  %1312 = vmatprep.subr.bf16.mxu0 %v3558_v19 }
 0x456   :  { %1272 = vmatpush1.bf16.msra.mxu1 %v3564_v23  ;;  %1313 = vmatpush1.bf16.msra.mxu0 %v3566_v24 }
 0x457   :  { %1273 = vmatprep.subr.bf16.mxu1 %v3570_v26  ;;  %1314 = vmatprep.subr.bf16.mxu0 %v3572_v27 }
 0x45a   :  { %1274 = vmatpush1.bf16.msra.mxu1 %v3576_v28  ;;  %1315 = vmatpush1.bf16.msra.mxu0 %v3578_v29 }
 0x45b   :  { %1275 = vmatprep.subr.bf16.mxu1 %v3582_v30  ;;  %1316 = vmatprep.subr.bf16.mxu0 %v3584_v31 }
 0x45e   :  { %1276 = vmatpush1.bf16.msra.mxu1 %v3590_v32  ;;  %1317 = vmatpush1.bf16.msra.mxu0 %v3592_v33 }
 0x45f   :  { %1277 = vmatprep.subr.bf16.mxu1 %v3596_v34  ;;  %1318 = vmatprep.subr.bf16.mxu0 %v3598_v35 }
 0x462   :  { %1278 = vmatpush1.bf16.msra.mxu1 %v3602_v36  ;;  %1319 = vmatpush1.bf16.msra.mxu0 %v3604_v37 }
 0x463   :  { %1279 = vmatprep.subr.bf16.mxu1 %v3608_v38  ;;  %1320 = vmatprep.subr.bf16.mxu0 %v3610_v39 }
 0x466   :  { %1280 = vmatpush1.bf16.msra.mxu1 %v3616_v40  ;;  %1321 = vmatpush1.bf16.msra.mxu0 %v3618_v41 }
 0x467   :  { %1281 = vmatprep.subr.bf16.mxu1 %v3622_v42  ;;  %1322 = vmatprep.subr.bf16.mxu0 %v3624_v43 }
 0x46a   :  { %1282 = vmatpush1.bf16.msra.mxu1 %v3628_v44  ;;  %1323 = vmatpush1.bf16.msra.mxu0 %v3630_v45 }
 0x46b   :  { %1383 = vmatprep.subr.bf16.mxu1 %v3529_v48  ;;  %1424 = vmatprep.subr.bf16.mxu0 %v3531_v49 }
 0x520   :  { %v1185_v3 = vpop.f32.mrb[28].mxu1  ;;  %v1226_v56 = vpop.f32.mrb[36].mxu0 }
 0x521   :  { %v1233_v58 = vadd.f32 %v1185_v3, %v4469_v57  ;;  %v1235_v60 = vadd.f32 %v1226_v56, %v4470_v59  ;;  %v1187_v61 = vpop.f32.mrb[29].mxu1  ;;  %v1228_v62 = vpop.f32.mrb[37].mxu0 }
 0x522   :  { %v1234_v63 = vadd.f32 %v1187_v61, %v4471_v50  ;;  %v1236_v7 = vadd.f32 %v1228_v62, %v4472_v4  ;;  %v1189_v10 = vpop.f32.mrb[30].mxu1  ;;  %v1230_v22 = vpop.f32.mrb[38].mxu0 }
 0x523   :  { %v2723_v11 = vmul.f32 -1.442695, %v1233_v58  ;;  %v1190_v16 = vpop.f32.mrb[31].mxu1  ;;  %v1231_v17 = vpop.f32.mrb[39].mxu0 }
 0x524   :  { %v2724_v48 = vmul.f32 -1.442695, %v1234_v63  ;;  %v2725_v49 = vmul.f32 -1.442695, %v1236_v7 }
 0x525   :  { %3000 = vpow2.f32 %v2723_v11 }
 0x526   :  { %3002 = vpow2.f32 %v2724_v48 }
 0x527   :  { %3004 = vpow2.f32 %v2725_v49 }
 0x528   :  { %3006 = vtanh.f32 %v1235_v60 }
 0x52f   :  { %v3001_v52 = vpop.eup %3000 }
 0x530   :  { %v3003_v54 = vpop.eup %3002  ;;  %v1240_v8 = vadd.f32 1.0, %v3001_v52 }
 0x531   :  { %v1246_v21 = vadd.f32 1.0, %v3003_v54  ;;  %v3005_v46 = vpop.eup %3004 }
 0x532   :  { %3008 = vrcp.f32 %v1240_v8  ;;  %v3007_v20 = vpop.eup %3006  ;;  %v1253_v13 = vadd.f32 1.0, %v3005_v46  ;;  %v3959_v46 = vld [vmem:[#allocation6 + $0x8] ss:$16 sps:$4 sm:$0xff]  }
 0x533   :  { %3010 = vrcp.f32 %v1246_v21  ;;  %v3956_v21 = vld [vmem:[#allocation6] ss:$16 sps:$4 sm:$0xff]  }
 0x534   :  { %3012 = vrcp.f32 %v1253_v13  ;;  %v3976_v13 = vld [vmem:[#allocation6 + $0x44] ss:$16 sps:$4 sm:$0xff]  }
 0x53c   :  { %v3009_v53 = vpop.eup %3008 }
 0x53d   :  { %v3011_v47 = vpop.eup %3010  ;;  %v1257_v9 = vmul.f32 %v3009_v53, %v3007_v20  ;;  %v3962_v20 = vld [vmem:[#allocation6 + $0x24] ss:$16 sps:$4 sm:$0xff]   ;;  %v3965_v53 = vld [vmem:[#allocation6 + $0x2c] ss:$16 sps:$4 sm:$0xff]  }
 0x53e   :  { %v1256_v3 = vmul.f32 %v3011_v47, %v3850_v25  ;;  %v3013_v57 = vpop.eup %3012  ;;  %v3970_v47 = vld [vmem:[#allocation6 + $0x20] ss:$16 sps:$4 sm:$0xff]  }
 0x540   :  { %v3897_v56 = vadd.f32 %v1257_v9, %v1256_v3  ;;  %v3973_v9 = vld [vmem:[#allocation6 + $0x28] ss:$16 sps:$4 sm:$0xff]   ;;  %v3979_v3 = vld [vmem:[#allocation6 + $0x4c] ss:$16 sps:$4 sm:$0xff]  }
 0x542   :  { %3014 = vtanh.f32 %v3897_v56 }
 0x54c   :  { %v3015_v58 = vpop.eup %3014 }
 0x54d   :  { %v3900_v59 = vmul.f32 %v3015_v58, %v3013_v57  ;;  %v3985_v57 = vld [vmem:[#allocation6 + $0x48] ss:$16 sps:$4 sm:$0xff]   ;;  %v3988_v58 = vld [vmem:[#allocation6 + $0x64] ss:$16 sps:$4 sm:$0xff]  }
 0x54f   :  { %1733 = vadd.xlane.f32.xlu1 %v3900_v59  ;;  %v1266_v60 = vpack.c.bf16 %v3900_v59, %v3900_v59 }
 0x551   :  { %1300 = vmatmul.mubr.bf16.vlgmr.msra.gmra.mrb[32].mxu1 %v1266_v60  ;;  %1341 = vmatmul.mubr.bf16.vlgmr.msra.gmra.mrb[40].mxu0 %v1266_v60  ;;  %v3991_v60 = vld [vmem:[#allocation6 + $0x6c] ss:$16 sps:$4 sm:$0xff]  }
 0x552   :  { %1384 = vmatpush1.bf16.msra.mxu1 %v3540_v1  ;;  %1425 = vmatpush1.bf16.msra.mxu0 %v3542_v2  ;;  %v3937_v1 = vld [vmem:[#allocation6 + $0x4] ss:$16 sps:$4 sm:$0xff]   ;;  %v3940_v2 = vld [vmem:[#allocation6 + $0xc] ss:$16 sps:$4 sm:$0xff]  }
 0x553   :  { %1385 = vmatprep.subr.bf16.mxu1 %v3544_v5  ;;  %1426 = vmatprep.subr.bf16.mxu0 %v3546_v6 }
 0x554   :  { %1415 = vmatprep.mubr.bf16.mxu1 %v4466_v55  ;;  %1456 = vmatprep.mubr.bf16.mxu0 %v4466_v55 }
 0x556   :  { %1386 = vmatpush1.bf16.msra.mxu1 %v3550_v12  ;;  %1427 = vmatpush1.bf16.msra.mxu0 %v3552_v14  ;;  %v4473_v12 = vld [vmem:[#allocation24_spill] sm:$0xff] }
 0x557   :  { %1387 = vmatprep.subr.bf16.mxu1 %v3556_v18  ;;  %1428 = vmatprep.subr.bf16.mxu0 %v3558_v19  ;;  %v4474_v18 = vld [vmem:[#allocation25_spill] sm:$0xff] }
 0x55a   :  { %1388 = vmatpush1.bf16.msra.mxu1 %v3564_v23  ;;  %1429 = vmatpush1.bf16.msra.mxu0 %v3566_v24 }
 0x55b   :  { %1389 = vmatprep.subr.bf16.mxu1 %v3570_v26  ;;  %1430 = vmatprep.subr.bf16.mxu0 %v3572_v27  ;;  %v4475_v26 = vld [vmem:[#allocation26_spill] sm:$0xff] }
 0x55e   :  { %1390 = vmatpush1.bf16.msra.mxu1 %v3576_v28  ;;  %1431 = vmatpush1.bf16.msra.mxu0 %v3578_v29  ;;  %v4476_v28 = vld [vmem:[#allocation27_spill] sm:$0xff] }
 0x55f   :  { %1391 = vmatprep.subr.bf16.mxu1 %v3582_v30  ;;  %1432 = vmatprep.subr.bf16.mxu0 %v3584_v31 }
 0x562   :  { %1392 = vmatpush1.bf16.msra.mxu1 %v3590_v32  ;;  %1433 = vmatpush1.bf16.msra.mxu0 %v3592_v33 }
 0x563   :  { %1393 = vmatprep.subr.bf16.mxu1 %v3596_v34  ;;  %1434 = vmatprep.subr.bf16.mxu0 %v3598_v35 }
 0x566   :  { %1394 = vmatpush1.bf16.msra.mxu1 %v3602_v36  ;;  %1435 = vmatpush1.bf16.msra.mxu0 %v3604_v37 }
 0x567   :  { %1395 = vmatprep.subr.bf16.mxu1 %v3608_v38  ;;  %1436 = vmatprep.subr.bf16.mxu0 %v3610_v39 }
 0x56a   :  { %1396 = vmatpush1.bf16.msra.mxu1 %v3616_v40  ;;  %1437 = vmatpush1.bf16.msra.mxu0 %v3618_v41 }
 0x56b   :  { %1397 = vmatprep.subr.bf16.mxu1 %v3622_v42  ;;  %1438 = vmatprep.subr.bf16.mxu0 %v3624_v43 }
 0x56e   :  { %1398 = vmatpush1.bf16.msra.mxu1 %v3628_v44  ;;  %1439 = vmatpush1.bf16.msra.mxu0 %v3630_v45 }
 0x56f   :  { %1499 = vmatprep.subr.bf16.mxu1 %v3937_v1  ;;  %1540 = vmatprep.subr.bf16.mxu0 %v3940_v2 }
 0x624   :  { %v1301_v5 = vpop.f32.mrb[32].mxu1  ;;  %v1342_v6 = vpop.f32.mrb[40].mxu0 }
 0x625   :  { %v1349_v14 = vadd.f32 %v1301_v5, %v4473_v12  ;;  %v1351_v19 = vadd.f32 %v1342_v6, %v4474_v18  ;;  %v1303_v23 = vpop.f32.mrb[33].mxu1  ;;  %v1344_v24 = vpop.f32.mrb[41].mxu0  ;;  %v3994_v5 = vld [vmem:[#allocation6 + $0x60] ss:$16 sps:$4 sm:$0xff]   ;;  %v3997_v6 = vld [vmem:[#allocation6 + $0x68] ss:$16 sps:$4 sm:$0xff]  }
 0x626   :  { %v1350_v27 = vadd.f32 %v1303_v23, %v4475_v26  ;;  %v1352_v29 = vadd.f32 %v1344_v24, %v4476_v28  ;;  %v1305_v30 = vpop.f32.mrb[34].mxu1  ;;  %v1346_v31 = vpop.f32.mrb[42].mxu0  ;;  %v4000_v12 = vld [vmem:[#allocation6 + $0x84] ss:$16 sps:$4 sm:$0xff]   ;;  %v4006_v18 = vld [vmem:[#allocation6 + $0x80] ss:$16 sps:$4 sm:$0xff]  }
 0x627   :  { %v2726_v32 = vmul.f32 -1.442695, %v1349_v14  ;;  %v1306_v33 = vpop.f32.mrb[35].mxu1  ;;  %v1347_v34 = vpop.f32.mrb[43].mxu0  ;;  %v4003_v14 = vld [vmem:[#allocation6 + $0x8c] ss:$16 sps:$4 sm:$0xff]  }
 0x628   :  { %v2727_v35 = vmul.f32 -1.442695, %v1350_v27  ;;  %v2728_v25 = vmul.f32 -1.442695, %v1352_v29  ;;  %v4012_v23 = vld [vmem:[#allocation6 + $0xa4] ss:$16 sps:$4 sm:$0xff]  }
 0x629   :  { %3016 = vpow2.f32 %v2726_v32  ;;  %v4015_v24 = vld [vmem:[#allocation6 + $0xac] ss:$16 sps:$4 sm:$0xff]   ;;  %v4478_v26 = vld [vmem:[#allocation29_spill] sm:$0xff]  ;;  %v4480_v29 = vld [vmem:[#allocation31_spill] sm:$0xff] }
 0x62a   :  { %3018 = vpow2.f32 %v2727_v35  ;;  %v4479_v28 = vld [vmem:[#allocation30_spill] sm:$0xff] }
 0x62b   :  { %3020 = vpow2.f32 %v2728_v25 }
 0x62c   :  { %3022 = vtanh.f32 %v1351_v19  ;;  %v4009_v19 = vld [vmem:[#allocation6 + $0x88] ss:$16 sps:$4 sm:$0xff]  }
 0x633   :  { %v3017_v61 = vpop.eup %3016 }
 0x634   :  { %v3019_v62 = vpop.eup %3018  ;;  %v1356_v50 = vadd.f32 1.0, %v3017_v61 }
 0x635   :  { %v1362_v63 = vadd.f32 1.0, %v3019_v62  ;;  %v3021_v4 = vpop.eup %3020 }
 0x636   :  { %3024 = vrcp.f32 %v1356_v50  ;;  %v3023_v7 = vpop.eup %3022  ;;  %v1369_v16 = vadd.f32 1.0, %v3021_v4 }
 0x637   :  { %3026 = vrcp.f32 %v1362_v63 }
 0x638   :  { %3028 = vrcp.f32 %v1369_v16 }
 0x640   :  { %v3025_v10 = vpop.eup %3024 }
 0x641   :  { %v3027_v22 = vpop.eup %3026  ;;  %v1373_v11 = vmul.f32 %v3025_v10, %v3023_v7 }
 0x642   :  { %v1372_v17 = vmul.f32 %v3027_v22, %v3897_v56  ;;  %v3029_v49 = vpop.eup %3028  ;;  %v3982_v56 = vld [vmem:[#allocation6 + $0x40] ss:$16 sps:$4 sm:$0xff]  }
 0x644   :  { %v3948_v48 = vadd.f32 %v1373_v11, %v1372_v17 }
 0x646   :  { %3030 = vtanh.f32 %v3948_v48 }
 0x650   :  { %v3031_v52 = vpop.eup %3030 }
 0x651   :  { %v3951_v54 = vmul.f32 %v3031_v52, %v3029_v49  ;;  %v3215_v52 = vld [vmem:[#allocation6 + $0xa8] ss:$16 sps:$4 sm:$0xff]  }
 0x653   :  { %1735 = vadd.xlane.f32.xlu0 %v3951_v54  ;;  %v1382_v8 = vpack.c.bf16 %v3951_v54, %v3951_v54 }
 0x655   :  { %1416 = vmatmul.mubr.bf16.vlgmr.msra.gmra.mrb[36].mxu1 %v1382_v8  ;;  %1457 = vmatmul.mubr.bf16.vlgmr.msra.gmra.mrb[44].mxu0 %v1382_v8  ;;  %v3216_v8 = vld [vmem:[#allocation6 + $0xc4] ss:$16 sps:$4 sm:$0xff]  }
 0x656   :  { %1500 = vmatpush1.bf16.msra.mxu1 %v3956_v21  ;;  %1541 = vmatpush1.bf16.msra.mxu0 %v3959_v46 }
 0x657   :  { %1501 = vmatprep.subr.bf16.mxu1 %v3962_v20  ;;  %1542 = vmatprep.subr.bf16.mxu0 %v3965_v53 }
 0x658   :  { %1531 = vmatprep.mubr.bf16.mxu1 %v4466_v55  ;;  %1572 = vmatprep.mubr.bf16.mxu0 %v4466_v55 }
 0x65a   :  { %1502 = vmatpush1.bf16.msra.mxu1 %v3970_v47  ;;  %1543 = vmatpush1.bf16.msra.mxu0 %v3973_v9 }
 0x65b   :  { %1503 = vmatprep.subr.bf16.mxu1 %v3976_v13  ;;  %1544 = vmatprep.subr.bf16.mxu0 %v3979_v3 }
 0x65e   :  { %1504 = vmatpush1.bf16.msra.mxu1 %v3982_v56  ;;  %1545 = vmatpush1.bf16.msra.mxu0 %v3985_v57 }
 0x65f   :  { %1505 = vmatprep.subr.bf16.mxu1 %v3988_v58  ;;  %1546 = vmatprep.subr.bf16.mxu0 %v3991_v60 }
 0x662   :  { %1506 = vmatpush1.bf16.msra.mxu1 %v3994_v5  ;;  %1547 = vmatpush1.bf16.msra.mxu0 %v3997_v6 }
 0x663   :  { %1507 = vmatprep.subr.bf16.mxu1 %v4000_v12  ;;  %1548 = vmatprep.subr.bf16.mxu0 %v4003_v14 }
 0x666   :  { %1508 = vmatpush1.bf16.msra.mxu1 %v4006_v18  ;;  %1549 = vmatpush1.bf16.msra.mxu0 %v4009_v19 }
 0x667   :  { %1509 = vmatprep.subr.bf16.mxu1 %v4012_v23  ;;  %1550 = vmatprep.subr.bf16.mxu0 %v4015_v24 }
 0x66a   :  { %1510 = vmatpush1.bf16.msra.mxu1 %v3602_v36  ;;  %1551 = vmatpush1.bf16.msra.mxu0 %v3604_v37 }
 0x66b   :  { %1511 = vmatprep.subr.bf16.mxu1 %v3608_v38  ;;  %1552 = vmatprep.subr.bf16.mxu0 %v3610_v39  ;;  %v4477_v38 = vld [vmem:[#allocation28_spill] sm:$0xff] }
 0x66e   :  { %1512 = vmatpush1.bf16.msra.mxu1 %v3616_v40  ;;  %1553 = vmatpush1.bf16.msra.mxu0 %v3618_v41 }
 0x66f   :  { %1513 = vmatprep.subr.bf16.mxu1 %v3622_v42  ;;  %1554 = vmatprep.subr.bf16.mxu0 %v3624_v43 }
 0x672   :  { %1514 = vmatpush1.bf16.msra.mxu1 %v3628_v44  ;;  %1555 = vmatpush1.bf16.msra.mxu0 %v3630_v45 }
 0x673   :  { %1615 = vmatprep.subr.bf16.mxu1 %v3937_v1  ;;  %1656 = vmatprep.subr.bf16.mxu0 %v3940_v2 }
 0x728   :  { %v1417_v36 = vpop.f32.mrb[36].mxu1  ;;  %v1458_v37 = vpop.f32.mrb[44].mxu0 }
 0x729   :  { %v1465_v39 = vadd.f32 %v1417_v36, %v4477_v38  ;;  %v1467_v40 = vadd.f32 %v1458_v37, %v4478_v26  ;;  %v1419_v27 = vpop.f32.mrb[37].mxu1  ;;  %v1460_v41 = vpop.f32.mrb[45].mxu0 }
 0x72a   :  { %v1466_v42 = vadd.f32 %v1419_v27, %v4479_v28  ;;  %v1468_v43 = vadd.f32 %v1460_v41, %v4480_v29  ;;  %v1421_v30 = vpop.f32.mrb[38].mxu1  ;;  %v1462_v44 = vpop.f32.mrb[46].mxu0 }
 0x72b   :  { %v2729_v31 = vmul.f32 -1.442695, %v1465_v39  ;;  %v1422_v45 = vpop.f32.mrb[39].mxu1  ;;  %v1463_v32 = vpop.f32.mrb[47].mxu0 }
 0x72c   :  { %v2730_v1 = vmul.f32 -1.442695, %v1466_v42  ;;  %v2731_v2 = vmul.f32 -1.442695, %v1468_v43 }
 0x72d   :  { %3032 = vpow2.f32 %v2729_v31 }
 0x72e   :  { %3034 = vpow2.f32 %v2730_v1 }
 0x72f   :  { %3036 = vpow2.f32 %v2731_v2  ;;  %v1728_v2 = vpop.xlane.xlu0 %1727 }
 0x730   :  { %3038 = vtanh.f32 %v1467_v40 }
 0x737   :  { %v3033_v33 = vpop.eup %3032 }
 0x738   :  { %v3035_v34 = vpop.eup %3034  ;;  %v1472_v35 = vadd.f32 1.0, %v3033_v33  ;;  %v1744_v33 = vmul.f32 0.0078125, %v1728_v2 }
 0x739   :  { %v1478_v25 = vadd.f32 1.0, %v3035_v34  ;;  %v3037_v61 = vpop.eup %3036  ;;  %v4073_v34 = vpop.xlane.xlu0 %1729 }
 0x73a   :  { %3040 = vrcp.f32 %v1472_v35  ;;  %v3039_v62 = vpop.eup %3038  ;;  %v1485_v7 = vadd.f32 1.0, %v3037_v61  ;;  %v1732_v35 = vpop.xlane.xlu1 %1731 }
 0x73b   :  { %3042 = vrcp.f32 %v1478_v25 }
 0x73c   :  { %3044 = vrcp.f32 %v1485_v7 }
 0x744   :  { %v3041_v50 = vpop.eup %3040 }
 0x745   :  { %v3043_v63 = vpop.eup %3042  ;;  %v1489_v4 = vmul.f32 %v3041_v50, %v3039_v62  ;;  %v4076_v62 = vsub.f32 %v3759_v0, %v1744_v33  ;;  %v1746_v50 = vmul.f32 0.0078125, %v1732_v35  ;;  %v1745_v33 = vmul.f32 0.0078125, %v4073_v34  ;;  %v1734_v35 = vpop.xlane.xlu1 %1733 }
 0x746   :  { %v1488_v10 = vmul.f32 %v3043_v63, %v3948_v48  ;;  %v3045_v11 = vpop.eup %3044  ;;  %v3214_v48 = vld [vmem:[#allocation6 + $0xa0] ss:$16 sps:$4 sm:$0xff]  }
 0x748   :  { %v4035_v22 = vadd.f32 %v1489_v4, %v1488_v10  ;;  %v1736_v4 = vpop.xlane.xlu0 %1735  ;;  %v4079_v10 = vsub.f32 %v3853_v15, %v1746_v50  ;;  %v4103_v50 = vsub.f32 %v3806_v51, %v1745_v33 }
 0x74a   :  { %3046 = vtanh.f32 %v4035_v22  ;;  %v1761_v34 = vmul.f32 %v4103_v50, %v4103_v50 }
 0x754   :  { %v3047_v16 = vpop.eup %3046 }
 0x755   :  { %v4038_v17 = vmul.f32 %v3047_v16, %v3045_v11  ;;  %v1760_v11 = vmul.f32 %v4076_v62, %v4076_v62  ;;  %v1762_v16 = vmul.f32 %v4079_v10, %v4079_v10 }
 0x757   :  { %1737 = vadd.xlane.f32.xlu1 %v4038_v17  ;;  %v1498_v49 = vpack.c.bf16 %v4038_v17, %v4038_v17 }
 0x759   :  { %1532 = vmatmul.mubr.bf16.vlgmr.msra.gmra.mrb[40].mxu1 %v1498_v49  ;;  %1573 = vmatmul.mubr.bf16.vlgmr.msra.gmra.mrb[48].mxu0 %v1498_v49 }
 0x75a   :  { %1616 = vmatpush1.bf16.msra.mxu1 %v3956_v21  ;;  %1657 = vmatpush1.bf16.msra.mxu0 %v3959_v46  ;;  %v3217_v21 = vld [vmem:[#allocation6 + $0xcc] ss:$16 sps:$4 sm:$0xff]   ;;  %v3218_v46 = vld [vmem:[#allocation6 + $0xc0] ss:$16 sps:$4 sm:$0xff]  }
 0x75b   :  { %1617 = vmatprep.subr.bf16.mxu1 %v3962_v20  ;;  %1658 = vmatprep.subr.bf16.mxu0 %v3965_v53  ;;  %v3219_v20 = vld [vmem:[#allocation6 + $0xc8] ss:$16 sps:$4 sm:$0xff]   ;;  %v3220_v53 = vld [vmem:[#allocation6 + $0xe4] ss:$16 sps:$4 sm:$0xff]  }
 0x75c   :  { %1647 = vmatprep.mubr.bf16.mxu1 %v4466_v55  ;;  %1688 = vmatprep.mubr.bf16.mxu0 %v4466_v55 }
 0x75e   :  { %1618 = vmatpush1.bf16.msra.mxu1 %v3970_v47  ;;  %1659 = vmatpush1.bf16.msra.mxu0 %v3973_v9  ;;  %v3221_v47 = vld [vmem:[#allocation6 + $0xec] ss:$16 sps:$4 sm:$0xff]   ;;  %v3222_v9 = vld [vmem:[#allocation6 + $0xe0] ss:$16 sps:$4 sm:$0xff]  }
 0x75f   :  { %1619 = vmatprep.subr.bf16.mxu1 %v3976_v13  ;;  %1660 = vmatprep.subr.bf16.mxu0 %v3979_v3  ;;  %v3223_v13 = vld [vmem:[#allocation6 + $0xe8] ss:$16 sps:$4 sm:$0xff]  }
 0x762   :  { %1620 = vmatpush1.bf16.msra.mxu1 %v3982_v56  ;;  %1661 = vmatpush1.bf16.msra.mxu0 %v3985_v57  ;;  %v4481_v57 = vld [vmem:[#allocation32_spill] sm:$0xff] }
 0x763   :  { %1621 = vmatprep.subr.bf16.mxu1 %v3988_v58  ;;  %1662 = vmatprep.subr.bf16.mxu0 %v3991_v60  ;;  %v4482_v60 = vld [vmem:[#allocation33_spill] sm:$0xff] }
 0x766   :  { %1622 = vmatpush1.bf16.msra.mxu1 %v3994_v5  ;;  %1663 = vmatpush1.bf16.msra.mxu0 %v3997_v6 }
 0x767   :  { %1623 = vmatprep.subr.bf16.mxu1 %v4000_v12  ;;  %1664 = vmatprep.subr.bf16.mxu0 %v4003_v14  ;;  %v4483_v14 = vld [vmem:[#allocation34_spill] sm:$0xff] }
 0x76a   :  { %1624 = vmatpush1.bf16.msra.mxu1 %v4006_v18  ;;  %1665 = vmatpush1.bf16.msra.mxu0 %v4009_v19  ;;  %v4484_v19 = vld [vmem:[#allocation35_spill] sm:$0xff] }
 0x76b   :  { %1625 = vmatprep.subr.bf16.mxu1 %v4012_v23  ;;  %1666 = vmatprep.subr.bf16.mxu0 %v4015_v24 }
 0x76e   :  { %1626 = vmatpush1.bf16.msra.mxu1 %v3214_v48  ;;  %1667 = vmatpush1.bf16.msra.mxu0 %v3215_v52 }
 0x76f   :  { %1627 = vmatprep.subr.bf16.mxu1 %v3216_v8  ;;  %1668 = vmatprep.subr.bf16.mxu0 %v3217_v21  ;;  %v2904_v21 = vld [vmem:[#allocation8] ss:$16 sps:$4 sm:$0xff]  }
 0x772   :  { %1628 = vmatpush1.bf16.msra.mxu1 %v3218_v46  ;;  %1669 = vmatpush1.bf16.msra.mxu0 %v3219_v20  ;;  %v2906_v46 = vld [vmem:[#allocation8 + $0x4] ss:$16 sps:$4 sm:$0xff]   ;;  %v2909_v20 = vld [vmem:[#allocation8 + $0xc] ss:$16 sps:$4 sm:$0xff]  }
 0x773   :  { %1629 = vmatprep.subr.bf16.mxu1 %v3220_v53  ;;  %1670 = vmatprep.subr.bf16.mxu0 %v3221_v47  ;;  %v2912_v53 = vld [vmem:[#allocation8 + $0x24] ss:$16 sps:$4 sm:$0xff]   ;;  %v2915_v47 = vld [vmem:[#allocation8 + $0x2c] ss:$16 sps:$4 sm:$0xff]  }
 0x776   :  { %1630 = vmatpush1.bf16.msra.mxu1 %v3222_v9  ;;  %1671 = vmatpush1.bf16.msra.mxu0 %v3223_v13  ;;  %v2910_v9 = vld [vmem:[#allocation8 + $0x20] ss:$16 sps:$4 sm:$0xff]   ;;  %v2913_v13 = vld [vmem:[#allocation8 + $0x28] ss:$16 sps:$4 sm:$0xff]  }
 0x777   :  { %2064 = vmatprep.subr.bf16.mxu1 %v2906_v46  ;;  %2137 = vmatprep.subr.bf16.mxu0 %v2909_v20  ;;  %v2925_v46 = vld [vmem:[#allocation8 + $0x68] ss:$16 sps:$4 sm:$0xff]   ;;  %v2933_v20 = vld [vmem:[#allocation8 + $0x8c] ss:$16 sps:$4 sm:$0xff]  }
 0x82c   :  { %v1533_v3 = vpop.f32.mrb[40].mxu1  ;;  %v1574_v56 = vpop.f32.mrb[48].mxu0 }
 0x82d   :  { %v1581_v58 = vadd.f32 %v1533_v3, %v4481_v57  ;;  %v1583_v5 = vadd.f32 %v1574_v56, %v4482_v60  ;;  %v1535_v6 = vpop.f32.mrb[41].mxu1  ;;  %v1576_v12 = vpop.f32.mrb[49].mxu0  ;;  %v4485_v57 = vld [vmem:[#allocation36_spill] sm:$0xff]  ;;  %v4486_v60 = vld [vmem:[#allocation37_spill] sm:$0xff] }
 0x82e   :  { %v1582_v18 = vadd.f32 %v1535_v6, %v4483_v14  ;;  %v1584_v23 = vadd.f32 %v1576_v12, %v4484_v19  ;;  %v1537_v24 = vpop.f32.mrb[42].mxu1  ;;  %v1578_v36 = vpop.f32.mrb[50].mxu0  ;;  %v4487_v14 = vld [vmem:[#allocation38_spill] sm:$0xff]  ;;  %v4488_v19 = vld [vmem:[#allocation39_spill] sm:$0xff] }
 0x82f   :  { %v2732_v37 = vmul.f32 -1.442695, %v1581_v58  ;;  %v1538_v38 = vpop.f32.mrb[43].mxu1  ;;  %v1579_v39 = vpop.f32.mrb[51].mxu0 }
 0x830   :  { %v2733_v26 = vmul.f32 -1.442695, %v1582_v18  ;;  %v2734_v40 = vmul.f32 -1.442695, %v1584_v23 }
 0x831   :  { %3048 = vpow2.f32 %v2732_v37 }
 0x832   :  { %3050 = vpow2.f32 %v2733_v26 }
 0x833   :  { %3052 = vpow2.f32 %v2734_v40 }
 0x834   :  { %3054 = vtanh.f32 %v1583_v5 }
 0x83b   :  { %v3049_v27 = vpop.eup %3048 }
 0x83c   :  { %v3051_v41 = vpop.eup %3050  ;;  %v1588_v28 = vadd.f32 1.0, %v3049_v27 }
 0x83d   :  { %v1594_v42 = vadd.f32 1.0, %v3051_v41  ;;  %v3053_v29 = vpop.eup %3052 }
 0x83e   :  { %3056 = vrcp.f32 %v1588_v28  ;;  %v3055_v43 = vpop.eup %3054  ;;  %v1601_v45 = vadd.f32 1.0, %v3053_v29 }
 0x83f   :  { %3058 = vrcp.f32 %v1594_v42 }
 0x840   :  { %3060 = vrcp.f32 %v1601_v45 }
 0x848   :  { %v3057_v30 = vpop.eup %3056 }
 0x849   :  { %v3059_v44 = vpop.eup %3058  ;;  %v1605_v31 = vmul.f32 %v3057_v30, %v3055_v43 }
 0x84a   :  { %v1604_v32 = vmul.f32 %v3059_v44, %v4035_v22  ;;  %v3061_v25 = vpop.eup %3060  ;;  %v1748_v22 = vmul.f32 0.0078125, %v1736_v4 }
 0x84c   :  { %v4070_v1 = vadd.f32 %v1605_v31, %v1604_v32  ;;  %v4086_v0 = vsub.f32 %v3951_v54, %v1748_v22  ;;  %v2907_v54 = vld [vmem:[#allocation8 + $0x8] ss:$16 sps:$4 sm:$0xff]  }
 0x84e   :  { %3062 = vtanh.f32 %v4070_v1  ;;  %v1764_v15 = vmul.f32 %v4086_v0, %v4086_v0 }
 0x858   :  { %v3063_v61 = vpop.eup %3062 }
 0x859   :  { %v1608_v63 = vmul.f32 %v3063_v61, %v3061_v25 }
 0x85b   :  { %1739 = vadd.xlane.f32.xlu0 %v1608_v63  ;;  %v1614_v7 = vpack.c.bf16 %v1608_v63, %v1608_v63 }
 0x85d   :  { %1648 = vmatmul.mubr.bf16.vlgmr.msra.gmra.mrb[44].mxu1 %v1614_v7  ;;  %1689 = vmatmul.mubr.bf16.vlgmr.msra.gmra.mrb[52].mxu0 %v1614_v7  ;;  %v1738_v7 = vpop.xlane.xlu1 %1737 }
 0x85e   :  { %2096 = vmatprep.mubr.bf16.mxu1 %v4466_v55  ;;  %2169 = vmatprep.mubr.bf16.mxu0 %v4466_v55  ;;  %v1749_v22 = vmul.f32 0.0078125, %v1738_v7 }
 0x85f   :  { %1768 = vadd.xlane.f32.xlu0 %v1760_v11  ;;  %2065 = vmatpush1.bf16.msra.mxu1 %v2904_v21  ;;  %v2927_v21 = vld [vmem:[#allocation8 + $0x6c] ss:$16 sps:$4 sm:$0xff]  }
 0x860   :  { %2138 = vmatpush1.bf16.msra.mxu0 %v2907_v54  ;;  %2066 = vmatprep.subr.bf16.mxu1 %v2912_v53  ;;  %v4115_v11 = vsub.f32 %v4038_v17, %v1749_v22  ;;  %v2922_v17 = vld [vmem:[#allocation8 + $0x60] ss:$16 sps:$4 sm:$0xff]   ;;  %v2930_v54 = vld [vmem:[#allocation8 + $0x84] ss:$16 sps:$4 sm:$0xff]  }
 0x861   :  { %2139 = vmatprep.subr.bf16.mxu0 %v2915_v47  ;;  %v2928_v53 = vld [vmem:[#allocation8 + $0x80] ss:$16 sps:$4 sm:$0xff]   ;;  %v2931_v47 = vld [vmem:[#allocation8 + $0x88] ss:$16 sps:$4 sm:$0xff]  }
 0x863   :  { %1772 = vadd.xlane.f32.xlu0 %v1762_v16  ;;  %2067 = vmatpush1.bf16.msra.mxu1 %v2910_v9  ;;  %v1765_v16 = vmul.f32 %v4115_v11, %v4115_v11  ;;  %v2936_v9 = vld [vmem:[#allocation8 + $0xa4] ss:$16 sps:$4 sm:$0xff]  }
 0x864   :  { %2140 = vmatpush1.bf16.msra.mxu0 %v2913_v13  ;;  %v2939_v13 = vld [vmem:[#allocation8 + $0xac] ss:$16 sps:$4 sm:$0xff]  }
 0x867   :  { %1776 = vadd.xlane.f32.xlu0 %v1764_v15  ;;  %v2916_v15 = vld [vmem:[#allocation8 + $0x40] ss:$16 sps:$4 sm:$0xff]  }
 0x8e8   :  { %v1740_v49 = vpop.xlane.xlu0 %1739 }
 0x8e9   :  { %v1750_v48 = vmul.f32 0.0078125, %v1740_v49  ;;  %v2918_v49 = vld [vmem:[#allocation8 + $0x44] ss:$16 sps:$4 sm:$0xff]  }
 0x8ea   :  { %2068 = vmatprep.subr.bf16.mxu1 %v2918_v49 }
 0x8eb   :  { %v4092_v52 = vsub.f32 %v1608_v63, %v1750_v48  ;;  %v1747_v63 = vmul.f32 0.0078125, %v1734_v35  ;;  %v2921_v48 = vld [vmem:[#allocation8 + $0x4c] ss:$16 sps:$4 sm:$0xff]   ;;  %2069 = vmatpush1.bf16.msra.mxu1 %v2916_v15 }
 0x8ec   :  { %2141 = vmatprep.subr.bf16.mxu0 %v2921_v48 }
 0x8ed   :  { %v1766_v8 = vmul.f32 %v4092_v52, %v4092_v52 }
 0x8ef   :  { %1780 = vadd.xlane.f32.xlu0 %v1766_v8  ;;  %v2924_v8 = vld [vmem:[#allocation8 + $0x64] ss:$16 sps:$4 sm:$0xff]  }
 0x8f0   :  { %2070 = vmatprep.subr.bf16.mxu1 %v2924_v8 }
 0x8f1   :  { %2071 = vmatpush1.bf16.msra.mxu1 %v2922_v17 }
 0x8f2   :  { %2072 = vmatprep.subr.bf16.mxu1 %v2930_v54 }
 0x8f5   :  { %2073 = vmatpush1.bf16.msra.mxu1 %v2928_v53 }
 0x8f6   :  { %2074 = vmatprep.subr.bf16.mxu1 %v2936_v9 }
 0x930   :  { %v1649_v3 = vpop.f32.mrb[44].mxu1  ;;  %v1690_v56 = vpop.f32.mrb[52].mxu0 }
 0x931   :  { %v1697_v58 = vadd.f32 %v1649_v3, %v4485_v57  ;;  %v1699_v5 = vadd.f32 %v1690_v56, %v4486_v60  ;;  %v1651_v6 = vpop.f32.mrb[45].mxu1  ;;  %v1692_v12 = vpop.f32.mrb[53].mxu0  ;;  %v2934_v3 = vld [vmem:[#allocation8 + $0xa0] ss:$16 sps:$4 sm:$0xff]   ;;  %v2937_v56 = vld [vmem:[#allocation8 + $0xa8] ss:$16 sps:$4 sm:$0xff]  }
 0x932   :  { %v1698_v18 = vadd.f32 %v1651_v6, %v4487_v14  ;;  %v1700_v23 = vadd.f32 %v1692_v12, %v4488_v19  ;;  %v1653_v24 = vpop.f32.mrb[46].mxu1  ;;  %v1694_v36 = vpop.f32.mrb[54].mxu0  ;;  %2075 = vmatpush1.bf16.msra.mxu1 %v2934_v3  ;;  %v2942_v57 = vld [vmem:[#allocation8 + $0xc4] ss:$16 sps:$4 sm:$0xff]   ;;  %v2940_v60 = vld [vmem:[#allocation8 + $0xc0] ss:$16 sps:$4 sm:$0xff]  }
 0x933   :  { %v2735_v37 = vmul.f32 -1.442695, %v1697_v58  ;;  %v1654_v38 = vpop.f32.mrb[47].mxu1  ;;  %v1695_v39 = vpop.f32.mrb[55].mxu0  ;;  %v2945_v58 = vld [vmem:[#allocation8 + $0xcc] ss:$16 sps:$4 sm:$0xff]   ;;  %2076 = vmatprep.subr.bf16.mxu1 %v2942_v57 }
 0x934   :  { %v2736_v26 = vmul.f32 -1.442695, %v1698_v18  ;;  %v2737_v40 = vmul.f32 -1.442695, %v1700_v23  ;;  %v2948_v6 = vld [vmem:[#allocation8 + $0xe4] ss:$16 sps:$4 sm:$0xff]   ;;  %v1769_v19 = vpop.xlane.xlu0 %1768 }
 0x935   :  { %3064 = vpow2.f32 %v2735_v37  ;;  %v2951_v12 = vld [vmem:[#allocation8 + $0xec] ss:$16 sps:$4 sm:$0xff]   ;;  %v2946_v14 = vld [vmem:[#allocation8 + $0xe0] ss:$16 sps:$4 sm:$0xff]   ;;  %v2949_v18 = vld [vmem:[#allocation8 + $0xe8] ss:$16 sps:$4 sm:$0xff]  }
 0x936   :  { %3066 = vpow2.f32 %v2736_v26  ;;  %2077 = vmatpush1.bf16.msra.mxu1 %v2940_v60  ;;  %v1784_v23 = vmul.f32 0.0078125, %v1769_v19 }
 0x937   :  { %3068 = vpow2.f32 %v2737_v40  ;;  %2078 = vmatprep.subr.bf16.mxu1 %v2948_v6 }
 0x938   :  { %3070 = vtanh.f32 %v1699_v5  ;;  %v2943_v5 = vld [vmem:[#allocation8 + $0xc8] ss:$16 sps:$4 sm:$0xff]   ;;  %v1792_v24 = vadd.f32 1e-05, %v1784_v23  ;;  %v1773_v36 = vpop.xlane.xlu0 %1772 }
 0x939   :  { %v1786_v39 = vmul.f32 0.0078125, %v1773_v36 }
 0x93a   :  { %2079 = vmatpush1.bf16.msra.mxu1 %v2946_v14 }
 0x93f   :  { %v3065_v27 = vpop.eup %3064 }
 0x940   :  { %v3067_v41 = vpop.eup %3066  ;;  %v1704_v28 = vadd.f32 1.0, %v3065_v27 }
 0x941   :  { %v1710_v42 = vadd.f32 1.0, %v3067_v41  ;;  %v3069_v29 = vpop.eup %3068 }
 0x942   :  { %3072 = vrcp.f32 %v1704_v28  ;;  %v3071_v43 = vpop.eup %3070  ;;  %v1717_v45 = vadd.f32 1.0, %v3069_v29  ;;  %v1794_v28 = vadd.f32 1e-05, %v1786_v39  ;;  %v1777_v29 = vpop.xlane.xlu0 %1776 }
 0x943   :  { %3074 = vrcp.f32 %v1710_v42 }
 0x944   :  { %3076 = vrcp.f32 %v1717_v45 }
 0x94c   :  { %v3073_v30 = vpop.eup %3072 }
 0x94d   :  { %v3075_v44 = vpop.eup %3074  ;;  %v1721_v31 = vmul.f32 %v3073_v30, %v3071_v43 }
 0x94e   :  { %v1720_v32 = vmul.f32 %v3075_v44, %v4070_v1  ;;  %v3077_v25 = vpop.eup %3076  ;;  %v4110_v1 = vsub.f32 %v3900_v59, %v1747_v63  ;;  %v2919_v59 = vld [vmem:[#allocation8 + $0x48] ss:$16 sps:$4 sm:$0xff]   ;;  %v1788_v44 = vmul.f32 0.0078125, %v1777_v29 }
 0x94f   :  { %2142 = vmatpush1.bf16.msra.mxu0 %v2919_v59 }
 0x950   :  { %v1722_v2 = vadd.f32 %v1721_v31, %v1720_v32  ;;  %v1763_v51 = vmul.f32 %v4110_v1, %v4110_v1  ;;  %2143 = vmatprep.subr.bf16.mxu0 %v2927_v21  ;;  %v1796_v33 = vadd.f32 1e-05, %v1788_v44 }
 0x952   :  { %3078 = vtanh.f32 %v1722_v2  ;;  %1726 = vst [vmem:[#allocation12] sm:$0xff] %v1722_v2 }
 0x953   :  { %2144 = vmatpush1.bf16.msra.mxu0 %v2925_v46  ;;  %3080 = vrsqrt.f32 %v1792_v24 }
 0x954   :  { %2145 = vmatprep.subr.bf16.mxu0 %v2933_v20 }
 0x957   :  { %2146 = vmatpush1.bf16.msra.mxu0 %v2931_v47 }
 0x958   :  { %2147 = vmatprep.subr.bf16.mxu0 %v2939_v13 }
 0x95b   :  { %2148 = vmatpush1.bf16.msra.mxu0 %v2937_v56 }
 0x95c   :  { %v3079_v61 = vpop.eup %3078  ;;  %2149 = vmatprep.subr.bf16.mxu0 %v2945_v58 }
 0x95d   :  { %v4105_v4 = vmul.f32 %v3079_v61, %v3077_v25  ;;  %v3081_v32 = vpop.eup %3080  ;;  %v2738_v61 = vld [vmem:[%s4427_s6] ss:$0 sm:$0xff] }
 0x95e   :  { %v1808_v25 = vmul.f32 %v3081_v32, %v4076_v62 }
 0x95f   :  { %1741 = vadd.xlane.f32.xlu1 %v4105_v4  ;;  %1725 = vst [vmem:[#allocation10] sm:$0xff] %v4105_v4  ;;  %2150 = vmatpush1.bf16.msra.mxu0 %v2943_v5 }
 0x960   :  { %2151 = vmatprep.subr.bf16.mxu0 %v2951_v12  ;;  %v1823_v7 = vmul.f32 %v2738_v61, %v1808_v25 }
 0x963   :  { %1770 = vadd.xlane.f32.xlu1 %v1761_v34  ;;  %2152 = vmatpush1.bf16.msra.mxu0 %v2949_v18  ;;  %v2739_v34 = vld [vmem:[%s4428_s7] ss:$0 sm:$0xff] }
 0x964   :  { %v1838_v15 = vadd.f32 %v2739_v34, %v1823_v7 }
 0x967   :  { %1774 = vadd.xlane.f32.xlu1 %v1763_v51 }
 0x96b   :  { %1778 = vadd.xlane.f32.xlu1 %v1765_v16 }
 0x9ec   :  { %v1742_v37 = vpop.xlane.xlu1 %1741 }
 0x9ed   :  { %v1751_v38 = vmul.f32 0.0078125, %v1742_v37  ;;  %v4489_v37 = vld [vmem:[#allocation17_spill] sm:$0xff] }
 0x9ef   :  { %v4122_v26 = vsub.f32 %v4105_v4, %v1751_v38  ;;  %v4490_v38 = vsub.s32 0, %v4489_v37 }
 0x9f0   :  { %v1771_v40 = vpop.xlane.xlu1 %1770 }
 0x9f1   :  { %v1785_v27 = vmul.f32 0.0078125, %v1771_v40  ;;  %v1767_v41 = vmul.f32 %v4122_v26, %v4122_v26 }
 0x9f3   :  { %v1793_v42 = vadd.f32 1e-05, %v1785_v27  ;;  %1782 = vadd.xlane.f32.xlu1 %v1767_v41  ;;  %v4493_v41 = vsub.s32 1, %v4489_v37 }
 0x9f4   :  { %v1775_v43 = vpop.xlane.xlu1 %1774 }
 0x9f5   :  { %3082 = vrsqrt.f32 %v1793_v42  ;;  %v1787_v30 = vmul.f32 0.0078125, %v1775_v43  ;;  %v4494_v42 = vsub.s32 3, %v4489_v37 }
 0x9f6   :  { %3084 = vrsqrt.f32 %v1794_v28 }
 0x9f7   :  { %v1795_v31 = vadd.f32 1e-05, %v1787_v30 }
 0x9f8   :  { %v1779_v45 = vpop.xlane.xlu1 %1778 }
 0x9f9   :  { %3086 = vrsqrt.f32 %v1795_v31  ;;  %v1789_v2 = vmul.f32 0.0078125, %v1779_v45 }
 0x9fb   :  { %v1797_v35 = vadd.f32 1e-05, %v1789_v2 }
 0x9fd   :  { %3088 = vrsqrt.f32 %v1797_v35 }
 0x9fe   :  { %3090 = vrsqrt.f32 %v1796_v33 }
 0x9ff   :  { %v3083_v63 = vpop.eup %3082 }
 0xa00   :  { %v1809_v4 = vmul.f32 %v3083_v63, %v4103_v50  ;;  %v3085_v22 = vpop.eup %3084 }
 0xa01   :  { %v1810_v62 = vmul.f32 %v3085_v22, %v4079_v10 }
 0xa02   :  { %v1824_v51 = vmul.f32 %v2738_v61, %v1809_v4 }
 0xa03   :  { %v3087_v16 = vpop.eup %3086  ;;  %v1825_v50 = vmul.f32 %v2738_v61, %v1810_v62 }
 0xa04   :  { %v1839_v49 = vadd.f32 %v2739_v34, %v1824_v51  ;;  %v1811_v59 = vmul.f32 %v3087_v16, %v4110_v1 }
 0xa05   :  { %v1840_v20 = vadd.f32 %v2739_v34, %v1825_v50 }
 0xa06   :  { %v1846_v48 = vpack.c.bf16 %v1839_v49, %v1838_v15  ;;  %v1826_v8 = vmul.f32 %v2738_v61, %v1811_v59 }
 0xa07   :  { %v3089_v21 = vpop.eup %3088 }
 0xa08   :  { %2097 = vmatmul.mubr.bf16.vlgmr.msra.gmra.mrb[48].mxu1 %v1846_v48  ;;  %2170 = vmatmul.mubr.bf16.vlgmr.msra.gmra.mrb[56].mxu0 %v1846_v48  ;;  %v3091_v17 = vpop.eup %3090  ;;  %v1841_v46 = vadd.f32 %v2739_v34, %v1826_v8  ;;  %v1813_v54 = vmul.f32 %v3089_v21, %v4115_v11  ;;  %v1781_v11 = vpop.xlane.xlu0 %1780 }
 0xa09   :  { %2106 = vmatprep.mubr.bf16.mxu1 %v4466_v55  ;;  %2179 = vmatprep.mubr.bf16.mxu0 %v4466_v55  ;;  %v1812_v53 = vmul.f32 %v3091_v17, %v4086_v0  ;;  %v1790_v0 = vmul.f32 0.0078125, %v1781_v11 }
 0xa0a   :  { %v1847_v10 = vpack.c.bf16 %v1841_v46, %v1840_v20  ;;  %v1828_v47 = vmul.f32 %v2738_v61, %v1813_v54 }
 0xa0b   :  { %v1827_v1 = vmul.f32 %v2738_v61, %v1812_v53  ;;  %v1798_v56 = vadd.f32 1e-05, %v1790_v0 }
 0xa0c   :  { %v1843_v9 = vadd.f32 %v2739_v34, %v1828_v47 }
 0xa0d   :  { %v1842_v13 = vadd.f32 %v2739_v34, %v1827_v1  ;;  %3092 = vrsqrt.f32 %v1798_v56 }
 0xa0f   :  { %v1848_v3 = vpack.c.bf16 %v1843_v9, %v1842_v13 }
 0xa10   :  { %2107 = vmatmul.mubr.bf16.gmra.mrb[52].mxu1 %v1847_v10  ;;  %2180 = vmatmul.mubr.bf16.gmra.mrb[60].mxu0 %v1847_v10 }
 0xa11   :  { %2116 = vmatprep.mubr.bf16.mxu1 %v4466_v55  ;;  %2189 = vmatprep.mubr.bf16.mxu0 %v4466_v55 }
 0xa17   :  { %v3093_v5 = vpop.eup %3092 }
 0xa18   :  { %2117 = vmatmul.mubr.bf16.gmra.mrb[56].mxu1 %v1848_v3  ;;  %2190 = vmatmul.mubr.bf16.gmra.mrb[64].mxu0 %v1848_v3  ;;  %v1814_v6 = vmul.f32 %v3093_v5, %v4092_v52  ;;  %v4491_v52 = vsub.s32 2, %v4489_v37 }
 0xa19   :  { %2126 = vmatprep.mubr.bf16.mxu1 %v4466_v55  ;;  %2199 = vmatprep.mubr.bf16.mxu0 %v4466_v55  ;;  %v1882_v55 = vld [vmem:[%s4430_s9] sm:$0xf]  ;;  %s3370_s9 = smov [#allocation10]  }
 0xa1a   :  { %v1829_v18 = vmul.f32 %v2738_v61, %v1814_v6  ;;  %v4151_v39 = vrot.slane %v1882_v55, %v4490_v38  ;;  %v4155_v40 = vrot.slane %v1882_v55, %v4491_v52  ;;  %v4162_v28 = vrot.slane %v1882_v55, %v4493_v41  ;;  %s2615_s22 = sshll.u32 %s3370_s9, 4  ;;  %s2616_s22 = int_to_ptr.vmem [resolvable:$true] %s2615_s22 }
 0xa1b   :  { %v4166_v29 = vrot.slane %v1882_v55, %v4494_v42  ;;  %s3290_s29 = scalar_lea.vmem %s2616_s22, 128  ;;  %p3295_p11 = scmp.lt.s32.totalorder %s2616_s22, %s2616_s22 }
 0xa1c   :  { %v1844_v23 = vadd.f32 %v2739_v34, %v1829_v18  ;;  %p3291_p10 = scmp.ne.s32.totalorder %s2616_s22, %s3290_s29  ;;  %p3296_p12 = scmp.lt.s32.totalorder %s3290_s29, %s3290_s29 }
 0xa1e   :  { %p3297_p13 = por %p3296_p12, %p3295_p11 }
 0xa20   :  { %p3298_p0 = pnand %p3297_p13, %p3291_p10 }
 0xa80   :  { %v1783_v57 = vpop.xlane.xlu1 %1782 }
 0xa81   :  { %v1791_v58 = vmul.f32 0.0078125, %v1783_v57 }
 0xa83   :  { %v1799_v60 = vadd.f32 1e-05, %v1791_v58 }
 0xa85   :  { %3094 = vrsqrt.f32 %v1799_v60 }
 0xa8f   :  { %v3095_v12 = vpop.eup %3094 }
 0xa90   :  { %v1815_v14 = vmul.f32 %v3095_v12, %v4122_v26  ;;  %v4492_v26 = vlaneseq }
 0xa92   :  { %v1830_v19 = vmul.f32 %v2738_v61, %v1815_v14  ;;  %v4158_v27 = vand.u32 127, %v4492_v26 }
 0xa94   :  { %v1845_v24 = vadd.f32 %v2739_v34, %v1830_v19  ;;  %vm2212_vm2 = vcmp.lt.s32.totalorder %v4158_v27, 5 }
 0xa96   :  { %v1849_v36 = vpack.c.bf16 %v1845_v24, %v1844_v23 }
 0xa98   :  { %2127 = vmatmul.mubr.bf16.gmra.mrb[60].mxu1 %v1849_v36  ;;  %2200 = vmatmul.mubr.bf16.gmra.mrb[68].mxu0 %v1849_v36 }
 0xadb   :  { %v2098_v43 = vpop.f32.mrb[48].mxu1  ;;  %v2171_v30 = vpop.f32.mrb[56].mxu0 }
 0xadc   :  { %v2099_v44 = vadd.f32 %v2098_v43, %v4151_v39  ;;  %v4170_v31 = vadd.f32 %v2171_v30, %v4155_v40  ;;  %v2100_v45 = vpop.f32.mrb[49].mxu1  ;;  %v2173_v32 = vpop.f32.mrb[57].mxu0 }
 0xadd   :  { %v2101_v2 = vadd.f32 %v2100_v45, %v4162_v28  ;;  %v4174_v33 = vadd.f32 %v2173_v32, %v4166_v29  ;;  %v2102_v35 = vpop.f32.mrb[50].mxu1  ;;  %v2175_v25 = vpop.f32.mrb[58].mxu0 }
 0xade   :  { %v2326_v61 = vand.u32 2147483647, %v4170_v31  ;;  %v2103_v63 = vadd.f32 %v2102_v35, %v4151_v39  ;;  %v4180_v4 = vadd.f32 %v2175_v25, %v4155_v40  ;;  %v2104_v7 = vpop.f32.mrb[51].mxu1  ;;  %v2177_v22 = vpop.f32.mrb[59].mxu0  ;;  %v4190_v62 = vsel %vm2212_vm2, %v2099_v44, -1e+30 }
 0xadf   :  { %2566 = vst [vmem:[#allocation9 + $0x8] sm:$0xff] %v2101_v2  ;;  %v2327_v34 = vand.u32 2147483647, %v4174_v33  ;;  %v2105_v51 = vadd.f32 %v2104_v7, %v4162_v28  ;;  %v4185_v16 = vadd.f32 %v2177_v22, %v4166_v29  ;;  %2221 = vmax.xlane.f32.xlu0 %v4190_v62 }
 0xae0   :  { %v2350_v15 = vsub.f32 0.0, %v2326_v61  ;;  %v2329_v49 = vand.u32 2147483647, %v4180_v4  ;;  %v4196_v8 = vsel %vm2212_vm2, %v2103_v63, -1e+30 }
 0xae1   :  { %v2351_v59 = vsub.f32 0.0, %v2327_v34  ;;  %2570 = vst [vmem:[#allocation9 + $0x28] sm:$0xff] %v2105_v51  ;;  %v2330_v48 = vand.u32 2147483647, %v4185_v16  ;;  %2223 = vmax.xlane.f32.xlu1 %v4196_v8 }
 0xae2   :  { %v2375_v21 = vmul.f32 1.442695, %v2350_v15  ;;  %v2353_v50 = vsub.f32 0.0, %v2329_v49 }
 0xae3   :  { %v2377_v17 = vmul.f32 1.442695, %v2351_v59  ;;  %v2354_v46 = vsub.f32 0.0, %v2330_v48  ;;  %v2108_v54 = vpop.f32.mrb[52].mxu1  ;;  %v2181_v20 = vpop.f32.mrb[60].mxu0 }
 0xae4   :  { %3096 = vpow2.f32 %v2375_v21  ;;  %v2381_v53 = vmul.f32 1.442695, %v2353_v50  ;;  %v2109_v10 = vadd.f32 %v2108_v54, %v4151_v39  ;;  %v4201_v47 = vadd.f32 %v2181_v20, %v4155_v40  ;;  %v2110_v1 = vpop.f32.mrb[53].mxu1  ;;  %v2183_v9 = vpop.f32.mrb[61].mxu0 }
 0xae5   :  { %3098 = vpow2.f32 %v2377_v17  ;;  %v2383_v13 = vmul.f32 1.442695, %v2354_v46  ;;  %v2111_v3 = vadd.f32 %v2110_v1, %v4162_v28  ;;  %v4205_v11 = vadd.f32 %v2183_v9, %v4166_v29  ;;  %v2112_v0 = vpop.f32.mrb[54].mxu1  ;;  %v2185_v56 = vpop.f32.mrb[62].mxu0 }
 0xae6   :  { %3100 = vpow2.f32 %v2381_v53  ;;  %v2332_v57 = vand.u32 2147483647, %v4201_v47  ;;  %v2113_v58 = vadd.f32 %v2112_v0, %v4151_v39  ;;  %v2114_v60 = vpop.f32.mrb[55].mxu1  ;;  %v2187_v5 = vpop.f32.mrb[63].mxu0  ;;  %v4211_v12 = vadd.f32 %v2185_v56, %v4155_v40 }
 0xae7   :  { %3102 = vpow2.f32 %v2383_v13  ;;  %2574 = vst [vmem:[#allocation9 + $0x48] sm:$0xff] %v2111_v3  ;;  %v2333_v6 = vand.u32 2147483647, %v4205_v11  ;;  %v2115_v18 = vadd.f32 %v2114_v60, %v4162_v28  ;;  %v4215_v19 = vadd.f32 %v2187_v5, %v4166_v29 }
 0xae8   :  { %v2356_v14 = vsub.f32 0.0, %v2332_v57  ;;  %v4219_v23 = vsel %vm2212_vm2, %v2109_v10, -1e+30  ;;  %v2335_v36 = vand.u32 2147483647, %v4211_v12 }
 0xae9   :  { %v2357_v24 = vsub.f32 0.0, %v2333_v6  ;;  %2225 = vmax.xlane.f32.xlu0 %v4219_v23  ;;  %v4225_v55 = vsel %vm2212_vm2, %v2113_v58, -1e+30  ;;  %2578 = vst [vmem:[#allocation9 + $0x68] sm:$0xff] %v2115_v18  ;;  %v2336_v38 = vand.u32 2147483647, %v4215_v19 }
 0xaea   :  { %v2387_v37 = vmul.f32 1.442695, %v2356_v14  ;;  %2227 = vmax.xlane.f32.xlu1 %v4225_v55  ;;  %v2359_v26 = vsub.f32 0.0, %v2335_v36 }
 0xaeb   :  { %v2389_v52 = vmul.f32 1.442695, %v2357_v24  ;;  %v2118_v41 = vpop.f32.mrb[56].mxu1  ;;  %v2191_v42 = vpop.f32.mrb[64].mxu0  ;;  %v2360_v43 = vsub.f32 0.0, %v2336_v38 }
 0xaec   :  { %3104 = vpow2.f32 %v2387_v37  ;;  %v4230_v30 = vadd.f32 %v2191_v42, %v4155_v40  ;;  %v2120_v44 = vpop.f32.mrb[57].mxu1  ;;  %v2193_v45 = vpop.f32.mrb[65].mxu0  ;;  %v2393_v32 = vmul.f32 1.442695, %v2359_v26  ;;  %v2119_v22 = vadd.f32 %v2118_v41, %v4151_v39 }
 0xaed   :  { %3106 = vpow2.f32 %v2389_v52  ;;  %v2121_v2 = vadd.f32 %v2120_v44, %v4162_v28  ;;  %v4234_v35 = vadd.f32 %v2193_v45, %v4166_v29  ;;  %v2122_v25 = vpop.f32.mrb[58].mxu1  ;;  %v2195_v61 = vpop.f32.mrb[66].mxu0  ;;  %v2395_v7 = vmul.f32 1.442695, %v2360_v43 }
 0xaee   :  { %v3097_v63 = vpop.eup %3096  ;;  %v2338_v34 = vand.u32 2147483647, %v4230_v30  ;;  %v2124_v51 = vpop.f32.mrb[59].mxu1  ;;  %3108 = vpow2.f32 %v2393_v32  ;;  %v2123_v48 = vadd.f32 %v2122_v25, %v4151_v39  ;;  %v4241_v54 = vadd.f32 %v2195_v61, %v4155_v40 }
 0xaef   :  { %v3099_v15 = vpop.eup %3098  ;;  %v2422_v49 = vadd.f32 1.0, %v3097_v63  ;;  %2582 = vst [vmem:[#allocation9 + $0x88] sm:$0xff] %v2121_v2  ;;  %v2339_v59 = vand.u32 2147483647, %v4234_v35  ;;  %v2197_v21 = vpop.f32.mrb[67].mxu0  ;;  %3110 = vpow2.f32 %v2395_v7  ;;  %v2125_v1 = vadd.f32 %v2124_v51, %v4162_v28 }
 0xaf0   :  { %v3101_v50 = vpop.eup %3100  ;;  %v2423_v17 = vadd.f32 1.0, %v3099_v15  ;;  %v2362_v46 = vsub.f32 0.0, %v2338_v34  ;;  %v2341_v0 = vand.u32 2147483647, %v4241_v54  ;;  %v4246_v56 = vadd.f32 %v2197_v21, %v4166_v29 }
 0xaf1   :  { %v3103_v20 = vpop.eup %3102  ;;  %3112 = vlog2.f32 %v2422_v49  ;;  %v2425_v53 = vadd.f32 1.0, %v3101_v50  ;;  %v2363_v10 = vsub.f32 0.0, %v2339_v59  ;;  %2586 = vst [vmem:[#allocation9 + $0xa8] sm:$0xff] %v2125_v1  ;;  %v4250_v57 = vsel %vm2212_vm2, %v2119_v22, -1e+30 }
 0xaf2   :  { %3114 = vlog2.f32 %v2423_v17  ;;  %v2426_v9 = vadd.f32 1.0, %v3103_v20  ;;  %v2399_v13 = vmul.f32 1.442695, %v2362_v46  ;;  %v4254_v58 = vsel %vm2212_vm2, %v2123_v48, -1e+30  ;;  %2229 = vmax.xlane.f32.xlu0 %v4250_v57 }
 0xaf3   :  { %3116 = vlog2.f32 %v2425_v53  ;;  %v2401_v3 = vmul.f32 1.442695, %v2363_v10  ;;  %v2365_v60 = vsub.f32 0.0, %v2341_v0  ;;  %v2342_v5 = vand.u32 2147483647, %v4246_v56  ;;  %2231 = vmax.xlane.f32.xlu1 %v4254_v58 }
 0xaf4   :  { %3118 = vlog2.f32 %v2426_v9  ;;  %v4260_v37 = vadd.s32 128, %v4158_v27  ;;  %v4263_v26 = vadd.s32 256, %v4158_v27  ;;  %v2302_v2 = vmax.f32 %v4170_v31, 0.0 }
 0xaf5   :  { %3120 = vpow2.f32 %v2399_v13  ;;  %v2405_v24 = vmul.f32 1.442695, %v2365_v60  ;;  %v2366_v36 = vsub.f32 0.0, %v2342_v5  ;;  %v2303_v63 = vmax.f32 %v4174_v33, 0.0 }
 0xaf6   :  { %v3105_v6 = vpop.eup %3104  ;;  %3122 = vpow2.f32 %v2401_v3  ;;  %vm2296_vm3 = vcmp.lt.s32.totalorder %v4260_v37, 160  ;;  %vm2300_vm4 = vcmp.lt.s32.totalorder %v4263_v26, 320  ;;  %v2305_v51 = vmax.f32 %v4180_v4, 0.0 }
 0xaf7   :  { %v3107_v14 = vpop.eup %3106  ;;  %v2428_v18 = vadd.f32 1.0, %v3105_v6  ;;  %v2407_v43 = vmul.f32 1.442695, %v2366_v36  ;;  %v2306_v48 = vmax.f32 %v4185_v16, 0.0  ;;  %v2308_v13 = vmax.f32 %v4201_v47, 0.0 }
 0xaf8   :  { %v2429_v38 = vadd.f32 1.0, %v3107_v14  ;;  %v3109_v52 = vpop.eup %3108  ;;  %v2309_v60 = vmax.f32 %v4205_v11, 0.0  ;;  %v2311_v36 = vmax.f32 %v4211_v12, 0.0 }
 0xaf9   :  { %3124 = vlog2.f32 %v2428_v18  ;;  %v3111_v41 = vpop.eup %3110  ;;  %v2431_v42 = vadd.f32 1.0, %v3109_v52 }
 0xafa   :  { %3126 = vlog2.f32 %v2429_v38  ;;  %v2432_v45 = vadd.f32 1.0, %v3111_v41 }
 0xafb   :  { %v3113_v44 = vpop.eup %3112  ;;  %3128 = vpow2.f32 %v2405_v24 }
 0xafc   :  { %v3115_v32 = vpop.eup %3114  ;;  %v2448_v25 = vmul.f32 0.6931472, %v3113_v44  ;;  %3130 = vlog2.f32 %v2431_v42  ;;  %v2312_v42 = vmax.f32 %v4215_v19, 0.0 }
 0xafd   :  { %v3117_v61 = vpop.eup %3116  ;;  %v2450_v7 = vmul.f32 0.6931472, %v3115_v32  ;;  %3132 = vlog2.f32 %v2432_v45 }
 0xafe   :  { %v3119_v22 = vpop.eup %3118  ;;  %v2494_v34 = vadd.f32 %v2448_v25, %v2302_v2  ;;  %v2454_v15 = vmul.f32 0.6931472, %v3117_v61  ;;  %3134 = vpow2.f32 %v2407_v43  ;;  %v2314_v61 = vmax.f32 %v4230_v30, 0.0 }
 0xaff   :  { %v3121_v49 = vpop.eup %3120  ;;  %v2495_v59 = vadd.f32 %v2450_v7, %v2303_v63  ;;  %v2456_v21 = vmul.f32 0.6931472, %v3119_v22  ;;  %v2315_v7 = vmax.f32 %v4234_v35, 0.0  ;;  %v2318_v35 = vmax.f32 %v4246_v56, 0.0 }
 0xb00   :  { %v3123_v50 = vpop.eup %3122  ;;  %v2542_v17 = vsel %vm2296_vm3, %v4170_v31, %v2494_v34  ;;  %v2497_v46 = vadd.f32 %v2454_v15, %v2305_v51  ;;  %v2434_v33 = vadd.f32 1.0, %v3121_v49 }
 0xb01   :  { %2567 = vst [vmem:[#allocation9 + $0x10] sm:$0xff] %v2542_v17  ;;  %v2519_v20 = vsel %vm2300_vm4, %v2495_v59, 0.0  ;;  %v2498_v53 = vadd.f32 %v2456_v21, %v2306_v48  ;;  %v2435_v10 = vadd.f32 1.0, %v3123_v50  ;;  %v2317_v59 = vmax.f32 %v4241_v54, 0.0 }
 0xb02   :  { %2568 = vst [vmem:[#allocation9 + $0x18] sm:$0xff] %v2519_v20  ;;  %v2545_v1 = vsel %vm2296_vm3, %v4180_v4, %v2497_v46  ;;  %3136 = vlog2.f32 %v2434_v33 }
 0xb03   :  { %v3125_v16 = vpop.eup %3124  ;;  %2571 = vst [vmem:[#allocation9 + $0x30] sm:$0xff] %v2545_v1  ;;  %v2522_v9 = vsel %vm2300_vm4, %v2498_v53, 0.0  ;;  %3138 = vlog2.f32 %v2435_v10 }
 0xb04   :  { %v3127_v31 = vpop.eup %3126  ;;  %2572 = vst [vmem:[#allocation9 + $0x38] sm:$0xff] %v2522_v9  ;;  %v2460_v3 = vmul.f32 0.6931472, %v3125_v16 }
 0xb05   :  { %v3129_v0 = vpop.eup %3128  ;;  %v2462_v5 = vmul.f32 0.6931472, %v3127_v31 }
 0xb06   :  { %v3131_v6 = vpop.eup %3130  ;;  %v2500_v14 = vadd.f32 %v2460_v3, %v2308_v13  ;;  %v2437_v18 = vadd.f32 1.0, %v3129_v0 }
 0xb07   :  { %v3133_v4 = vpop.eup %3132  ;;  %v2501_v24 = vadd.f32 %v2462_v5, %v2309_v60  ;;  %v2466_v38 = vmul.f32 0.6931472, %v3131_v6 }
 0xb08   :  { %v3135_v52 = vpop.eup %3134  ;;  %v2548_v41 = vsel %vm2296_vm3, %v4201_v47, %v2500_v14  ;;  %v2468_v43 = vmul.f32 0.6931472, %v3133_v4  ;;  %3140 = vlog2.f32 %v2437_v18 }
 0xb09   :  { %2575 = vst [vmem:[#allocation9 + $0x50] sm:$0xff] %v2548_v41  ;;  %v2525_v11 = vsel %vm2300_vm4, %v2501_v24, 0.0  ;;  %v2503_v44 = vadd.f32 %v2466_v38, %v2311_v36  ;;  %v2438_v45 = vadd.f32 1.0, %v3135_v52 }
 0xb0a   :  { %2576 = vst [vmem:[#allocation9 + $0x58] sm:$0xff] %v2525_v11  ;;  %v2504_v32 = vadd.f32 %v2468_v43, %v2312_v42 }
 0xb0b   :  { %v2551_v2 = vsel %vm2296_vm3, %v4211_v12, %v2503_v44  ;;  %3142 = vlog2.f32 %v2438_v45 }
 0xb0c   :  { %v3137_v25 = vpop.eup %3136  ;;  %2579 = vst [vmem:[#allocation9 + $0x70] sm:$0xff] %v2551_v2  ;;  %v2528_v47 = vsel %vm2300_vm4, %v2504_v32, 0.0 }
 0xb0d   :  { %v3139_v19 = vpop.eup %3138  ;;  %2580 = vst [vmem:[#allocation9 + $0x78] sm:$0xff] %v2528_v47  ;;  %v2472_v63 = vmul.f32 0.6931472, %v3137_v25 }
 0xb0e   :  { %v2474_v22 = vmul.f32 0.6931472, %v3139_v19 }
 0xb0f   :  { %v2506_v34 = vadd.f32 %v2472_v63, %v2314_v61 }
 0xb10   :  { %v2507_v51 = vadd.f32 %v2474_v22, %v2315_v7 }
 0xb11   :  { %v2554_v12 = vsel %vm2296_vm3, %v4230_v30, %v2506_v34 }
 0xb12   :  { %v3141_v15 = vpop.eup %3140  ;;  %2583 = vst [vmem:[#allocation9 + $0x90] sm:$0xff] %v2554_v12  ;;  %v2531_v49 = vsel %vm2300_vm4, %v2507_v51, 0.0 }
 0xb13   :  { %2584 = vst [vmem:[#allocation9 + $0x98] sm:$0xff] %v2531_v49  ;;  %v2478_v48 = vmul.f32 0.6931472, %v3141_v15 }
 0xb15   :  { %v3143_v21 = vpop.eup %3142  ;;  %v2509_v50 = vadd.f32 %v2478_v48, %v2317_v59 }
 0xb16   :  { %v2480_v17 = vmul.f32 0.6931472, %v3143_v21 }
 0xb17   :  { %v2557_v46 = vsel %vm2296_vm3, %v4241_v54, %v2509_v50 }
 0xb18   :  { %2587 = vst [vmem:[#allocation9 + $0xb0] sm:$0xff] %v2557_v46  ;;  %v2510_v30 = vadd.f32 %v2480_v17, %v2318_v35 }
 0xb1a   :  { %v2534_v33 = vsel %vm2300_vm4, %v2510_v30, 0.0 }
 0xb1b   :  { %2588 = vst [vmem:[#allocation9 + $0xb8] sm:$0xff] %v2534_v33 }
 0xb6b   :  { %v2128_v20 = vpop.f32.mrb[60].mxu1  ;;  %v2201_v53 = vpop.f32.mrb[68].mxu0 }
 0xb6c   :  { %v4310_v10 = vadd.f32 %v2201_v53, %v4155_v40  ;;  %v2130_v1 = vpop.f32.mrb[61].mxu1  ;;  %v2203_v16 = vpop.f32.mrb[69].mxu0  ;;  %v2129_v56 = vadd.f32 %v2128_v20, %v4151_v39 }
 0xb6d   :  { %v2131_v9 = vadd.f32 %v2130_v1, %v4162_v28  ;;  %v4315_v31 = vadd.f32 %v2203_v16, %v4166_v29  ;;  %v2132_v54 = vpop.f32.mrb[62].mxu1  ;;  %v2205_v13 = vpop.f32.mrb[70].mxu0 }
 0xb6e   :  { %v2344_v3 = vand.u32 2147483647, %v4310_v10  ;;  %v2222_v0 = vpop.xlane.xlu0 %2221  ;;  %v4319_v60 = vadd.f32 %v2205_v13, %v4155_v40  ;;  %v2134_v5 = vpop.f32.mrb[63].mxu1  ;;  %v2133_v18 = vadd.f32 %v2132_v54, %v4151_v39  ;;  %v2320_v1 = vmax.f32 %v4310_v10, 0.0 }
 0xb6f   :  { %2590 = vst [vmem:[#allocation9 + $0xc8] sm:$0xff] %v2131_v9  ;;  %v2345_v6 = vand.u32 2147483647, %v4315_v31  ;;  %v2237_v14 = vsub.f32 %v4190_v62, %v2222_v0  ;;  %v2135_v4 = vadd.f32 %v2134_v5, %v4162_v28  ;;  %v2207_v24 = vpop.f32.mrb[71].mxu0  ;;  %v2224_v36 = vpop.xlane.xlu1 %2223  ;;  %v4332_v62 = vsel %vm2212_vm2, %v2129_v56, -1e+30 }
 0xb70   :  { %v2368_v38 = vsub.f32 0.0, %v2344_v3  ;;  %v2347_v52 = vand.u32 2147483647, %v4319_v60  ;;  %v4327_v41 = vadd.f32 %v2207_v24, %v4166_v29  ;;  %v2238_v43 = vsub.f32 %v4196_v8, %v2224_v36  ;;  %2233 = vmax.xlane.f32.xlu0 %v4332_v62 }
 0xb71   :  { %v2369_v40 = vsub.f32 0.0, %v2345_v6  ;;  %v2245_v42 = vmul.f32 1.442695, %v2237_v14  ;;  %2594 = vst [vmem:[#allocation9 + $0xe8] sm:$0xff] %v2135_v4  ;;  %v4338_v29 = vsel %vm2212_vm2, %v2133_v18, -1e+30 }
 0xb72   :  { %v2411_v39 = vmul.f32 1.442695, %v2368_v38  ;;  %v2371_v11 = vsub.f32 0.0, %v2347_v52  ;;  %v2348_v28 = vand.u32 2147483647, %v4327_v41  ;;  %2235 = vmax.xlane.f32.xlu1 %v4338_v29  ;;  %v2323_v54 = vmax.f32 %v4319_v60, 0.0 }
 0xb73   :  { %v2413_v44 = vmul.f32 1.442695, %v2369_v40  ;;  %3144 = vpow2.f32 %v2245_v42  ;;  %v2247_v45 = vmul.f32 1.442695, %v2238_v43  ;;  %v2324_v14 = vmax.f32 %v4327_v41, 0.0 }
 0xb74   :  { %3146 = vpow2.f32 %v2411_v39  ;;  %v2417_v32 = vmul.f32 1.442695, %v2371_v11  ;;  %v2372_v8 = vsub.f32 0.0, %v2348_v28 }
 0xb75   :  { %3148 = vpow2.f32 %v2413_v44 }
 0xb76   :  { %3150 = vpow2.f32 %v2417_v32  ;;  %v2419_v2 = vmul.f32 1.442695, %v2372_v8  ;;  %v2226_v25 = vpop.xlane.xlu0 %2225 }
 0xb77   :  { %3152 = vpow2.f32 %v2247_v45  ;;  %v2239_v47 = vsub.f32 %v4219_v23, %v2226_v25  ;;  %v2228_v19 = vpop.xlane.xlu1 %2227 }
 0xb78   :  { %3154 = vpow2.f32 %v2419_v2  ;;  %v2240_v61 = vsub.f32 %v4225_v55, %v2228_v19 }
 0xb79   :  { %v2249_v63 = vmul.f32 1.442695, %v2239_v47 }
 0xb7a   :  { %v2251_v27 = vmul.f32 1.442695, %v2240_v61 }
 0xb7b   :  { %3156 = vpow2.f32 %v2249_v63 }
 0xb7c   :  { %3158 = vpow2.f32 %v2251_v27 }
 0xb7d   :  { %v4343_v7 = vpop.eup %3144 }
 0xb7e   :  { %v3147_v22 = vpop.eup %3146  ;;  %2261 = vadd.xlane.f32.xlu0 %v4343_v7 }
 0xb7f   :  { %v3149_v34 = vpop.eup %3148  ;;  %v2440_v51 = vadd.f32 1.0, %v3147_v22  ;;  %v2230_v55 = vpop.xlane.xlu0 %2229 }
 0xb80   :  { %v3151_v12 = vpop.eup %3150  ;;  %v2441_v15 = vadd.f32 1.0, %v3149_v34  ;;  %v2232_v48 = vpop.xlane.xlu1 %2231  ;;  %v2241_v50 = vsub.f32 %v4250_v57, %v2230_v55 }
 0xb81   :  { %v4346_v49 = vpop.eup %3152  ;;  %3160 = vlog2.f32 %v2440_v51  ;;  %v2443_v23 = vadd.f32 1.0, %v3151_v12  ;;  %v2242_v35 = vsub.f32 %v4254_v58, %v2232_v48  ;;  %v2321_v58 = vmax.f32 %v4315_v31, 0.0 }
 0xb82   :  { %v3155_v59 = vpop.eup %3154  ;;  %3162 = vlog2.f32 %v2441_v15  ;;  %2263 = vadd.xlane.f32.xlu1 %v4346_v49  ;;  %v2253_v46 = vmul.f32 1.442695, %v2241_v50 }
 0xb83   :  { %3164 = vlog2.f32 %v2443_v23  ;;  %v2444_v21 = vadd.f32 1.0, %v3155_v59  ;;  %v2255_v30 = vmul.f32 1.442695, %v2242_v35 }
 0xb85   :  { %v4351_v17 = vpop.eup %3156  ;;  %3166 = vlog2.f32 %v2444_v21 }
 0xb86   :  { %v4353_v33 = vpop.eup %3158  ;;  %2265 = vadd.xlane.f32.xlu0 %v4351_v17  ;;  %3168 = vpow2.f32 %v2253_v46 }
 0xb87   :  { %2267 = vadd.xlane.f32.xlu1 %v4353_v33  ;;  %3170 = vpow2.f32 %v2255_v30 }
 0xb8b   :  { %v3161_v20 = vpop.eup %3160 }
 0xb8c   :  { %v3163_v53 = vpop.eup %3162  ;;  %v2484_v57 = vmul.f32 0.6931472, %v3161_v20 }
 0xb8d   :  { %v3165_v16 = vpop.eup %3164  ;;  %v2486_v56 = vmul.f32 0.6931472, %v3163_v53 }
 0xb8e   :  { %v2512_v9 = vadd.f32 %v2484_v57, %v2320_v1  ;;  %v2490_v13 = vmul.f32 0.6931472, %v3165_v16 }
 0xb8f   :  { %v3167_v3 = vpop.eup %3166  ;;  %v2513_v0 = vadd.f32 %v2486_v56, %v2321_v58 }
 0xb90   :  { %v2560_v5 = vsel %vm2296_vm3, %v4310_v10, %v2512_v9  ;;  %v2515_v6 = vadd.f32 %v2490_v13, %v2323_v54  ;;  %v2492_v18 = vmul.f32 0.6931472, %v3167_v3  ;;  %v3169_v4 = vpop.eup %3168 }
 0xb91   :  { %2591 = vst [vmem:[#allocation9 + $0xd0] sm:$0xff] %v2560_v5  ;;  %v2537_v31 = vsel %vm2300_vm4, %v2513_v0, 0.0  ;;  %v3171_v24 = vpop.eup %3170  ;;  %2269 = vadd.xlane.f32.xlu0 %v3169_v4 }
 0xb92   :  { %2592 = vst [vmem:[#allocation9 + $0xd8] sm:$0xff] %v2537_v31  ;;  %v2563_v36 = vsel %vm2296_vm3, %v4319_v60, %v2515_v6  ;;  %v2516_v38 = vadd.f32 %v2492_v18, %v2324_v14  ;;  %2271 = vadd.xlane.f32.xlu1 %v3171_v24 }
 0xb93   :  { %2595 = vst [vmem:[#allocation9 + $0xf0] sm:$0xff] %v2563_v36 }
 0xb94   :  { %v2540_v10 = vsel %vm2300_vm4, %v2516_v38, 0.0 }
 0xb95   :  { %2596 = vst [vmem:[#allocation9 + $0xf8] sm:$0xff] %v2540_v10 }
 0xbfd   :  { %v2234_v52 = vpop.xlane.xlu0 %2233 }
 0xbfe   :  { %v2243_v41 = vsub.f32 %v4332_v62, %v2234_v52 }
 0xbff   :  { %v2236_v40 = vpop.xlane.xlu1 %2235 }
 0xc00   :  { %v2257_v42 = vmul.f32 1.442695, %v2243_v41  ;;  %v2244_v43 = vsub.f32 %v4338_v29, %v2236_v40 }
 0xc02   :  { %3172 = vpow2.f32 %v2257_v42  ;;  %v2259_v39 = vmul.f32 1.442695, %v2244_v43 }
 0xc04   :  { %3174 = vpow2.f32 %v2259_v39 }
 0xc0b   :  { %v2262_v37 = vpop.xlane.xlu0 %2261 }
 0xc0c   :  { %3176 = vrcp.f32 %v2262_v37  ;;  %v4373_v60 = vpop.eup %3172 }
 0xc0d   :  { %2273 = vadd.xlane.f32.xlu0 %v4373_v60 }
 0xc0e   :  { %v4376_v26 = vpop.eup %3174 }
 0xc0f   :  { %v2264_v11 = vpop.xlane.xlu1 %2263  ;;  %2275 = vadd.xlane.f32.xlu1 %v4376_v26 }
 0xc10   :  { %3178 = vrcp.f32 %v2264_v11 }
 0xc13   :  { %v2266_v62 = vpop.xlane.xlu0 %2265 }
 0xc14   :  { %3180 = vrcp.f32 %v2266_v62  ;;  %v2268_v28 = vpop.xlane.xlu1 %2267 }
 0xc15   :  { %3182 = vrcp.f32 %v2268_v28 }
 0xc16   :  { %v3177_v44 = vpop.eup %3176 }
 0xc17   :  { %v2278_v45 = vmul.f32 %v3177_v44, %v4343_v7 }
 0xc19   :  { %2565 = vst [vmem:[#allocation9] sm:$0xff] %v2278_v45 }
 0xc1a   :  { %v3179_v29 = vpop.eup %3178 }
 0xc1b   :  { %v2280_v32 = vmul.f32 %v3179_v29, %v4346_v49 }
 0xc1d   :  { %2569 = vst [vmem:[#allocation9 + $0x20] sm:$0xff] %v2280_v32 }
 0xc1e   :  { %v3181_v8 = vpop.eup %3180  ;;  %v2270_v47 = vpop.xlane.xlu0 %2269 }
 0xc1f   :  { %v3183_v2 = vpop.eup %3182  ;;  %v2282_v25 = vmul.f32 %v3181_v8, %v4351_v17  ;;  %3184 = vrcp.f32 %v2270_v47  ;;  %v2272_v61 = vpop.xlane.xlu1 %2271 }
 0xc20   :  { %v2284_v19 = vmul.f32 %v3183_v2, %v4353_v33  ;;  %3186 = vrcp.f32 %v2272_v61 }
 0xc21   :  { %2573 = vst [vmem:[#allocation9 + $0x40] sm:$0xff] %v2282_v25 }
 0xc22   :  { %2577 = vst [vmem:[#allocation9 + $0x60] sm:$0xff] %v2284_v19 }
 0xc29   :  { %v3185_v63 = vpop.eup %3184 }
 0xc2a   :  { %v3187_v27 = vpop.eup %3186  ;;  %v2286_v7 = vmul.f32 %v3185_v63, %v3169_v4 }
 0xc2b   :  { %v2288_v22 = vmul.f32 %v3187_v27, %v3171_v24 }
 0xc2c   :  { %2581 = vst [vmem:[#allocation9 + $0x80] sm:$0xff] %v2286_v7 }
 0xc2d   :  { %2585 = vst [vmem:[#allocation9 + $0xa0] sm:$0xff] %v2288_v22 }
 0xc2e   :  { %3301 = shalt.err (!%p3298_p0)
}
 0xc2f   :  { %s3302_s16 = scalar_lea.hbm %s4432_s11, 128 }
 0xc30   :  { %p3303_p1 = scmp.ne.s32.totalorder %s4432_s11, %s3302_s16  ;;  %p3306_p2 = scmp.lt.u32.totalorder %s3302_s16, %s4432_s11 }
 0xc32   :  { %p3308_p3 = pnand %p3306_p2, %p3303_p1 }
 0xc34   :  { %3311 = shalt.err (!%p3308_p3)
}
 0xc35   :  { %2618 = dma.vmem_to_hbm [thread:$0]  %s2616_s22, 128, %s4432_s11, [#allocation11]  }
 0xc36   :  { %s3371_s1 = smov [#allocation12]  }
 0xc37   :  { %s2625_s20 = sshll.u32 %s3371_s1, 4  ;;  %s2626_s20 = int_to_ptr.vmem [resolvable:$true] %s2625_s20 }
 0xc38   :  { %s3312_s21 = scalar_lea.vmem %s2626_s20, 128  ;;  %p3317_p5 = scmp.lt.s32.totalorder %s2626_s20, %s2626_s20 }
 0xc39   :  { %p3313_p4 = scmp.ne.s32.totalorder %s2626_s20, %s3312_s21  ;;  %p3318_p6 = scmp.lt.s32.totalorder %s3312_s21, %s3312_s21 }
 0xc3b   :  { %p3319_p7 = por %p3318_p6, %p3317_p5 }
 0xc3d   :  { %p3320_p8 = pnand %p3319_p7, %p3313_p4 }
 0xc3f   :  { %3323 = shalt.err (!%p3320_p8)
}
 0xc40   :  { %s3324_s24 = scalar_lea.hbm %s4433_s12, 128 }
 0xc41   :  { %p3325_p9 = scmp.ne.s32.totalorder %s4433_s12, %s3324_s24  ;;  %p3328_p10 = scmp.lt.u32.totalorder %s3324_s24, %s4433_s12 }
 0xc43   :  { %p3330_p11 = pnand %p3328_p10, %p3325_p9 }
 0xc45   :  { %3333 = shalt.err (!%p3330_p11)
}
 0xc46   :  { %2628 = dma.vmem_to_hbm [thread:$0]  %s2626_s20, 128, %s4433_s12, [#allocation11]  }
 0xc47   :  { %s3372_s27 = smov [#allocation9]  }
 0xc48   :  { %s2602_s28 = sshll.u32 %s3372_s27, 4  ;;  %s2603_s28 = int_to_ptr.vmem [resolvable:$true] %s2602_s28 }
 0xc49   :  { %s3334_s4 = scalar_lea.vmem %s2603_s28, 4096  ;;  %p3339_p13 = scmp.lt.s32.totalorder %s2603_s28, %s2603_s28 }
 0xc4a   :  { %p3335_p12 = scmp.ne.s32.totalorder %s2603_s28, %s3334_s4  ;;  %p3340_p0 = scmp.lt.s32.totalorder %s3334_s4, %s3334_s4 }
 0xc4c   :  { %p3341_p1 = por %p3340_p0, %p3339_p13 }
 0xc4e   :  { %p3342_p2 = pnand %p3341_p1, %p3335_p12 }
 0xc9a   :  { %v2274_v34 = vpop.xlane.xlu0 %2273 }
 0xc9b   :  { %3188 = vrcp.f32 %v2274_v34 }
 0xc9c   :  { %v2276_v51 = vpop.xlane.xlu1 %2275 }
 0xc9d   :  { %3190 = vrcp.f32 %v2276_v51 }
 0xca5   :  { %v3189_v12 = vpop.eup %3188 }
 0xca6   :  { %v2290_v15 = vmul.f32 %v3189_v12, %v4373_v60 }
 0xca7   :  { %v3191_v49 = vpop.eup %3190 }
 0xca8   :  { %2589 = vst [vmem:[#allocation9 + $0xc0] sm:$0xff] %v2290_v15  ;;  %v2292_v23 = vmul.f32 %v3191_v49, %v4376_v26 }
 0xcaa   :  { %2593 = vst [vmem:[#allocation9 + $0xe0] sm:$0xff] %v2292_v23 }
 0xcab   :  { %3345 = shalt.err (!%p3342_p2)
}
 0xcac   :  { %s3346_s7 = scalar_lea.hbm %s4431_s10, 4096 }
 0xcad   :  { %p3347_p3 = scmp.ne.s32.totalorder %s4431_s10, %s3346_s7  ;;  %p3350_p4 = scmp.lt.u32.totalorder %s3346_s7, %s4431_s10 }
 0xcaf   :  { %p3352_p5 = pnand %p3350_p4, %p3347_p3 }
 0xcb1   :  { %3355 = shalt.err (!%p3352_p5)
}
 0xcb2   :  { %s3373_s15 = smov 512   ;;  %s3374_s16 = smov 32  }
 0xcb3   :  { %2608 = dma.vmem_to_hbm [thread:$0]  %s2603_s28, 4096, %s4431_s10, [#allocation5], %s3373_s15, %s3373_s15, %s3374_s16  }
 0xcb4   :  { %3360 = dma.done.wait [#allocation5], 4096  }
 0xcb5   :  { %3361 = vsyncadd [#allocation5], 4294963200 }
 0xcb6   :  { %3362 = dma.done.wait [#allocation11], 256  }
 0xcb7   :  { %3363 = vsyncadd [#allocation11], 4294967040 }
 0xcb8   :  { %2638 = vsyncpa [#allocation4], 1 }
 0xcb9   :  { %2639 = vsyncpa [#allocation7], 1 }
 0xcba   :  { %2640 = vsyncpa [#allocation5], 1 }
 0xcbb   :  { %2641 = vsyncpa [#allocation11], 1 }

</bundles_post_ra>
